<compile_context>
chip_gen: v5e
topology: v5e:2x2
jax: 0.10.0
libtpu: 0.0.40
codegen_flags: <defaults>
</compile_context>

<pallas_src>
import numpy as np
import jax
import jax.numpy as jnp
from jax import lax
from jax.experimental import pallas as pl
from jax.experimental.pallas import tpu as pltpu

NBINS = 256  # uint8 intensity bins


def _round_up(x, m):
    return (x + m - 1) // m * m


# --------------------------- pass 1: histogram + LUT -------------------------------
def _make_hist_lut_kernel(npix_valid, total_pixels):
    """npix_valid: valid pixels per (image, channel) slab (rest of the lane axis is pad).
    total_pixels: N * H * W (denominator of the source CDF)."""
    inv_total = 1.0 / float(total_pixels)

    def kernel(tq_ref, pres_ref, img_ref, lut_ref, acc_ref):
        # tq_ref:   (1, 1, 256)  f32   reference CDF for this channel
        # pres_ref: (1, 1, 256)  f32   1.0 where the reference histogram bin is non-empty
        # img_ref:  (1, 1, 1, T) uint8 source pixel tile (lanes)
        # lut_ref:  (1, 256, 1)  f32   per-channel LUT (written at the last tile only)
        # acc_ref:  (256, 1)     int32 running "count(x <= bin)" accumulator
        ni = pl.program_id(1)
        ti = pl.program_id(2)

        @pl.when(jnp.logical_and(ni == 0, ti == 0))
        def _():
            acc_ref[...] = jnp.zeros_like(acc_ref)

        x_row = img_ref[0, 0].astype(jnp.int32)                     # (1, T)
        tile = x_row.shape[1]
        bins_col = lax.broadcasted_iota(jnp.int32, (NBINS, 1), 0)   # (256, 1)
        lane = lax.broadcasted_iota(jnp.int32, (1, tile), 1)        # (1, T)
        valid = (ti * tile + lane) < npix_valid                     # mask out lane padding

        # per-tile CDF counts via the MXU: contraction over the pixel (lane) axis.
        le = jnp.logical_and(x_row <= bins_col, valid)              # (256, T) bool
        ones = jnp.ones((tile, 128), jnp.bfloat16)
        part = jnp.dot(le.astype(jnp.bfloat16), ones,
                       preferred_element_type=jnp.float32)          # (256, 128), cols identical
        acc_ref[...] += part[:, :1].astype(jnp.int32)               # exact int32 counts

        last = jnp.logical_and(ni == pl.num_programs(1) - 1,
                               ti == pl.num_programs(2) - 1)

        @pl.when(last)
        def _():
            # ---- np.interp(src_quantiles, tmpl_quantiles, tmpl_values) for all 256 bins.
            q = acc_ref[...].astype(jnp.float32) * jnp.float32(inv_total)   # (256, 1)
            tq_row = tq_ref[0]                                      # (1, 256)
            present_row = pres_ref[0] > jnp.float32(0.5)            # (1, 256) bool
            v_row = lax.broadcasted_iota(jnp.int32, (1, NBINS), 1).astype(jnp.float32)

            LO_S = jnp.float32(-1.0)      # sentinel below any value / quantile
            HI_S = jnp.float32(512.0)     # sentinel above any value
            Q_HI_S = jnp.float32(2.0)     # sentinel above any quantile

            le_mask = jnp.logical_and(tq_row <= q, present_row)     # (256, 256)
            ge_mask = jnp.logical_and(tq_row >= q, present_row)     # (256, 256)

            v_lo_raw = jnp.max(jnp.where(le_mask, v_row, LO_S), axis=1, keepdims=True)
            q_lo_raw = jnp.max(jnp.where(le_mask, tq_row, LO_S), axis=1, keepdims=True)
            v_hi_raw = jnp.min(jnp.where(ge_mask, v_row, HI_S), axis=1, keepdims=True)
            q_hi_raw = jnp.min(jnp.where(ge_mask, tq_row, Q_HI_S), axis=1, keepdims=True)

            first_v = jnp.min(jnp.where(present_row, v_row, HI_S), axis=1, keepdims=True)
            first_q = jnp.min(jnp.where(present_row, tq_row, Q_HI_S), axis=1, keepdims=True)
            last_v = jnp.max(jnp.where(present_row, v_row, LO_S), axis=1, keepdims=True)
            last_q = jnp.max(jnp.where(present_row, tq_row, LO_S), axis=1, keepdims=True)

            any_lo = v_lo_raw > LO_S
            any_hi = v_hi_raw < HI_S

            v_lo = jnp.where(any_lo, v_lo_raw, first_v)
            q_lo = jnp.where(any_lo, q_lo_raw, first_q)
            v_hi = jnp.where(any_hi, v_hi_raw, last_v)
            q_hi = jnp.where(any_hi, q_hi_raw, last_q)

            denom = q_hi - q_lo
            frac = jnp.where(denom > 0.0, (q - q_lo) / denom, jnp.float32(0.0))
            lut_col = v_lo + (v_hi - v_lo) * frac                   # (256, 1)
            lut_ref[...] = lut_col[None].astype(lut_ref.dtype)      # (1, 256, 1)

    return kernel


# --------------------------- pass 2: LUT gather -------------------------------------
def _gather_kernel(lut_ref, img_ref, out_ref):
    # lut_ref: (1, 256, 1)  f32
    # img_ref: (1, 1, 1, T) uint8
    # out_ref: (1, 1, 1, T) f32
    x_row = img_ref[0, 0].astype(jnp.int32)                         # (1, T)
    lut_col = lut_ref[0]                                            # (256, 1)
    bins_col = lax.broadcasted_iota(jnp.int32, (NBINS, 1), 0)       # (256, 1)
    oh = x_row == bins_col                                          # (256, T) bool
    out_row = jnp.sum(jnp.where(oh, lut_col, jnp.float32(0.0)),
                      axis=0, keepdims=True)                        # (1, T)
    out_ref[...] = out_row[None, None].astype(out_ref.dtype)


# --------------------------------- wrapper -------------------------------------------
def histo_match_pallas(img, ref, *, tile_lanes=1024):
    """Histogram-match `img` to `ref`, channel-wise.

    img: (C, H, W) or (N, C, H, W), integer-valued in [0, 255]
    ref: (C, Hr, Wr), integer-valued in [0, 255]
    returns float32 array with the same shape as `img`.
    """
    orig_shape = img.shape
    orig_ndim = img.ndim
    if orig_ndim == 4:
        n, c, h, w = img.shape
    elif orig_ndim == 3:
        c, h, w = img.shape
        n = 1
    else:
        raise ValueError("img must be CHW or NCHW")
    assert c == ref.shape[0], "channel count of image and reference must match"

    hw = h * w
    total_pixels = n * hw

    # ---- reference-side CDF: fixed image, computed once in plain JAX (tiny). ----
    ref_flat = ref.reshape(c, -1).astype(jnp.int32)
    nref = ref_flat.shape[1]
    ref_counts = jax.vmap(lambda r: jnp.bincount(r, length=NBINS))(ref_flat)      # (C, 256)
    ref_cdf = (jnp.cumsum(ref_counts, axis=1).astype(jnp.float32)
               / jnp.float32(nref)).reshape(c, 1, NBINS)
    ref_present = (ref_counts > 0).astype(jnp.float32).reshape(c, 1, NBINS)

    # ---- source pixels: NCHW walked directly (free reshape, no transpose), uint8. ----
    img4 = img.reshape(n, c, 1, hw).astype(jnp.uint8)
    tile = min(tile_lanes, _round_up(hw, 128))
    hwp = _round_up(hw, tile)
    if hwp != hw:
        img4 = jnp.pad(img4, ((0, 0), (0, 0), (0, 0), (0, hwp - hw)))
    tiles = hwp // tile
    grid = (c, n, tiles)

    # ---- pass 1: per-channel histogram accumulation + LUT ----
    lut = pl.pallas_call(
        _make_hist_lut_kernel(hw, total_pixels),
        out_shape=jax.ShapeDtypeStruct((c, NBINS, 1), jnp.float32),
        grid_spec=pltpu.PrefetchScalarGridSpec(
            num_scalar_prefetch=0,
            grid=grid,
            in_specs=[
                pl.BlockSpec((1, 1, NBINS), lambda ci, ni, ti: (ci, 0, 0)),
                pl.BlockSpec((1, 1, NBINS), lambda ci, ni, ti: (ci, 0, 0)),
                pl.BlockSpec((1, 1, 1, tile), lambda ci, ni, ti: (ni, ci, 0, ti)),
            ],
            out_specs=pl.BlockSpec((1, NBINS, 1), lambda ci, ni, ti: (ci, 0, 0)),
            scratch_shapes=[pltpu.VMEM((NBINS, 1), jnp.int32)],
        ),
        compiler_params=pltpu.CompilerParams(
            dimension_semantics=("parallel", "arbitrary", "arbitrary"),
        ),
    )(ref_cdf, ref_present, img4)

    # ---- pass 2: apply LUT to every pixel tile (lane-dense f32 output tiles) ----
    out4 = pl.pallas_call(
        _gather_kernel,
        out_shape=jax.ShapeDtypeStruct((n, c, 1, hwp), jnp.float32),
        grid_spec=pltpu.PrefetchScalarGridSpec(
            num_scalar_prefetch=0,
            grid=grid,
            in_specs=[
                pl.BlockSpec((1, NBINS, 1), lambda ci, ni, ti: (ci, 0, 0)),
                pl.BlockSpec((1, 1, 1, tile), lambda ci, ni, ti: (ni, ci, 0, ti)),
            ],
            out_specs=pl.BlockSpec((1, 1, 1, tile), lambda ci, ni, ti: (ni, ci, 0, ti)),
        ),
        compiler_params=pltpu.CompilerParams(
            dimension_semantics=("parallel", "parallel", "arbitrary"),
        ),
    )(lut, img4)

    out = out4[..., :hw]
    if orig_ndim == 4:
        return out.reshape(n, c, h, w)
    return out.reshape(orig_shape)


# ----------------------------- numpy reference ------------------------------------
def _match_cumulative_cdf_np(source, template):
    src_values, src_unique_indices, src_counts = np.unique(
        source.ravel(), return_inverse=True, return_counts=True
    )
    tmpl_values, tmpl_counts = np.unique(template.ravel(), return_counts=True)
    src_quantiles = np.cumsum(src_counts) / source.size
    tmpl_quantiles = np.cumsum(tmpl_counts) / template.size
    interp_a_values = np.interp(src_quantiles, tmpl_quantiles, tmpl_values)
    return interp_a_values[src_unique_indices].reshape(source.shape)


def match_histograms_np(img, ref):
    refc = ref.reshape(ref.shape[0], -1)
    if img.ndim == 4:
        n, c, h, w = img.shape
        src = np.transpose(img, (1, 0, 2, 3)).reshape(c, -1)
    else:
        c = img.shape[0]
        src = img.reshape(c, -1)
    out = np.empty(src.shape, dtype=np.float64)
    for ch in range(c):
        out[ch] = _match_cumulative_cdf_np(src[ch], refc[ch])
    if img.ndim == 4:
        return np.transpose(out.reshape(c, n, h, w), (1, 0, 2, 3))
    return out.reshape(img.shape)


if __name__ == "__main__":
    key = jax.random.PRNGKey(0)
    k_img, k_ref, k_img3 = jax.random.split(key, 3)

    # NCHW uint8-valued image and deterministic synthetic uint8 reference image.
    img = jax.random.randint(k_img, (2, 3, 16, 16), 0, 256, dtype=jnp.int32).astype(jnp.uint8)
    ref = jax.random.randint(k_ref, (3, 8, 16), 0, 256, dtype=jnp.int32).astype(jnp.uint8)

    out = jax.block_until_ready(histo_match_pallas(img, ref))
    expected = match_histograms_np(np.asarray(img, dtype=np.int64),
                                   np.asarray(ref, dtype=np.int64))
    np.testing.assert_allclose(np.asarray(out), expected, rtol=1e-4, atol=1e-2)

    # CHW (3-D) path
    img3 = jax.random.randint(k_img3, (3, 16, 16), 0, 256, dtype=jnp.int32).astype(jnp.uint8)
    out3 = jax.block_until_ready(histo_match_pallas(img3, ref))
    expected3 = match_histograms_np(np.asarray(img3, dtype=np.int64),
                                    np.asarray(ref, dtype=np.int64))
    np.testing.assert_allclose(np.asarray(out3), expected3, rtol=1e-4, atol=1e-2)

    print("KERNEL_OK")
</pallas_src>

<mosaic_0001>
module attributes {stable_mosaic.version = 11 : i64} {
  func.func @kernel(%arg0: i32, %arg1: i32, %arg2: i32, %arg3: memref<1x1x256xf32, #tpu.memory_space<vmem>>, %arg4: memref<1x1x256xf32, #tpu.memory_space<vmem>>, %arg5: memref<1x1x1x256xi8, #tpu.memory_space<vmem>>, %arg6: memref<1x256x1xf32, #tpu.memory_space<vmem>>, %arg7: memref<256x1xi32, #tpu.memory_space<vmem>>) attributes {dimension_semantics = [#tpu.dimension_semantics<parallel>, #tpu.dimension_semantics<arbitrary>, #tpu.dimension_semantics<arbitrary>], iteration_bounds = array<i64: 3, 2, 1>, scalar_prefetch = 0 : i64, scratch_operands = 1 : i64, tpu.core_type = #tpu.core_type<tc>, window_params = [{transform_indices = @transform_0, window_bounds = array<i64: 1, 1, 256>}, {transform_indices = @transform_1, window_bounds = array<i64: 1, 1, 256>}, {transform_indices = @transform_2, window_bounds = array<i64: 1, 1, 1, 256>}, {transform_indices = @transform_3, window_bounds = array<i64: 1, 256, 1>}]} {
    %c0_i32 = arith.constant 0 : i32
    %0 = arith.cmpi eq, %arg1, %c0_i32 : i32
    %c0_i32_0 = arith.constant 0 : i32
    %1 = arith.cmpi eq, %arg2, %c0_i32_0 : i32
    %2 = arith.andi %0, %1 : i1
    %3 = arith.extui %2 : i1 to i32
    %c0_i32_1 = arith.constant 0 : i32
    %4 = arith.cmpi ne, %3, %c0_i32_1 : i32
    scf.if %4 {
      %c0_i32_13 = arith.constant 0 : i32
      %35 = vector.broadcast %c0_i32_13 : i32 to vector<256x1xi32>
      %c0_14 = arith.constant 0 : index
      %c0_15 = arith.constant 0 : index
      %36 = vector.load %arg7[%c0_14, %c0_15] : memref<256x1xi32, #tpu.memory_space<vmem>>, vector<256x1xi32>
      tpu.vector_store %arg7[%c0_14, %c0_15], %35 {strides = array<i32>} : memref<256x1xi32, #tpu.memory_space<vmem>>, vector<256x1xi32>,
    } else {
    }
    %c0 = arith.constant 0 : index
    %c0_2 = arith.constant 0 : index
    %c0_3 = arith.constant 0 : index
    %c0_4 = arith.constant 0 : index
    %5 = vector.load %arg5[%c0, %c0_2, %c0_3, %c0_4] : memref<1x1x1x256xi8, #tpu.memory_space<vmem>>, vector<1x1x1x256xi8>
    %6 = vector.shape_cast %5 : vector<1x1x1x256xi8> to vector<1x256xi8>
    %7 = arith.extui %6 : vector<1x256xi8> to vector<1x256xi32>
    %8 = tpu.iota {dimensions = array<i32: 0>} : vector<256x1xi32>
    %9 = tpu.iota {dimensions = array<i32: 1>} : vector<1x256xi32>
    %c256_i32 = arith.constant 256 : i32
    %10 = arith.muli %arg2, %c256_i32 : i32
    %11 = vector.broadcast %10 : i32 to vector<1x256xi32>
    %12 = arith.addi %11, %9 : vector<1x256xi32>
    %c256_i32_5 = arith.constant 256 : i32
    %13 = vector.broadcast %c256_i32_5 : i32 to vector<1x256xi32>
    %14 = arith.cmpi slt, %12, %13 : vector<1x256xi32>
    %15 = vector.broadcast %7 : vector<1x256xi32> to vector<256x256xi32>
    %16 = vector.broadcast %8 : vector<256x1xi32> to vector<256x256xi32>
    %17 = arith.cmpi sle, %15, %16 : vector<256x256xi32>
    %18 = vector.broadcast %14 : vector<1x256xi1> to vector<256x256xi1>
    %19 = arith.andi %17, %18 : vector<256x256xi1>
    %cst = arith.constant 1.000000e+00 : bf16
    %20 = vector.broadcast %cst : bf16 to vector<256x128xbf16>
    %21 = arith.extui %19 : vector<256x256xi1> to vector<256x256xi32>
    %22 = arith.sitofp %21 : vector<256x256xi32> to vector<256x256xf32>
    %23 = arith.truncf %22 : vector<256x256xf32> to vector<256x256xbf16>
    %cst_6 = arith.constant dense<0.000000e+00> : vector<256x128xf32>
    %24 = tpu.matmul %23, %20, %cst_6 {dimension_numbers = #tpu.dot_dimension_numbers<[1], [0], [0], [1], [0, 0, 1, 1], [], []>} : vector<256x256xbf16>, vector<256x128xbf16>, vector<256x128xf32> -> vector<256x128xf32>
    %c0_7 = arith.constant 0 : index
    %c0_8 = arith.constant 0 : index
    %25 = vector.load %arg7[%c0_7, %c0_8] : memref<256x1xi32, #tpu.memory_space<vmem>>, vector<256x1xi32>
    %26 = vector.extract_strided_slice %24 {offsets = [0, 0], sizes = [256, 1], strides = [1, 1]} : vector<256x128xf32> to vector<256x1xf32>
    %27 = arith.fptosi %26 : vector<256x1xf32> to vector<256x1xi32>
    %28 = arith.addi %25, %27 : vector<256x1xi32>
    %c0_9 = arith.constant 0 : index
    %c0_10 = arith.constant 0 : index
    %29 = vector.load %arg7[%c0_9, %c0_10] : memref<256x1xi32, #tpu.memory_space<vmem>>, vector<256x1xi32>
    tpu.vector_store %arg7[%c0_9, %c0_10], %28 {strides = array<i32>} : memref<256x1xi32, #tpu.memory_space<vmem>>, vector<256x1xi32>,
    %c1_i32 = arith.constant 1 : i32
    %30 = arith.cmpi eq, %arg1, %c1_i32 : i32
    %c0_i32_11 = arith.constant 0 : i32
    %31 = arith.cmpi eq, %arg2, %c0_i32_11 : i32
    %32 = arith.andi %30, %31 : i1
    %33 = arith.extui %32 : i1 to i32
    %c0_i32_12 = arith.constant 0 : i32
    %34 = arith.cmpi ne, %33, %c0_i32_12 : i32
    scf.if %34 {
      %c0_13 = arith.constant 0 : index
      %c0_14 = arith.constant 0 : index
      %35 = vector.load %arg7[%c0_13, %c0_14] : memref<256x1xi32, #tpu.memory_space<vmem>>, vector<256x1xi32>
      %36 = arith.sitofp %35 : vector<256x1xi32> to vector<256x1xf32>
      %cst_15 = arith.constant 0.001953125 : f32
      %37 = vector.broadcast %cst_15 : f32 to vector<256x1xf32>
      %38 = arith.mulf %36, %37 : vector<256x1xf32>
      %c0_16 = arith.constant 0 : index
      %c0_17 = arith.constant 0 : index
      %c0_18 = arith.constant 0 : index
      %39 = vector.load %arg3[%c0_16, %c0_17, %c0_18] : memref<1x1x256xf32, #tpu.memory_space<vmem>>, vector<1x1x256xf32>
      %40 = vector.shape_cast %39 : vector<1x1x256xf32> to vector<1x256xf32>
      %c0_19 = arith.constant 0 : index
      %c0_20 = arith.constant 0 : index
      %c0_21 = arith.constant 0 : index
      %41 = vector.load %arg4[%c0_19, %c0_20, %c0_21] : memref<1x1x256xf32, #tpu.memory_space<vmem>>, vector<1x1x256xf32>
      %42 = vector.shape_cast %41 : vector<1x1x256xf32> to vector<1x256xf32>
      %cst_22 = arith.constant 5.000000e-01 : f32
      %43 = vector.broadcast %cst_22 : f32 to vector<1x256xf32>
      %44 = arith.cmpf ogt, %42, %43 : vector<1x256xf32>
      %45 = tpu.iota {dimensions = array<i32: 1>} : vector<1x256xi32>
      %46 = arith.sitofp %45 : vector<1x256xi32> to vector<1x256xf32>
      %47 = vector.broadcast %40 : vector<1x256xf32> to vector<256x256xf32>
      %48 = vector.broadcast %38 : vector<256x1xf32> to vector<256x256xf32>
      %49 = arith.cmpf ole, %47, %48 : vector<256x256xf32>
      %50 = vector.broadcast %44 : vector<1x256xi1> to vector<256x256xi1>
      %51 = arith.andi %49, %50 : vector<256x256xi1>
      %52 = vector.broadcast %40 : vector<1x256xf32> to vector<256x256xf32>
      %53 = vector.broadcast %38 : vector<256x1xf32> to vector<256x256xf32>
      %54 = arith.cmpf oge, %52, %53 : vector<256x256xf32>
      %55 = vector.broadcast %44 : vector<1x256xi1> to vector<256x256xi1>
      %56 = arith.andi %54, %55 : vector<256x256xi1>
      %cst_23 = arith.constant -1.000000e+00 : f32
      %57 = vector.shape_cast %46 : vector<1x256xf32> to vector<1x256xf32>
      %58 = vector.broadcast %57 : vector<1x256xf32> to vector<256x256xf32>
      %59 = vector.broadcast %cst_23 : f32 to vector<256x256xf32>
      %60 = arith.select %51, %58, %59 : vector<256x256xi1>, vector<256x256xf32>
      %cst_24 = arith.constant dense<0xFF800000> : vector<256xf32>
      %61 = vector.multi_reduction <maximumf>, %60, %cst_24 [1] : vector<256x256xf32> to vector<256xf32>
      %62 = vector.shape_cast %61 : vector<256xf32> to vector<256x1xf32>
      %cst_25 = arith.constant -1.000000e+00 : f32
      %63 = vector.shape_cast %40 : vector<1x256xf32> to vector<1x256xf32>
      %64 = vector.broadcast %63 : vector<1x256xf32> to vector<256x256xf32>
      %65 = vector.broadcast %cst_25 : f32 to vector<256x256xf32>
      %66 = arith.select %51, %64, %65 : vector<256x256xi1>, vector<256x256xf32>
      %cst_26 = arith.constant dense<0xFF800000> : vector<256xf32>
      %67 = vector.multi_reduction <maximumf>, %66, %cst_26 [1] : vector<256x256xf32> to vector<256xf32>
      %68 = vector.shape_cast %67 : vector<256xf32> to vector<256x1xf32>
      %cst_27 = arith.constant 5.120000e+02 : f32
      %69 = vector.shape_cast %46 : vector<1x256xf32> to vector<1x256xf32>
      %70 = vector.broadcast %69 : vector<1x256xf32> to vector<256x256xf32>
      %71 = vector.broadcast %cst_27 : f32 to vector<256x256xf32>
      %72 = arith.select %56, %70, %71 : vector<256x256xi1>, vector<256x256xf32>
      %cst_28 = arith.constant dense<0x7F800000> : vector<256xf32>
      %73 = vector.multi_reduction <minimumf>, %72, %cst_28 [1] : vector<256x256xf32> to vector<256xf32>
      %74 = vector.shape_cast %73 : vector<256xf32> to vector<256x1xf32>
      %cst_29 = arith.constant 2.000000e+00 : f32
      %75 = vector.shape_cast %40 : vector<1x256xf32> to vector<1x256xf32>
      %76 = vector.broadcast %75 : vector<1x256xf32> to vector<256x256xf32>
      %77 = vector.broadcast %cst_29 : f32 to vector<256x256xf32>
      %78 = arith.select %56, %76, %77 : vector<256x256xi1>, vector<256x256xf32>
      %cst_30 = arith.constant dense<0x7F800000> : vector<256xf32>
      %79 = vector.multi_reduction <minimumf>, %78, %cst_30 [1] : vector<256x256xf32> to vector<256xf32>
      %80 = vector.shape_cast %79 : vector<256xf32> to vector<256x1xf32>
      %cst_31 = arith.constant 5.120000e+02 : f32
      %81 = vector.broadcast %cst_31 : f32 to vector<1x256xf32>
      %82 = arith.select %44, %46, %81 : vector<1x256xi1>, vector<1x256xf32>
      %cst_32 = arith.constant dense<0x7F800000> : vector<1xf32>
      %83 = vector.multi_reduction <minimumf>, %82, %cst_32 [1] : vector<1x256xf32> to vector<1xf32>
      %84 = vector.shape_cast %83 : vector<1xf32> to vector<1x1xf32>
      %cst_33 = arith.constant 2.000000e+00 : f32
      %85 = vector.broadcast %cst_33 : f32 to vector<1x256xf32>
      %86 = arith.select %44, %40, %85 : vector<1x256xi1>, vector<1x256xf32>
      %cst_34 = arith.constant dense<0x7F800000> : vector<1xf32>
      %87 = vector.multi_reduction <minimumf>, %86, %cst_34 [1] : vector<1x256xf32> to vector<1xf32>
      %88 = vector.shape_cast %87 : vector<1xf32> to vector<1x1xf32>
      %cst_35 = arith.constant -1.000000e+00 : f32
      %89 = vector.broadcast %cst_35 : f32 to vector<1x256xf32>
      %90 = arith.select %44, %46, %89 : vector<1x256xi1>, vector<1x256xf32>
      %cst_36 = arith.constant dense<0xFF800000> : vector<1xf32>
      %91 = vector.multi_reduction <maximumf>, %90, %cst_36 [1] : vector<1x256xf32> to vector<1xf32>
      %92 = vector.shape_cast %91 : vector<1xf32> to vector<1x1xf32>
      %cst_37 = arith.constant -1.000000e+00 : f32
      %93 = vector.broadcast %cst_37 : f32 to vector<1x256xf32>
      %94 = arith.select %44, %40, %93 : vector<1x256xi1>, vector<1x256xf32>
      %cst_38 = arith.constant dense<0xFF800000> : vector<1xf32>
      %95 = vector.multi_reduction <maximumf>, %94, %cst_38 [1] : vector<1x256xf32> to vector<1xf32>
      %96 = vector.shape_cast %95 : vector<1xf32> to vector<1x1xf32>
      %cst_39 = arith.constant -1.000000e+00 : f32
      %97 = vector.broadcast %cst_39 : f32 to vector<256x1xf32>
      %98 = arith.cmpf ogt, %62, %97 : vector<256x1xf32>
      %cst_40 = arith.constant 5.120000e+02 : f32
      %99 = vector.broadcast %cst_40 : f32 to vector<256x1xf32>
      %100 = arith.cmpf olt, %74, %99 : vector<256x1xf32>
      %101 = vector.shape_cast %84 : vector<1x1xf32> to vector<1x1xf32>
      %102 = vector.broadcast %101 : vector<1x1xf32> to vector<256x1xf32>
      %103 = arith.select %98, %62, %102 : vector<256x1xi1>, vector<256x1xf32>
      %104 = vector.shape_cast %88 : vector<1x1xf32> to vector<1x1xf32>
      %105 = vector.broadcast %104 : vector<1x1xf32> to vector<256x1xf32>
      %106 = arith.select %98, %68, %105 : vector<256x1xi1>, vector<256x1xf32>
      %107 = vector.shape_cast %92 : vector<1x1xf32> to vector<1x1xf32>
      %108 = vector.broadcast %107 : vector<1x1xf32> to vector<256x1xf32>
      %109 = arith.select %100, %74, %108 : vector<256x1xi1>, vector<256x1xf32>
      %110 = vector.shape_cast %96 : vector<1x1xf32> to vector<1x1xf32>
      %111 = vector.broadcast %110 : vector<1x1xf32> to vector<256x1xf32>
      %112 = arith.select %100, %80, %111 : vector<256x1xi1>, vector<256x1xf32>
      %113 = arith.subf %112, %106 : vector<256x1xf32>
      %cst_41 = arith.constant 0.000000e+00 : f32
      %114 = vector.broadcast %cst_41 : f32 to vector<256x1xf32>
      %115 = arith.cmpf ogt, %113, %114 : vector<256x1xf32>
      %116 = arith.subf %38, %106 : vector<256x1xf32>
      %117 = arith.divf %116, %113 : vector<256x1xf32>
      %cst_42 = arith.constant 0.000000e+00 : f32
      %118 = vector.broadcast %cst_42 : f32 to vector<256x1xf32>
      %119 = arith.select %115, %117, %118 : vector<256x1xi1>, vector<256x1xf32>
      %120 = arith.subf %109, %103 : vector<256x1xf32>
      %121 = arith.mulf %120, %119 : vector<256x1xf32>
      %122 = arith.addf %103, %121 : vector<256x1xf32>
      %123 = vector.shape_cast %122 : vector<256x1xf32> to vector<1x256x1xf32>
      %c0_43 = arith.constant 0 : index
      %c0_44 = arith.constant 0 : index
      %c0_45 = arith.constant 0 : index
      %124 = vector.load %arg6[%c0_43, %c0_44, %c0_45] : memref<1x256x1xf32, #tpu.memory_space<vmem>>, vector<1x256x1xf32>
      tpu.vector_store %arg6[%c0_43, %c0_44, %c0_45], %123 {strides = array<i32>} : memref<1x256x1xf32, #tpu.memory_space<vmem>>, vector<1x256x1xf32>,
    } else {
    }
    return
  }
  func.func @transform_0(%arg0: i32, %arg1: i32, %arg2: i32) -> (i32, i32, i32) {
    %c0_i32 = arith.constant 0 : i32
    %c0_i32_0 = arith.constant 0 : i32
    %c0_i32_1 = arith.constant 0 : i32
    return %arg0, %c0_i32, %c0_i32_0 : i32, i32, i32
  }
  func.func @transform_1(%arg0: i32, %arg1: i32, %arg2: i32) -> (i32, i32, i32) {
    %c0_i32 = arith.constant 0 : i32
    %c0_i32_0 = arith.constant 0 : i32
    %c0_i32_1 = arith.constant 0 : i32
    return %arg0, %c0_i32, %c0_i32_0 : i32, i32, i32
  }
  func.func @transform_2(%arg0: i32, %arg1: i32, %arg2: i32) -> (i32, i32, i32, i32) {
    %c0_i32 = arith.constant 0 : i32
    %c0_i32_0 = arith.constant 0 : i32
    return %arg1, %arg0, %c0_i32, %arg2 : i32, i32, i32, i32
  }
  func.func @transform_3(%arg0: i32, %arg1: i32, %arg2: i32) -> (i32, i32, i32) {
    %c0_i32 = arith.constant 0 : i32
    %c0_i32_0 = arith.constant 0 : i32
    %c0_i32_1 = arith.constant 0 : i32
    return %arg0, %c0_i32, %c0_i32_0 : i32, i32, i32
  }
}

</mosaic_0001>

<bundles_post_ra>
// kernel: tpu_custom_call.1
= control target key start
LH: loop header
LB: loop body
LE: loop exit
PB: predicated region body
PF: predicated region fallthrough
CT: control target
= control target key end

     0   :  { %s3693_s12 = smov 0   ;;  %s3695_s13 = smov 0   ;;  %s8330_s0 = inlined_call_operand.vmem [shape: f32[3,1,256], index: 0, kind: input, shape index: {}]   ;;  %s8331_s1 = inlined_call_operand.vmem [shape: f32[3,1,256], index: 1, kind: input, shape index: {}]   ;;  %s8332_s2 = inlined_call_operand.vmem [shape: u8[2,3,1,256], index: 2, kind: input, shape index: {}]   ;;  %s8333_s3 = inlined_call_operand.vmem [shape: f32[3,256,1], index: 3, kind: output, shape index: {}]  }
   0x1   :  { %s3697_s14 = smov 0   ;;  %s3699_s15 = smov 0  }
   0x2   :  { %s3701_s16 = smov 0  }
   0x3 LB: > { %s28_s17 = sadd.s32 1, %s3659_s14  ;;  %s32_s18 = sadd.s32 1, %s3663_s15  ;;  %s3667_s16 = sphi %s3701_s16, %s13_s16   ;;  %s3663_s15 = sphi %s3699_s15, %s9899_s15   ;;  %s3659_s14 = sphi %s3697_s14, %s9898_s14   ;;  %s3655_s13 = sphi %s3695_s13, %s9897_s13   ;;  %s3651_s12 = sphi %s3693_s12, %s9896_s12  }
   0x4   : > { %p30_p0 = scmp.ge.s32.totalorder %s28_s17, 2  ;;  %p3199_p1 = scmp.ge.s32.totalorder %s3667_s16, 1 }
   0x5   : > { %p186_p2 = scmp.lt.s32.totalorder %s3667_s16, 7 }
   0x6   : > { %s9901_s17 = smov (%p30_p0, %s28_s17), 0  ;;  %s9903_s18 = smov (!%p30_p0, %s32_s18), %s3663_s15 }
   0x7   : > { %p187_p3 = pnand %p3199_p1, %p186_p2  ;;  %p34_p4 = scmp.ge.s32.totalorder %s9903_s18, 3 }
   0x8   : > { %p225_p5 = scmp.lt.s32.totalorder (!%p187_p3), %s3655_s13, 2  ;;  %p234_p6 = scmp.lt.s32.totalorder (!%p187_p3), %s3651_s12, 1 }
   0x9   : > { %s9905_s18 = smov (%p34_p4, %s9903_s18), 0  ;;  %190 = sbr.rel (%p187_p3) target bundleno = 1128 (0x468), region = 32 }
   0xa   : > { %p252_p7 = scmp.eq.s32.totalorder (!%p187_p3), %s3651_s12, 0 }
   0xe   : > { %s9907_s13 = smov (!%p225_p5, %s3655_s13), 2  ;;  %vm258_vm0 = vcmask (%p252_p7), 7168   ;;  %v3669_v0 = vmov (%p252_p7), 0  }
   0xf   : > { %s235_s19 = scalar_select %p234_p6, %s3651_s12, 1  ;;  %259 = vst.msk [vmem:[#allocation2] sm:$0xff] (%p252_p7), %vm258_vm0, %v3669_v0 }
  0x10   : > { %s3728_s20 = sshll.u32 %s9907_s13, 1  ;;  %s3337_s21 = sshll.u32 %s9907_s13, 8  ;;  %260 = vst.msk [vmem:[#allocation2 + $0x8] sm:$0xff] (%p252_p7), %vm258_vm0, %v3669_v0 }
  0x11   : > { %s3734_s24 = scalar_lea.vmem %s8330_s0, %s3728_s20  ;;  %s232_s27 = scalar_lea.vmem %s8331_s1, %s3728_s20  ;;  %261 = vst.msk [vmem:[#allocation2 + $0x10] sm:$0xff] (%p252_p7), %vm258_vm0, %v3669_v0 }
  0x12   : > { %s3356_s28 = smul.u32 6, %s235_s19  ;;  %s3743_s4 = scalar_lea.vmem %s8333_s3, %s3337_s21  ;;  %262 = vst.msk [vmem:[#allocation2 + $0x18] sm:$0xff] (%p252_p7), %vm258_vm0, %v3669_v0 }
  0x13   : > { %257 = sbr.rel (!%p252_p7) target bundleno = 47 (0x2f), region = 36  ;;  %263 = vst.msk [vmem:[#allocation2 + $0x20] sm:$0xff] (%p252_p7), %vm258_vm0, %v3669_v0 }
  0x14   : > { %s3746_s5 = sadd.s32 %s3356_s28, %s3728_s20  ;;  %264 = vst.msk [vmem:[#allocation2 + $0x28] sm:$0xff] (%p252_p7), %vm258_vm0, %v3669_v0 }
  0x15   : > { %s244_s8 = scalar_lea.vmem %s8332_s2, %s3746_s5  ;;  %265 = vst.msk [vmem:[#allocation2 + $0x30] sm:$0xff] (%p252_p7), %vm258_vm0, %v3669_v0 }
  0x16   : > { %266 = vst.msk [vmem:[#allocation2 + $0x38] sm:$0xff] (%p252_p7), %vm258_vm0, %v3669_v0 }
  0x17   : > { %267 = vst.msk [vmem:[#allocation2 + $0x40] sm:$0xff] (%p252_p7), %vm258_vm0, %v3669_v0 }
  0x18   : > { %268 = vst.msk [vmem:[#allocation2 + $0x48] sm:$0xff] %vm258_vm0, %v3669_v0 }
  0x19   : > { %269 = vst.msk [vmem:[#allocation2 + $0x50] sm:$0xff] %vm258_vm0, %v3669_v0 }
  0x1a   : > { %270 = vst.msk [vmem:[#allocation2 + $0x58] sm:$0xff] %vm258_vm0, %v3669_v0 }
  0x1b   : > { %271 = vst.msk [vmem:[#allocation2 + $0x60] sm:$0xff] %vm258_vm0, %v3669_v0 }
  0x1c   : > { %272 = vst.msk [vmem:[#allocation2 + $0x68] sm:$0xff] %vm258_vm0, %v3669_v0 }
  0x1d   : > { %273 = vst.msk [vmem:[#allocation2 + $0x70] sm:$0xff] %vm258_vm0, %v3669_v0 }
  0x1e   : > { %274 = vst.msk [vmem:[#allocation2 + $0x78] sm:$0xff] %vm258_vm0, %v3669_v0 }
  0x1f   : > { %275 = vst.msk [vmem:[#allocation2 + $0x80] sm:$0xff] %vm258_vm0, %v3669_v0 }
  0x20   : > { %276 = vst.msk [vmem:[#allocation2 + $0x88] sm:$0xff] %vm258_vm0, %v3669_v0 }
  0x21   : > { %277 = vst.msk [vmem:[#allocation2 + $0x90] sm:$0xff] %vm258_vm0, %v3669_v0 }
  0x22   : > { %278 = vst.msk [vmem:[#allocation2 + $0x98] sm:$0xff] %vm258_vm0, %v3669_v0 }
  0x23   : > { %279 = vst.msk [vmem:[#allocation2 + $0xa0] sm:$0xff] %vm258_vm0, %v3669_v0 }
  0x24   : > { %280 = vst.msk [vmem:[#allocation2 + $0xa8] sm:$0xff] %vm258_vm0, %v3669_v0 }
  0x25   : > { %281 = vst.msk [vmem:[#allocation2 + $0xb0] sm:$0xff] %vm258_vm0, %v3669_v0 }
  0x26   : > { %282 = vst.msk [vmem:[#allocation2 + $0xb8] sm:$0xff] %vm258_vm0, %v3669_v0 }
  0x27   : > { %283 = vst.msk [vmem:[#allocation2 + $0xc0] sm:$0xff] %vm258_vm0, %v3669_v0 }
  0x28   : > { %284 = vst.msk [vmem:[#allocation2 + $0xc8] sm:$0xff] %vm258_vm0, %v3669_v0 }
  0x29   : > { %285 = vst.msk [vmem:[#allocation2 + $0xd0] sm:$0xff] %vm258_vm0, %v3669_v0 }
  0x2a   : > { %286 = vst.msk [vmem:[#allocation2 + $0xd8] sm:$0xff] %vm258_vm0, %v3669_v0 }
  0x2b   : > { %287 = vst.msk [vmem:[#allocation2 + $0xe0] sm:$0xff] %vm258_vm0, %v3669_v0 }
  0x2c   : > { %288 = vst.msk [vmem:[#allocation2 + $0xe8] sm:$0xff] %vm258_vm0, %v3669_v0 }
  0x2d   : > { %289 = vst.msk [vmem:[#allocation2 + $0xf0] sm:$0xff] %vm258_vm0, %v3669_v0 }
  0x2e   : > { %290 = vst.msk [vmem:[#allocation2 + $0xf8] sm:$0xff] %vm258_vm0, %v3669_v0 }
  0x2f PF: > { %v294_v1 = vlaneseq  ;;  %v3670_v2 = vmov 1065369472   ;;  %v291_v5 = vld [vmem:[%s244_s8] sm:$0x3]  ;;  %v3671_v16 = vmov 1.0|1.0  }
  0x30   : > { %632 = vmatpush.bf16.msra.mxu0 %v3670_v2  ;;  %3340 = vmatpush.bf16.msra.mxu2 %v3670_v2  ;;  %v292_v6 = vunpack.c.0.s8 %v291_v5  ;;  %v810_v50 = vld [vmem:[#allocation2] sm:$0xff]  ;;  %p939_p8 = scmp.eq.s32.totalorder %s3651_s12, 1  ;;  %v811_v5 = vld [vmem:[#allocation2 + $0x8] sm:$0xff] }
  0x31   : > { %721 = vmatpush.bf16.msra.mxu1 %v3670_v2  ;;  %3348 = vmatpush.bf16.msra.mxu3 %v3670_v2  ;;  %v3784_v3 = vand.u32 127, %v294_v1  ;;  %v3794_v8 = vshrl.u32 %v294_v1, 7  ;;  %v826_v62 = vld [vmem:[#allocation2 + $0x80] sm:$0xff] }
  0x32   : > { %v293_v7 = vand.u32 255, %v292_v6 }
  0x33   : > { %v3787_v4 = vadd.s32 128, %v3784_v3  ;;  %v296_v11 = vadd.s32 8, %v3794_v8  ;;  %v311_v13 = vadd.s32 128, %v3794_v8  ;;  %v312_v14 = vadd.s32 136, %v3794_v8 }
  0x34   : > { %633 = vmatpush.bf16.msra.mxu0 %v3670_v2  ;;  %3341 = vmatpush.bf16.msra.mxu2 %v3670_v2  ;;  %v336_v9 = vperm.slane %v293_v7, 0  ;;  %v337_v10 = vperm.slane %v293_v7, 4  ;;  %v297_v17 = vadd.s32 16, %v3794_v8  ;;  %v298_v18 = vadd.s32 24, %v3794_v8 }
  0x35   : > { %722 = vmatpush.bf16.msra.mxu1 %v3670_v2  ;;  %3349 = vmatpush.bf16.msra.mxu3 %v3670_v2  ;;  %v313_v19 = vadd.s32 144, %v3794_v8  ;;  %v314_v20 = vadd.s32 152, %v3794_v8  ;;  %v299_v21 = vadd.s32 32, %v3794_v8  ;;  %v300_v22 = vadd.s32 40, %v3794_v8 }
  0x36   : > { %v3797_v12 = vperm.slane %v336_v9, 0  ;;  %v3801_v15 = vperm.slane %v337_v10, 0  ;;  %v315_v23 = vadd.s32 160, %v3794_v8  ;;  %v316_v24 = vadd.s32 168, %v3794_v8 }
  0x37   : > { %v301_v25 = vadd.s32 48, %v3794_v8  ;;  %v302_v26 = vadd.s32 56, %v3794_v8  ;;  %v317_v27 = vadd.s32 176, %v3794_v8  ;;  %v318_v28 = vadd.s32 184, %v3794_v8 }
  0x38   : > { %634 = vmatpush.bf16.msra.mxu0 %v3670_v2  ;;  %3342 = vmatpush.bf16.msra.mxu2 %v3670_v2  ;;  %vm340_vm1 = vcmp.le.s32.totalorder %v3797_v12, %v3794_v8  ;;  %vm342_vm2 = vcmp.le.s32.totalorder %v3797_v12, %v296_v11  ;;  %vm372_vm3 = vcmp.le.s32.totalorder %v3797_v12, %v311_v13  ;;  %v303_v29 = vadd.s32 64, %v3794_v8 }
  0x39   : > { %723 = vmatpush.bf16.msra.mxu1 %v3670_v2  ;;  %3350 = vmatpush.bf16.msra.mxu3 %v3670_v2  ;;  %vm374_vm4 = vcmp.le.s32.totalorder %v3797_v12, %v312_v14  ;;  %vm341_vm5 = vcmp.le.s32.totalorder %v3801_v15, %v3794_v8  ;;  %vm343_vm6 = vcmp.le.s32.totalorder %v3801_v15, %v296_v11  ;;  %vm3270_vm7 = vmpackc.low %vm342_vm2, %vm340_vm1  ;;  %v304_v30 = vadd.s32 72, %v3794_v8 }
  0x3a   : > { %vm373_vm8 = vcmp.le.s32.totalorder %v3801_v15, %v311_v13  ;;  %vm375_vm9 = vcmp.le.s32.totalorder %v3801_v15, %v312_v14  ;;  %vm3286_vm10 = vmpackc.low %vm374_vm4, %vm372_vm3  ;;  %vm344_vm13 = vcmp.le.s32.totalorder %v3797_v12, %v297_v17  ;;  %vm346_vm14 = vcmp.le.s32.totalorder %v3797_v12, %v298_v18 }
  0x3b   : > { %vm3302_vm11 = vmpackc.low %vm343_vm6, %vm341_vm5  ;;  %vm376_vm15 = vcmp.le.s32.totalorder %v3797_v12, %v313_v19  ;;  %vm378_vm0 = vcmp.le.s32.totalorder %v3797_v12, %v314_v20  ;;  %vm345_vm1 = vcmp.le.s32.totalorder %v3801_v15, %v297_v17  ;;  %vm347_vm2 = vcmp.le.s32.totalorder %v3801_v15, %v298_v18  ;;  %v827_v18 = vld [vmem:[#allocation2 + $0x88] sm:$0xff] }
  0x3c   : > { %635 = vmatpush.bf16.msra.mxu0 %v3670_v2  ;;  %3343 = vmatpush.bf16.msra.mxu2 %v3670_v2  ;;  %vm3318_vm12 = vmpackc.low %vm375_vm9, %vm373_vm8  ;;  %vm377_vm4 = vcmp.le.s32.totalorder %v3801_v15, %v313_v19  ;;  %vm379_vm5 = vcmp.le.s32.totalorder %v3801_v15, %v314_v20  ;;  %vm348_vm9 = vcmp.le.s32.totalorder %v3797_v12, %v299_v21  ;;  %v319_v31 = vadd.s32 192, %v3794_v8 }
  0x3d   : > { %724 = vmatpush.bf16.msra.mxu1 %v3670_v2  ;;  %3351 = vmatpush.bf16.msra.mxu3 %v3670_v2  ;;  %vm3272_vm3 = vmpackc.low %vm346_vm14, %vm344_vm13  ;;  %vm349_vm13 = vcmp.le.s32.totalorder %v3801_v15, %v299_v21  ;;  %vm351_vm14 = vcmp.le.s32.totalorder %v3801_v15, %v300_v22  ;;  %v320_v32 = vadd.s32 200, %v3794_v8  ;;  %v305_v33 = vadd.s32 80, %v3794_v8 }
  0x3e   : > { %vm3288_vm6 = vmpackc.low %vm378_vm0, %vm376_vm15  ;;  %vm381_vm0 = vcmp.le.s32.totalorder %v3801_v15, %v315_v23  ;;  %v306_v34 = vadd.s32 88, %v3794_v8  ;;  %v321_v35 = vadd.s32 208, %v3794_v8  ;;  %v322_v36 = vadd.s32 216, %v3794_v8 }
  0x3f   : > { %vm3320_vm8 = vmpackc.low %vm379_vm5, %vm377_vm4  ;;  %vm352_vm5 = vcmp.le.s32.totalorder %v3797_v12, %v301_v25  ;;  %v307_v37 = vadd.s32 96, %v3794_v8  ;;  %v308_v38 = vadd.s32 104, %v3794_v8  ;;  %v323_v39 = vadd.s32 224, %v3794_v8 }
  0x40   : > { %636 = vmatpush.bf16.msra.mxu0 %v3670_v2  ;;  %3344 = vmatpush.bf16.msra.mxu2 %v3670_v2  ;;  %v324_v40 = vadd.s32 232, %v3794_v8  ;;  %v309_v41 = vadd.s32 112, %v3794_v8  ;;  %v310_v42 = vadd.s32 120, %v3794_v8  ;;  %v325_v43 = vadd.s32 240, %v3794_v8 }
  0x41   : > { %725 = vmatpush.bf16.msra.mxu1 %v3670_v2  ;;  %3352 = vmatpush.bf16.msra.mxu3 %v3670_v2  ;;  %v326_v44 = vadd.s32 248, %v3794_v8 }
  0x44   : > { %637 = vmatpush.bf16.msra.mxu0 %v3670_v2  ;;  %3345 = vmatpush.bf16.msra.mxu2 %v3670_v2 }
  0x45   : > { %726 = vmatpush.bf16.msra.mxu1 %v3670_v2  ;;  %3353 = vmatpush.bf16.msra.mxu3 %v3670_v2 }
  0x48   : > { %638 = vmatpush.bf16.msra.mxu0 %v3670_v2  ;;  %3346 = vmatpush.bf16.msra.mxu2 %v3670_v2 }
  0x49   : > { %727 = vmatpush.bf16.msra.mxu1 %v3670_v2  ;;  %3354 = vmatpush.bf16.msra.mxu3 %v3670_v2 }
  0x4c   : > { %639 = vmatpush.bf16.msra.mxu0 %v3670_v2  ;;  %3347 = vmatpush.bf16.msra.mxu2 %v3670_v2 }
  0x4d   : > { %728 = vmatpush.bf16.msra.mxu1 %v3670_v2  ;;  %3355 = vmatpush.bf16.msra.mxu3 %v3670_v2 }
  0x4f   : > { %3271 = vmatmul.msk.bf16.vlgmr.msra.gmra.mxu0 %vm3270_vm7, %v3671_v16  ;;  %3287 = vmatmul.msk.bf16.vlgmr.msra.gmra.mxu2 %vm3286_vm10, %v3671_v16  ;;  %vm3304_vm7 = vmpackc.low %vm347_vm2, %vm345_vm1  ;;  %vm350_vm10 = vcmp.le.s32.totalorder %v3797_v12, %v300_v22  ;;  %vm383_vm1 = vcmp.le.s32.totalorder %v3801_v15, %v316_v24 }
  0x50   : > { %3303 = vmatmul.msk.bf16.vlgmr.msra.gmra.mxu1 %vm3302_vm11, %v3671_v16  ;;  %3319 = vmatmul.msk.bf16.vlgmr.msra.gmra.mxu3 %vm3318_vm12, %v3671_v16  ;;  %vm380_vm11 = vcmp.le.s32.totalorder %v3797_v12, %v315_v23  ;;  %vm382_vm12 = vcmp.le.s32.totalorder %v3797_v12, %v316_v24  ;;  %vm3274_vm15 = vmpackc.low %vm350_vm10, %vm348_vm9  ;;  %vm353_vm9 = vcmp.le.s32.totalorder %v3801_v15, %v301_v25  ;;  %v812_v23 = vld [vmem:[#allocation2 + $0x10] sm:$0xff] }
  0x51   : > { %vm3290_vm2 = vmpackc.low %vm382_vm12, %vm380_vm11  ;;  %vm355_vm10 = vcmp.le.s32.totalorder %v3801_v15, %v302_v26  ;;  %vm385_vm12 = vcmp.le.s32.totalorder %v3801_v15, %v317_v27 }
  0x52   : > { %vm3322_vm4 = vmpackc.low %vm383_vm1, %vm381_vm0  ;;  %vm356_vm1 = vcmp.le.s32.totalorder %v3797_v12, %v303_v29 }
  0x5f   : > { %3273 = vmatmul.msk.bf16.gmra.mxu0 %vm3272_vm3, %v3671_v16  ;;  %3289 = vmatmul.msk.bf16.gmra.mxu2 %vm3288_vm6, %v3671_v16  ;;  %vm3306_vm3 = vmpackc.low %vm351_vm14, %vm349_vm13  ;;  %vm354_vm6 = vcmp.le.s32.totalorder %v3797_v12, %v302_v26  ;;  %vm387_vm13 = vcmp.le.s32.totalorder %v3801_v15, %v318_v28 }
  0x60   : > { %3305 = vmatmul.msk.bf16.gmra.mxu1 %vm3304_vm7, %v3671_v16  ;;  %3321 = vmatmul.msk.bf16.gmra.mxu3 %vm3320_vm8, %v3671_v16  ;;  %vm384_vm7 = vcmp.le.s32.totalorder %v3797_v12, %v317_v27  ;;  %vm386_vm8 = vcmp.le.s32.totalorder %v3797_v12, %v318_v28  ;;  %vm3276_vm11 = vmpackc.low %vm354_vm6, %vm352_vm5  ;;  %vm357_vm5 = vcmp.le.s32.totalorder %v3801_v15, %v303_v29 }
  0x61   : > { %vm3292_vm14 = vmpackc.low %vm386_vm8, %vm384_vm7  ;;  %vm359_vm6 = vcmp.le.s32.totalorder %v3801_v15, %v304_v30  ;;  %vm389_vm8 = vcmp.le.s32.totalorder %v3801_v15, %v319_v31 }
  0x62   : > { %vm3324_vm0 = vmpackc.low %vm387_vm13, %vm385_vm12  ;;  %vm360_vm13 = vcmp.le.s32.totalorder %v3797_v12, %v305_v33 }
  0x6f   : > { %3275 = vmatmul.msk.bf16.gmra.mxu0 %vm3274_vm15, %v3671_v16  ;;  %3291 = vmatmul.msk.bf16.gmra.mxu2 %vm3290_vm2, %v3671_v16  ;;  %vm3308_vm15 = vmpackc.low %vm355_vm10, %vm353_vm9  ;;  %vm358_vm2 = vcmp.le.s32.totalorder %v3797_v12, %v304_v30  ;;  %vm391_vm9 = vcmp.le.s32.totalorder %v3801_v15, %v320_v32 }
  0x70   : > { %3307 = vmatmul.msk.bf16.gmra.mxu1 %vm3306_vm3, %v3671_v16  ;;  %3323 = vmatmul.msk.bf16.gmra.mxu3 %vm3322_vm4, %v3671_v16  ;;  %vm388_vm3 = vcmp.le.s32.totalorder %v3797_v12, %v319_v31  ;;  %vm390_vm4 = vcmp.le.s32.totalorder %v3797_v12, %v320_v32  ;;  %vm3278_vm7 = vmpackc.low %vm358_vm2, %vm356_vm1  ;;  %vm361_vm1 = vcmp.le.s32.totalorder %v3801_v15, %v305_v33 }
  0x71   : > { %vm3294_vm10 = vmpackc.low %vm390_vm4, %vm388_vm3  ;;  %vm363_vm2 = vcmp.le.s32.totalorder %v3801_v15, %v306_v34  ;;  %vm393_vm4 = vcmp.le.s32.totalorder %v3801_v15, %v321_v35 }
  0x72   : > { %vm3326_vm12 = vmpackc.low %vm391_vm9, %vm389_vm8  ;;  %vm364_vm9 = vcmp.le.s32.totalorder %v3797_v12, %v307_v37 }
  0x7f   : > { %3277 = vmatmul.msk.bf16.gmra.mxu0 %vm3276_vm11, %v3671_v16  ;;  %3293 = vmatmul.msk.bf16.gmra.mxu2 %vm3292_vm14, %v3671_v16  ;;  %vm3310_vm11 = vmpackc.low %vm359_vm6, %vm357_vm5  ;;  %vm362_vm14 = vcmp.le.s32.totalorder %v3797_v12, %v306_v34  ;;  %vm395_vm5 = vcmp.le.s32.totalorder %v3801_v15, %v322_v36 }
  0x80   : > { %3309 = vmatmul.msk.bf16.gmra.mxu1 %vm3308_vm15, %v3671_v16  ;;  %3325 = vmatmul.msk.bf16.gmra.mxu3 %vm3324_vm0, %v3671_v16  ;;  %vm392_vm15 = vcmp.le.s32.totalorder %v3797_v12, %v321_v35  ;;  %vm394_vm0 = vcmp.le.s32.totalorder %v3797_v12, %v322_v36  ;;  %vm3280_vm3 = vmpackc.low %vm362_vm14, %vm360_vm13  ;;  %vm365_vm13 = vcmp.le.s32.totalorder %v3801_v15, %v307_v37  ;;  %v828_v36 = vld [vmem:[#allocation2 + $0x90] sm:$0xff] }
  0x81   : > { %vm3296_vm6 = vmpackc.low %vm394_vm0, %vm392_vm15  ;;  %vm367_vm14 = vcmp.le.s32.totalorder %v3801_v15, %v308_v38  ;;  %vm397_vm0 = vcmp.le.s32.totalorder %v3801_v15, %v323_v39 }
  0x82   : > { %vm3328_vm8 = vmpackc.low %vm395_vm5, %vm393_vm4  ;;  %vm368_vm5 = vcmp.le.s32.totalorder %v3797_v12, %v309_v41 }
  0x8f   : > { %3279 = vmatmul.msk.bf16.gmra.mxu0 %vm3278_vm7, %v3671_v16  ;;  %3295 = vmatmul.msk.bf16.gmra.mxu2 %vm3294_vm10, %v3671_v16  ;;  %vm3312_vm7 = vmpackc.low %vm363_vm2, %vm361_vm1  ;;  %vm366_vm10 = vcmp.le.s32.totalorder %v3797_v12, %v308_v38  ;;  %vm399_vm1 = vcmp.le.s32.totalorder %v3801_v15, %v324_v40 }
  0x90   : > { %3311 = vmatmul.msk.bf16.gmra.mxu1 %vm3310_vm11, %v3671_v16  ;;  %3327 = vmatmul.msk.bf16.gmra.mxu3 %vm3326_vm12, %v3671_v16  ;;  %vm396_vm11 = vcmp.le.s32.totalorder %v3797_v12, %v323_v39  ;;  %vm398_vm12 = vcmp.le.s32.totalorder %v3797_v12, %v324_v40  ;;  %vm3282_vm15 = vmpackc.low %vm366_vm10, %vm364_vm9  ;;  %vm369_vm9 = vcmp.le.s32.totalorder %v3801_v15, %v309_v41  ;;  %v813_v41 = vld [vmem:[#allocation2 + $0x18] sm:$0xff] }
  0x91   : > { %vm3298_vm2 = vmpackc.low %vm398_vm12, %vm396_vm11  ;;  %vm371_vm10 = vcmp.le.s32.totalorder %v3801_v15, %v310_v42  ;;  %vm401_vm12 = vcmp.le.s32.totalorder %v3801_v15, %v325_v43 }
  0x92   : > { %vm3330_vm4 = vmpackc.low %vm399_vm1, %vm397_vm0 }
  0x9f   : > { %3281 = vmatmul.msk.bf16.gmra.mxu0 %vm3280_vm3, %v3671_v16  ;;  %3297 = vmatmul.msk.bf16.gmra.mxu2 %vm3296_vm6, %v3671_v16  ;;  %vm3314_vm3 = vmpackc.low %vm367_vm14, %vm365_vm13  ;;  %vm370_vm6 = vcmp.le.s32.totalorder %v3797_v12, %v310_v42  ;;  %vm403_vm13 = vcmp.le.s32.totalorder %v3801_v15, %v326_v44 }
  0xa0   : > { %3313 = vmatmul.msk.bf16.gmra.mxu1 %vm3312_vm7, %v3671_v16  ;;  %3329 = vmatmul.msk.bf16.gmra.mxu3 %vm3328_vm8, %v3671_v16  ;;  %vm400_vm7 = vcmp.le.s32.totalorder %v3797_v12, %v325_v43  ;;  %vm402_vm8 = vcmp.le.s32.totalorder %v3797_v12, %v326_v44  ;;  %vm3284_vm11 = vmpackc.low %vm370_vm6, %vm368_vm5 }
  0xa1   : > { %vm3300_vm14 = vmpackc.low %vm402_vm8, %vm400_vm7 }
  0xa2   : > { %vm3332_vm0 = vmpackc.low %vm403_vm13, %vm401_vm12 }
  0xaf   : > { %3283 = vmatmul.msk.bf16.gmra.mxu0 %vm3282_vm15, %v3671_v16  ;;  %3299 = vmatmul.msk.bf16.gmra.mxu2 %vm3298_vm2, %v3671_v16  ;;  %vm3316_vm15 = vmpackc.low %vm371_vm10, %vm369_vm9  ;;  %vm8334_vm2 = vcmask 7168  }
  0xb0   : > { %3315 = vmatmul.msk.bf16.gmra.mxu1 %vm3314_vm3, %v3671_v16  ;;  %3331 = vmatmul.msk.bf16.gmra.mxu3 %vm3330_vm4, %v3671_v16 }
  0xbf   : > { %3285 = vmatmul.msk.bf16.gmra.mxu0 %vm3284_vm11, %v3671_v16  ;;  %3301 = vmatmul.msk.bf16.gmra.mxu2 %vm3300_vm14, %v3671_v16 }
  0xc0   : > { %3317 = vmatmul.msk.bf16.gmra.mxu1 %vm3316_vm15, %v3671_v16  ;;  %3333 = vmatmul.msk.bf16.gmra.mxu3 %vm3332_vm0, %v3671_v16 }
  0xcc   : > { %v641_v45 = vpop.f32.mrf.mxu0 }
  0xcd   : > { %v730_v46 = vpop.f32.mrf.mxu1 }
  0xce   : > { %v731_v47 = vadd.f32 %v730_v46, %v641_v45 }
  0xd0   : > { %vm3357_vm1 = vcmp.lt.s32.totalorder %v731_v47, 0  ;;  %v3358_v48 = vceil.f32 %v731_v47  ;;  %v3359_v49 = vfloor.f32 %v731_v47 }
  0xd2   : > { %v3360_v51 = vsel %vm3357_vm1, %v3358_v48, %v3359_v49  ;;  %v681_v52 = vpop.f32.mrf.mxu2 }
  0xd3   : > { %v3361_v53 = vcvt.f32.s32 %v3360_v51  ;;  %v770_v54 = vpop.f32.mrf.mxu3 }
  0xd4   : > { %v771_v55 = vadd.f32 %v770_v54, %v681_v52  ;;  %v643_v56 = vpop.f32.mrf.mxu0  ;;  %v829_v54 = vld [vmem:[#allocation2 + $0x98] sm:$0xff] }
  0xd5   : > { %v874_v57 = vadd.s32 %v3361_v53, %v810_v50  ;;  %v732_v58 = vpop.f32.mrf.mxu1 }
  0xd6   : > { %vm3437_vm3 = vcmp.lt.s32.totalorder %v771_v55, 0  ;;  %v3438_v59 = vceil.f32 %v771_v55  ;;  %v3439_v60 = vfloor.f32 %v771_v55  ;;  %v733_v61 = vadd.f32 %v732_v58, %v643_v56 }
  0xd7   : > { %907 = vst.msk [vmem:[#allocation2] sm:$0xff] %vm8334_vm2, %v874_v57 }
  0xd8   : > { %v3440_v63 = vsel %vm3437_vm3, %v3438_v59, %v3439_v60  ;;  %vm3362_vm4 = vcmp.lt.s32.totalorder %v733_v61, 0  ;;  %v3363_v0 = vceil.f32 %v733_v61  ;;  %v3364_v1 = vfloor.f32 %v733_v61  ;;  %v814_v59 = vld [vmem:[#allocation2 + $0x20] sm:$0xff] }
  0xd9   : > { %v3441_v2 = vcvt.f32.s32 %v3440_v63 }
  0xda   : > { %v3365_v6 = vsel %vm3362_vm4, %v3363_v0, %v3364_v1  ;;  %v683_v7 = vpop.f32.mrf.mxu2 }
  0xdb   : > { %v890_v8 = vadd.s32 %v3441_v2, %v826_v62  ;;  %v3366_v9 = vcvt.f32.s32 %v3365_v6  ;;  %v772_v10 = vpop.f32.mrf.mxu3 }
  0xdc   : > { %v773_v11 = vadd.f32 %v772_v10, %v683_v7  ;;  %v646_v12 = vpop.f32.mrf.mxu0  ;;  %v830_v10 = vld [vmem:[#allocation2 + $0xa0] sm:$0xff] }
  0xdd   : > { %923 = vst.msk [vmem:[#allocation2 + $0x80] sm:$0xff] %vm8334_vm2, %v890_v8  ;;  %v875_v13 = vadd.s32 %v3366_v9, %v811_v5  ;;  %v735_v14 = vpop.f32.mrf.mxu1 }
  0xde   : > { %vm3442_vm5 = vcmp.lt.s32.totalorder %v773_v11, 0  ;;  %v3443_v15 = vceil.f32 %v773_v11  ;;  %v3444_v16 = vfloor.f32 %v773_v11  ;;  %v736_v17 = vadd.f32 %v735_v14, %v646_v12 }
  0xdf   : > { %908 = vst.msk [vmem:[#allocation2 + $0x8] sm:$0xff] %vm8334_vm2, %v875_v13 }
  0xe0   : > { %v3445_v19 = vsel %vm3442_vm5, %v3443_v15, %v3444_v16  ;;  %vm3367_vm6 = vcmp.lt.s32.totalorder %v736_v17, 0  ;;  %v3368_v20 = vceil.f32 %v736_v17  ;;  %v3369_v21 = vfloor.f32 %v736_v17  ;;  %v815_v15 = vld [vmem:[#allocation2 + $0x28] sm:$0xff] }
  0xe1   : > { %v3446_v22 = vcvt.f32.s32 %v3445_v19 }
  0xe2   : > { %v3370_v24 = vsel %vm3367_vm6, %v3368_v20, %v3369_v21  ;;  %v686_v25 = vpop.f32.mrf.mxu2 }
  0xe3   : > { %v891_v26 = vadd.s32 %v3446_v22, %v827_v18  ;;  %v3371_v27 = vcvt.f32.s32 %v3370_v24  ;;  %v775_v28 = vpop.f32.mrf.mxu3 }
  0xe4   : > { %v776_v29 = vadd.f32 %v775_v28, %v686_v25  ;;  %v648_v30 = vpop.f32.mrf.mxu0  ;;  %v831_v28 = vld [vmem:[#allocation2 + $0xa8] sm:$0xff] }
  0xe5   : > { %924 = vst.msk [vmem:[#allocation2 + $0x88] sm:$0xff] %vm8334_vm2, %v891_v26  ;;  %v876_v31 = vadd.s32 %v3371_v27, %v812_v23  ;;  %v737_v32 = vpop.f32.mrf.mxu1 }
  0xe6   : > { %vm3447_vm7 = vcmp.lt.s32.totalorder %v776_v29, 0  ;;  %v3448_v33 = vceil.f32 %v776_v29  ;;  %v3449_v34 = vfloor.f32 %v776_v29  ;;  %v738_v35 = vadd.f32 %v737_v32, %v648_v30 }
  0xe7   : > { %909 = vst.msk [vmem:[#allocation2 + $0x10] sm:$0xff] %vm8334_vm2, %v876_v31 }
  0xe8   : > { %v3450_v37 = vsel %vm3447_vm7, %v3448_v33, %v3449_v34  ;;  %vm3372_vm8 = vcmp.lt.s32.totalorder %v738_v35, 0  ;;  %v3373_v38 = vceil.f32 %v738_v35  ;;  %v3374_v39 = vfloor.f32 %v738_v35  ;;  %v816_v33 = vld [vmem:[#allocation2 + $0x30] sm:$0xff] }
  0xe9   : > { %v3451_v40 = vcvt.f32.s32 %v3450_v37 }
  0xea   : > { %v3375_v42 = vsel %vm3372_vm8, %v3373_v38, %v3374_v39  ;;  %v688_v43 = vpop.f32.mrf.mxu2 }
  0xeb   : > { %v892_v44 = vadd.s32 %v3451_v40, %v828_v36  ;;  %v3376_v45 = vcvt.f32.s32 %v3375_v42  ;;  %v777_v46 = vpop.f32.mrf.mxu3 }
  0xec   : > { %v778_v47 = vadd.f32 %v777_v46, %v688_v43  ;;  %v651_v48 = vpop.f32.mrf.mxu0  ;;  %v832_v46 = vld [vmem:[#allocation2 + $0xb0] sm:$0xff] }
  0xed   : > { %925 = vst.msk [vmem:[#allocation2 + $0x90] sm:$0xff] %vm8334_vm2, %v892_v44  ;;  %v877_v49 = vadd.s32 %v3376_v45, %v813_v41  ;;  %v740_v50 = vpop.f32.mrf.mxu1 }
  0xee   : > { %vm3452_vm9 = vcmp.lt.s32.totalorder %v778_v47, 0  ;;  %v3453_v51 = vceil.f32 %v778_v47  ;;  %v3454_v52 = vfloor.f32 %v778_v47  ;;  %v741_v53 = vadd.f32 %v740_v50, %v651_v48 }
  0xef   : > { %910 = vst.msk [vmem:[#allocation2 + $0x18] sm:$0xff] %vm8334_vm2, %v877_v49 }
  0xf0   : > { %v3455_v55 = vsel %vm3452_vm9, %v3453_v51, %v3454_v52  ;;  %vm3377_vm10 = vcmp.lt.s32.totalorder %v741_v53, 0  ;;  %v3378_v56 = vceil.f32 %v741_v53  ;;  %v3379_v57 = vfloor.f32 %v741_v53  ;;  %v817_v51 = vld [vmem:[#allocation2 + $0x38] sm:$0xff] }
  0xf1   : > { %v3456_v58 = vcvt.f32.s32 %v3455_v55 }
  0xf2   : > { %v3380_v60 = vsel %vm3377_vm10, %v3378_v56, %v3379_v57  ;;  %v691_v61 = vpop.f32.mrf.mxu2 }
  0xf3   : > { %v893_v62 = vadd.s32 %v3456_v58, %v829_v54  ;;  %v3381_v63 = vcvt.f32.s32 %v3380_v60  ;;  %v780_v0 = vpop.f32.mrf.mxu3 }
  0xf4   : > { %v781_v1 = vadd.f32 %v780_v0, %v691_v61  ;;  %v653_v2 = vpop.f32.mrf.mxu0  ;;  %v833_v0 = vld [vmem:[#allocation2 + $0xb8] sm:$0xff] }
  0xf5   : > { %926 = vst.msk [vmem:[#allocation2 + $0x98] sm:$0xff] %vm8334_vm2, %v893_v62  ;;  %v878_v5 = vadd.s32 %v3381_v63, %v814_v59  ;;  %v742_v6 = vpop.f32.mrf.mxu1 }
  0xf6   : > { %vm3457_vm11 = vcmp.lt.s32.totalorder %v781_v1, 0  ;;  %v3458_v7 = vceil.f32 %v781_v1  ;;  %v3459_v8 = vfloor.f32 %v781_v1  ;;  %v743_v9 = vadd.f32 %v742_v6, %v653_v2 }
  0xf7   : > { %911 = vst.msk [vmem:[#allocation2 + $0x20] sm:$0xff] %vm8334_vm2, %v878_v5 }
  0xf8   : > { %v3460_v11 = vsel %vm3457_vm11, %v3458_v7, %v3459_v8  ;;  %vm3382_vm12 = vcmp.lt.s32.totalorder %v743_v9, 0  ;;  %v3383_v12 = vceil.f32 %v743_v9  ;;  %v3384_v13 = vfloor.f32 %v743_v9  ;;  %v818_v7 = vld [vmem:[#allocation2 + $0x40] sm:$0xff] }
  0xf9   : > { %v3461_v14 = vcvt.f32.s32 %v3460_v11 }
  0xfa   : > { %v3385_v16 = vsel %vm3382_vm12, %v3383_v12, %v3384_v13  ;;  %v693_v17 = vpop.f32.mrf.mxu2 }
  0xfb   : > { %v894_v18 = vadd.s32 %v3461_v14, %v830_v10  ;;  %v3386_v19 = vcvt.f32.s32 %v3385_v16  ;;  %v782_v20 = vpop.f32.mrf.mxu3 }
  0xfc   : > { %v783_v21 = vadd.f32 %v782_v20, %v693_v17  ;;  %v656_v22 = vpop.f32.mrf.mxu0  ;;  %v834_v20 = vld [vmem:[#allocation2 + $0xc0] sm:$0xff] }
  0xfd   : > { %927 = vst.msk [vmem:[#allocation2 + $0xa0] sm:$0xff] %vm8334_vm2, %v894_v18  ;;  %v879_v23 = vadd.s32 %v3386_v19, %v815_v15  ;;  %v745_v24 = vpop.f32.mrf.mxu1 }
  0xfe   : > { %vm3462_vm13 = vcmp.lt.s32.totalorder %v783_v21, 0  ;;  %v3463_v25 = vceil.f32 %v783_v21  ;;  %v3464_v26 = vfloor.f32 %v783_v21  ;;  %v746_v27 = vadd.f32 %v745_v24, %v656_v22 }
  0xff   : > { %912 = vst.msk [vmem:[#allocation2 + $0x28] sm:$0xff] %vm8334_vm2, %v879_v23 }
 0x100   : > { %v3465_v29 = vsel %vm3462_vm13, %v3463_v25, %v3464_v26  ;;  %vm3387_vm14 = vcmp.lt.s32.totalorder %v746_v27, 0  ;;  %v3388_v30 = vceil.f32 %v746_v27  ;;  %v3389_v31 = vfloor.f32 %v746_v27  ;;  %v819_v25 = vld [vmem:[#allocation2 + $0x48] sm:$0xff] }
 0x101   : > { %v3466_v32 = vcvt.f32.s32 %v3465_v29 }
 0x102   : > { %v3390_v34 = vsel %vm3387_vm14, %v3388_v30, %v3389_v31  ;;  %v696_v35 = vpop.f32.mrf.mxu2 }
 0x103   : > { %v895_v36 = vadd.s32 %v3466_v32, %v831_v28  ;;  %v3391_v37 = vcvt.f32.s32 %v3390_v34  ;;  %v785_v38 = vpop.f32.mrf.mxu3 }
 0x104   : > { %v786_v39 = vadd.f32 %v785_v38, %v696_v35  ;;  %v658_v40 = vpop.f32.mrf.mxu0  ;;  %v835_v38 = vld [vmem:[#allocation2 + $0xc8] sm:$0xff] }
 0x105   : > { %928 = vst.msk [vmem:[#allocation2 + $0xa8] sm:$0xff] %vm8334_vm2, %v895_v36  ;;  %v880_v41 = vadd.s32 %v3391_v37, %v816_v33  ;;  %v747_v42 = vpop.f32.mrf.mxu1 }
 0x106   : > { %vm3467_vm15 = vcmp.lt.s32.totalorder %v786_v39, 0  ;;  %v3468_v43 = vceil.f32 %v786_v39  ;;  %v3469_v44 = vfloor.f32 %v786_v39  ;;  %v748_v45 = vadd.f32 %v747_v42, %v658_v40 }
 0x107   : > { %913 = vst.msk [vmem:[#allocation2 + $0x30] sm:$0xff] %vm8334_vm2, %v880_v41 }
 0x108   : > { %v3470_v47 = vsel %vm3467_vm15, %v3468_v43, %v3469_v44  ;;  %vm3392_vm0 = vcmp.lt.s32.totalorder %v748_v45, 0  ;;  %v3393_v48 = vceil.f32 %v748_v45  ;;  %v3394_v49 = vfloor.f32 %v748_v45  ;;  %v820_v43 = vld [vmem:[#allocation2 + $0x50] sm:$0xff] }
 0x109   : > { %v3471_v50 = vcvt.f32.s32 %v3470_v47 }
 0x10a   : > { %v3395_v52 = vsel %vm3392_vm0, %v3393_v48, %v3394_v49  ;;  %v698_v53 = vpop.f32.mrf.mxu2 }
 0x10b   : > { %v896_v54 = vadd.s32 %v3471_v50, %v832_v46  ;;  %v3396_v55 = vcvt.f32.s32 %v3395_v52  ;;  %v787_v56 = vpop.f32.mrf.mxu3 }
 0x10c   : > { %v788_v57 = vadd.f32 %v787_v56, %v698_v53  ;;  %v661_v58 = vpop.f32.mrf.mxu0  ;;  %v836_v56 = vld [vmem:[#allocation2 + $0xd0] sm:$0xff] }
 0x10d   : > { %929 = vst.msk [vmem:[#allocation2 + $0xb0] sm:$0xff] %vm8334_vm2, %v896_v54  ;;  %v881_v59 = vadd.s32 %v3396_v55, %v817_v51  ;;  %v750_v60 = vpop.f32.mrf.mxu1 }
 0x10e   : > { %vm3472_vm1 = vcmp.lt.s32.totalorder %v788_v57, 0  ;;  %v3473_v61 = vceil.f32 %v788_v57  ;;  %v3474_v62 = vfloor.f32 %v788_v57  ;;  %v751_v63 = vadd.f32 %v750_v60, %v661_v58 }
 0x10f   : > { %914 = vst.msk [vmem:[#allocation2 + $0x38] sm:$0xff] %vm8334_vm2, %v881_v59 }
 0x110   : > { %v3475_v1 = vsel %vm3472_vm1, %v3473_v61, %v3474_v62  ;;  %vm3397_vm3 = vcmp.lt.s32.totalorder %v751_v63, 0  ;;  %v3398_v2 = vceil.f32 %v751_v63  ;;  %v3399_v5 = vfloor.f32 %v751_v63  ;;  %v821_v61 = vld [vmem:[#allocation2 + $0x58] sm:$0xff] }
 0x111   : > { %v3476_v6 = vcvt.f32.s32 %v3475_v1 }
 0x112   : > { %v3400_v8 = vsel %vm3397_vm3, %v3398_v2, %v3399_v5  ;;  %v701_v9 = vpop.f32.mrf.mxu2 }
 0x113   : > { %v897_v10 = vadd.s32 %v3476_v6, %v833_v0  ;;  %v3401_v11 = vcvt.f32.s32 %v3400_v8  ;;  %v790_v12 = vpop.f32.mrf.mxu3 }
 0x114   : > { %v791_v13 = vadd.f32 %v790_v12, %v701_v9  ;;  %v663_v14 = vpop.f32.mrf.mxu0  ;;  %v837_v12 = vld [vmem:[#allocation2 + $0xd8] sm:$0xff] }
 0x115   : > { %930 = vst.msk [vmem:[#allocation2 + $0xb8] sm:$0xff] %vm8334_vm2, %v897_v10  ;;  %v882_v15 = vadd.s32 %v3401_v11, %v818_v7  ;;  %v752_v16 = vpop.f32.mrf.mxu1 }
 0x116   : > { %vm3477_vm4 = vcmp.lt.s32.totalorder %v791_v13, 0  ;;  %v3478_v17 = vceil.f32 %v791_v13  ;;  %v3479_v18 = vfloor.f32 %v791_v13  ;;  %v753_v19 = vadd.f32 %v752_v16, %v663_v14 }
 0x117   : > { %915 = vst.msk [vmem:[#allocation2 + $0x40] sm:$0xff] %vm8334_vm2, %v882_v15 }
 0x118   : > { %v3480_v21 = vsel %vm3477_vm4, %v3478_v17, %v3479_v18  ;;  %vm3402_vm5 = vcmp.lt.s32.totalorder %v753_v19, 0  ;;  %v3403_v22 = vceil.f32 %v753_v19  ;;  %v3404_v23 = vfloor.f32 %v753_v19  ;;  %v822_v17 = vld [vmem:[#allocation2 + $0x60] sm:$0xff] }
 0x119   : > { %v3481_v24 = vcvt.f32.s32 %v3480_v21 }
 0x11a   : > { %v3405_v26 = vsel %vm3402_vm5, %v3403_v22, %v3404_v23  ;;  %v703_v27 = vpop.f32.mrf.mxu2 }
 0x11b   : > { %v898_v28 = vadd.s32 %v3481_v24, %v834_v20  ;;  %v3406_v29 = vcvt.f32.s32 %v3405_v26  ;;  %v792_v30 = vpop.f32.mrf.mxu3 }
 0x11c   : > { %v793_v31 = vadd.f32 %v792_v30, %v703_v27  ;;  %v666_v32 = vpop.f32.mrf.mxu0  ;;  %v838_v30 = vld [vmem:[#allocation2 + $0xe0] sm:$0xff] }
 0x11d   : > { %931 = vst.msk [vmem:[#allocation2 + $0xc0] sm:$0xff] %vm8334_vm2, %v898_v28  ;;  %v883_v33 = vadd.s32 %v3406_v29, %v819_v25  ;;  %v755_v34 = vpop.f32.mrf.mxu1 }
 0x11e   : > { %vm3482_vm6 = vcmp.lt.s32.totalorder %v793_v31, 0  ;;  %v3483_v35 = vceil.f32 %v793_v31  ;;  %v3484_v36 = vfloor.f32 %v793_v31  ;;  %v756_v37 = vadd.f32 %v755_v34, %v666_v32 }
 0x11f   : > { %916 = vst.msk [vmem:[#allocation2 + $0x48] sm:$0xff] %vm8334_vm2, %v883_v33 }
 0x120   : > { %v3485_v39 = vsel %vm3482_vm6, %v3483_v35, %v3484_v36  ;;  %vm3407_vm7 = vcmp.lt.s32.totalorder %v756_v37, 0  ;;  %v3408_v40 = vceil.f32 %v756_v37  ;;  %v3409_v41 = vfloor.f32 %v756_v37  ;;  %v823_v35 = vld [vmem:[#allocation2 + $0x68] sm:$0xff] }
 0x121   : > { %v3486_v42 = vcvt.f32.s32 %v3485_v39 }
 0x122   : > { %v3410_v44 = vsel %vm3407_vm7, %v3408_v40, %v3409_v41  ;;  %v706_v45 = vpop.f32.mrf.mxu2 }
 0x123   : > { %v899_v46 = vadd.s32 %v3486_v42, %v835_v38  ;;  %v3411_v47 = vcvt.f32.s32 %v3410_v44  ;;  %v795_v48 = vpop.f32.mrf.mxu3 }
 0x124   : > { %v796_v49 = vadd.f32 %v795_v48, %v706_v45  ;;  %v668_v50 = vpop.f32.mrf.mxu0  ;;  %v839_v48 = vld [vmem:[#allocation2 + $0xe8] sm:$0xff] }
 0x125   : > { %932 = vst.msk [vmem:[#allocation2 + $0xc8] sm:$0xff] %vm8334_vm2, %v899_v46  ;;  %v884_v51 = vadd.s32 %v3411_v47, %v820_v43  ;;  %v757_v52 = vpop.f32.mrf.mxu1 }
 0x126   : > { %vm3487_vm8 = vcmp.lt.s32.totalorder %v796_v49, 0  ;;  %v3488_v53 = vceil.f32 %v796_v49  ;;  %v3489_v54 = vfloor.f32 %v796_v49  ;;  %v758_v55 = vadd.f32 %v757_v52, %v668_v50 }
 0x127   : > { %917 = vst.msk [vmem:[#allocation2 + $0x50] sm:$0xff] %vm8334_vm2, %v884_v51 }
 0x128   : > { %v3490_v57 = vsel %vm3487_vm8, %v3488_v53, %v3489_v54  ;;  %vm3412_vm9 = vcmp.lt.s32.totalorder %v758_v55, 0  ;;  %v3413_v58 = vceil.f32 %v758_v55  ;;  %v3414_v59 = vfloor.f32 %v758_v55  ;;  %v824_v53 = vld [vmem:[#allocation2 + $0x70] sm:$0xff] }
 0x129   : > { %v3491_v60 = vcvt.f32.s32 %v3490_v57 }
 0x12a   : > { %v3415_v62 = vsel %vm3412_vm9, %v3413_v58, %v3414_v59  ;;  %v708_v63 = vpop.f32.mrf.mxu2 }
 0x12b   : > { %v900_v0 = vadd.s32 %v3491_v60, %v836_v56  ;;  %v3416_v1 = vcvt.f32.s32 %v3415_v62  ;;  %v797_v2 = vpop.f32.mrf.mxu3 }
 0x12c   : > { %v798_v5 = vadd.f32 %v797_v2, %v708_v63  ;;  %v671_v6 = vpop.f32.mrf.mxu0  ;;  %v840_v2 = vld [vmem:[#allocation2 + $0xf0] sm:$0xff] }
 0x12d   : > { %933 = vst.msk [vmem:[#allocation2 + $0xd0] sm:$0xff] %vm8334_vm2, %v900_v0  ;;  %v885_v7 = vadd.s32 %v3416_v1, %v821_v61  ;;  %v760_v8 = vpop.f32.mrf.mxu1 }
 0x12e   : > { %vm3492_vm10 = vcmp.lt.s32.totalorder %v798_v5, 0  ;;  %v3493_v9 = vceil.f32 %v798_v5  ;;  %v3494_v10 = vfloor.f32 %v798_v5  ;;  %v761_v11 = vadd.f32 %v760_v8, %v671_v6 }
 0x12f   : > { %918 = vst.msk [vmem:[#allocation2 + $0x58] sm:$0xff] %vm8334_vm2, %v885_v7 }
 0x130   : > { %v3495_v13 = vsel %vm3492_vm10, %v3493_v9, %v3494_v10  ;;  %vm3417_vm11 = vcmp.lt.s32.totalorder %v761_v11, 0  ;;  %v3418_v14 = vceil.f32 %v761_v11  ;;  %v3419_v15 = vfloor.f32 %v761_v11  ;;  %v825_v9 = vld [vmem:[#allocation2 + $0x78] sm:$0xff] }
 0x131   : > { %v3496_v16 = vcvt.f32.s32 %v3495_v13 }
 0x132   : > { %v3420_v18 = vsel %vm3417_vm11, %v3418_v14, %v3419_v15  ;;  %v711_v19 = vpop.f32.mrf.mxu2 }
 0x133   : > { %v901_v20 = vadd.s32 %v3496_v16, %v837_v12  ;;  %v3421_v21 = vcvt.f32.s32 %v3420_v18  ;;  %v800_v22 = vpop.f32.mrf.mxu3 }
 0x134   : > { %v801_v23 = vadd.f32 %v800_v22, %v711_v19  ;;  %v673_v24 = vpop.f32.mrf.mxu0  ;;  %v841_v19 = vld [vmem:[#allocation2 + $0xf8] sm:$0xff] }
 0x135   : > { %934 = vst.msk [vmem:[#allocation2 + $0xd8] sm:$0xff] %vm8334_vm2, %v901_v20  ;;  %v886_v25 = vadd.s32 %v3421_v21, %v822_v17  ;;  %v762_v26 = vpop.f32.mrf.mxu1 }
 0x136   : > { %vm3497_vm12 = vcmp.lt.s32.totalorder %v801_v23, 0  ;;  %v3498_v27 = vceil.f32 %v801_v23  ;;  %v3499_v28 = vfloor.f32 %v801_v23  ;;  %v763_v29 = vadd.f32 %v762_v26, %v673_v24 }
 0x137   : > { %919 = vst.msk [vmem:[#allocation2 + $0x60] sm:$0xff] %vm8334_vm2, %v886_v25 }
 0x138   : > { %v3500_v31 = vsel %vm3497_vm12, %v3498_v27, %v3499_v28  ;;  %vm3422_vm13 = vcmp.lt.s32.totalorder %v763_v29, 0  ;;  %v3423_v32 = vceil.f32 %v763_v29  ;;  %v3424_v33 = vfloor.f32 %v763_v29 }
 0x139   : > { %v3501_v34 = vcvt.f32.s32 %v3500_v31 }
 0x13a   : > { %v3425_v36 = vsel %vm3422_vm13, %v3423_v32, %v3424_v33  ;;  %v713_v37 = vpop.f32.mrf.mxu2 }
 0x13b   : > { %v902_v38 = vadd.s32 %v3501_v34, %v838_v30  ;;  %v3426_v39 = vcvt.f32.s32 %v3425_v36  ;;  %v802_v40 = vpop.f32.mrf.mxu3 }
 0x13c   : > { %v803_v41 = vadd.f32 %v802_v40, %v713_v37  ;;  %v676_v42 = vpop.f32.mrf.mxu0 }
 0x13d   : > { %935 = vst.msk [vmem:[#allocation2 + $0xe0] sm:$0xff] %vm8334_vm2, %v902_v38  ;;  %v887_v43 = vadd.s32 %v3426_v39, %v823_v35  ;;  %v765_v44 = vpop.f32.mrf.mxu1 }
 0x13e   : > { %vm3502_vm14 = vcmp.lt.s32.totalorder %v803_v41, 0  ;;  %v3503_v45 = vceil.f32 %v803_v41  ;;  %v3504_v46 = vfloor.f32 %v803_v41  ;;  %v766_v47 = vadd.f32 %v765_v44, %v676_v42 }
 0x13f   : > { %920 = vst.msk [vmem:[#allocation2 + $0x68] sm:$0xff] %vm8334_vm2, %v887_v43 }
 0x140   : > { %v3505_v49 = vsel %vm3502_vm14, %v3503_v45, %v3504_v46  ;;  %vm3427_vm15 = vcmp.lt.s32.totalorder %v766_v47, 0  ;;  %v3428_v50 = vceil.f32 %v766_v47  ;;  %v3429_v51 = vfloor.f32 %v766_v47 }
 0x141   : > { %v3506_v52 = vcvt.f32.s32 %v3505_v49 }
 0x142   : > { %v3430_v54 = vsel %vm3427_vm15, %v3428_v50, %v3429_v51  ;;  %v716_v55 = vpop.f32.mrf.mxu2 }
 0x143   : > { %v903_v56 = vadd.s32 %v3506_v52, %v839_v48  ;;  %v3431_v57 = vcvt.f32.s32 %v3430_v54  ;;  %v805_v58 = vpop.f32.mrf.mxu3 }
 0x144   : > { %v806_v59 = vadd.f32 %v805_v58, %v716_v55  ;;  %v678_v60 = vpop.f32.mrf.mxu0 }
 0x145   : > { %936 = vst.msk [vmem:[#allocation2 + $0xe8] sm:$0xff] %vm8334_vm2, %v903_v56  ;;  %v888_v61 = vadd.s32 %v3431_v57, %v824_v53  ;;  %v767_v62 = vpop.f32.mrf.mxu1 }
 0x146   : > { %vm3507_vm0 = vcmp.lt.s32.totalorder %v806_v59, 0  ;;  %v3508_v63 = vceil.f32 %v806_v59  ;;  %v3509_v0 = vfloor.f32 %v806_v59  ;;  %v768_v1 = vadd.f32 %v767_v62, %v678_v60 }
 0x147   : > { %921 = vst.msk [vmem:[#allocation2 + $0x70] sm:$0xff] %vm8334_vm2, %v888_v61 }
 0x148   : > { %v3510_v5 = vsel %vm3507_vm0, %v3508_v63, %v3509_v0  ;;  %vm3432_vm1 = vcmp.lt.s32.totalorder %v768_v1, 0  ;;  %v3433_v6 = vceil.f32 %v768_v1  ;;  %v3434_v7 = vfloor.f32 %v768_v1 }
 0x149   : > { %v3511_v8 = vcvt.f32.s32 %v3510_v5 }
 0x14a   : > { %v3435_v10 = vsel %vm3432_vm1, %v3433_v6, %v3434_v7  ;;  %v718_v11 = vpop.f32.mrf.mxu2 }
 0x14b   : > { %v904_v12 = vadd.s32 %v3511_v8, %v840_v2  ;;  %v3436_v13 = vcvt.f32.s32 %v3435_v10  ;;  %v807_v14 = vpop.f32.mrf.mxu3 }
 0x14c   : > { %v808_v15 = vadd.f32 %v807_v14, %v718_v11 }
 0x14d   : > { %937 = vst.msk [vmem:[#allocation2 + $0xf0] sm:$0xff] %vm8334_vm2, %v904_v12  ;;  %v889_v16 = vadd.s32 %v3436_v13, %v825_v9 }
 0x14e   : > { %vm3512_vm3 = vcmp.lt.s32.totalorder %v808_v15, 0  ;;  %v3513_v17 = vceil.f32 %v808_v15  ;;  %v3514_v18 = vfloor.f32 %v808_v15 }
 0x14f   : > { %922 = vst.msk [vmem:[#allocation2 + $0x78] sm:$0xff] %vm8334_vm2, %v889_v16 }
 0x150   : > { %v3515_v20 = vsel %vm3512_vm3, %v3513_v17, %v3514_v18 }
 0x151   : > { %v3516_v21 = vcvt.f32.s32 %v3515_v20  ;;  %943 = sbr.rel (!%p939_p8) target bundleno = 1128 (0x468), region = 40 }
 0x153   : > { %v905_v22 = vadd.s32 %v3516_v21, %v841_v19 }
 0x155   : > { %938 = vst.msk [vmem:[#allocation2 + $0xf8] sm:$0xff] %vm8334_vm2, %v905_v22 }
 0x156   : > { %v948_v23 = vld [vmem:[#allocation2 + $0x20] sm:$0xff]  ;;  %v946_v24 = vld [vmem:[#allocation2 + $0x10] sm:$0xff]  ;;  %v3672_v25 = vmov 0   ;;  %v949_v30 = vld [vmem:[#allocation2 + $0x28] sm:$0xff] }
 0x157   : > { %3563 = vset.pattern.permute.xlu2 %v3672_v25  ;;  %3562 = vset.pattern.permute.xlu1 %v3672_v25  ;;  %v980_v26 = vcvt.s32.f32 %v948_v23  ;;  %v978_v27 = vcvt.s32.f32 %v946_v24  ;;  %v944_v28 = vld [vmem:[#allocation2] sm:$0xff]  ;;  %v947_v31 = vld [vmem:[#allocation2 + $0x18] sm:$0xff]  ;;  %v945_v34 = vld [vmem:[#allocation2 + $0x8] sm:$0xff]  ;;  %v981_v36 = vcvt.s32.f32 %v949_v30 }
 0x158   : > { %3561 = vset.pattern.permute.xlu0 %v3672_v25  ;;  %v976_v29 = vcvt.s32.f32 %v944_v28  ;;  %v979_v37 = vcvt.s32.f32 %v947_v31  ;;  %v977_v38 = vcvt.s32.f32 %v945_v34  ;;  %v952_v42 = vld [vmem:[#allocation2 + $0x40] sm:$0xff]  ;;  %v951_v43 = vld [vmem:[#allocation2 + $0x38] sm:$0xff]  ;;  %v950_v44 = vld [vmem:[#allocation2 + $0x30] sm:$0xff] }
 0x159   : > { %v3967_v32 = vmul.f32 0.001953125, %v980_v26  ;;  %v3969_v33 = vmul.f32 0.001953125, %v978_v27  ;;  %v3976_v39 = vmul.f32 0.001953125, %v981_v36  ;;  %v984_v45 = vcvt.s32.f32 %v952_v42  ;;  %v955_v51 = vld [vmem:[#allocation2 + $0x58] sm:$0xff]  ;;  %v954_v52 = vld [vmem:[#allocation2 + $0x50] sm:$0xff]  ;;  %v953_v53 = vld [vmem:[#allocation2 + $0x48] sm:$0xff] }
 0x15a   : > { %v3971_v35 = vmul.f32 0.001953125, %v976_v29  ;;  %v3978_v40 = vmul.f32 0.001953125, %v979_v37  ;;  %v3980_v41 = vmul.f32 0.001953125, %v977_v38  ;;  %v983_v46 = vcvt.s32.f32 %v951_v43  ;;  %v958_v60 = vld [vmem:[#allocation2 + $0x70] sm:$0xff]  ;;  %v957_v61 = vld [vmem:[#allocation2 + $0x68] sm:$0xff]  ;;  %v956_v62 = vld [vmem:[#allocation2 + $0x60] sm:$0xff] }
 0x15b   : > { %8743 = vst [vmem:[#allocation3_spill] sm:$0xff] %v3967_v32  ;;  %1072 = vperm.xlu2 %3563, %v3967_v32   ;;  %1062 = vperm.xlu1 %3562, %v3969_v33   ;;  %v982_v47 = vcvt.s32.f32 %v950_v44  ;;  %v3985_v48 = vmul.f32 0.001953125, %v984_v45  ;;  %v987_v54 = vcvt.s32.f32 %v955_v51  ;;  %v986_v55 = vcvt.s32.f32 %v954_v52  ;;  %v961_v7 = vld [vmem:[#allocation2 + $0x88] sm:$0xff]  ;;  %v960_v8 = vld [vmem:[#allocation2 + $0x80] sm:$0xff]  ;;  %v959_v9 = vld [vmem:[#allocation2 + $0x78] sm:$0xff] }
 0x15c   : > { %8744 = vst [vmem:[#allocation4_spill] sm:$0xff] %v3969_v33  ;;  %1052 = vperm.xlu0 %3561, %v3971_v35   ;;  %v3987_v49 = vmul.f32 0.001953125, %v983_v46  ;;  %v985_v56 = vcvt.s32.f32 %v953_v53  ;;  %v990_v63 = vcvt.s32.f32 %v958_v60  ;;  %v989_v0 = vcvt.s32.f32 %v957_v61  ;;  %v964_v16 = vld [vmem:[#allocation2 + $0xa0] sm:$0xff]  ;;  %v963_v17 = vld [vmem:[#allocation2 + $0x98] sm:$0xff]  ;;  %v962_v18 = vld [vmem:[#allocation2 + $0x90] sm:$0xff] }
 0x15d   : > { %8745 = vst [vmem:[#allocation5_spill] sm:$0xff] %v3971_v35  ;;  %v3989_v50 = vmul.f32 0.001953125, %v982_v47  ;;  %v3994_v57 = vmul.f32 0.001953125, %v987_v54  ;;  %v3996_v58 = vmul.f32 0.001953125, %v986_v55  ;;  %v988_v1 = vcvt.s32.f32 %v956_v62  ;;  %v967_v26 = vld [vmem:[#allocation2 + $0xb8] sm:$0xff]  ;;  %v966_v27 = vld [vmem:[#allocation2 + $0xb0] sm:$0xff] }
 0x15e   : > { %8746 = vst [vmem:[#allocation6_spill] sm:$0xff] %v3976_v39  ;;  %v3998_v59 = vmul.f32 0.001953125, %v985_v56  ;;  %v4003_v2 = vmul.f32 0.001953125, %v990_v63  ;;  %v4005_v5 = vmul.f32 0.001953125, %v989_v0  ;;  %v993_v10 = vcvt.s32.f32 %v961_v7  ;;  %v965_v28 = vld [vmem:[#allocation2 + $0xa8] sm:$0xff]  ;;  %v970_v38 = vld [vmem:[#allocation2 + $0xd0] sm:$0xff] }
 0x15f   : > { %8747 = vst [vmem:[#allocation7_spill] sm:$0xff] %v3978_v40  ;;  %v4007_v6 = vmul.f32 0.001953125, %v988_v1  ;;  %v992_v11 = vcvt.s32.f32 %v960_v8  ;;  %v991_v12 = vcvt.s32.f32 %v959_v9  ;;  %v996_v19 = vcvt.s32.f32 %v964_v16  ;;  %v969_v42 = vld [vmem:[#allocation2 + $0xc8] sm:$0xff]  ;;  %v968_v43 = vld [vmem:[#allocation2 + $0xc0] sm:$0xff]  ;;  %v971_v55 = vld [vmem:[#allocation2 + $0xd8] sm:$0xff] }
 0x160   : > { %8748 = vst [vmem:[#allocation8_spill] sm:$0xff] %v3980_v41  ;;  %v4012_v13 = vmul.f32 0.001953125, %v993_v10  ;;  %v995_v20 = vcvt.s32.f32 %v963_v17  ;;  %v994_v21 = vcvt.s32.f32 %v962_v18  ;;  %v999_v29 = vcvt.s32.f32 %v967_v26  ;;  %v973_v53 = vld [vmem:[#allocation2 + $0xe8] sm:$0xff]  ;;  %v972_v54 = vld [vmem:[#allocation2 + $0xe0] sm:$0xff]  ;;  %v975_v1 = vld [vmem:[#allocation2 + $0xf8] sm:$0xff] }
 0x161   : > { %8749 = vst [vmem:[#allocation9_spill] sm:$0xff] %v3985_v48  ;;  %v4014_v14 = vmul.f32 0.001953125, %v992_v11  ;;  %v4016_v15 = vmul.f32 0.001953125, %v991_v12  ;;  %v4021_v22 = vmul.f32 0.001953125, %v996_v19  ;;  %v998_v30 = vcvt.s32.f32 %v966_v27  ;;  %v974_v7 = vld [vmem:[#allocation2 + $0xf0] sm:$0xff] }
 0x162   : > { %8750 = vst [vmem:[#allocation10_spill] sm:$0xff] %v3987_v49  ;;  %v4023_v23 = vmul.f32 0.001953125, %v995_v20  ;;  %v4025_v24 = vmul.f32 0.001953125, %v994_v21  ;;  %v997_v31 = vcvt.s32.f32 %v965_v28  ;;  %v4030_v34 = vmul.f32 0.001953125, %v999_v29  ;;  %v4062_v10 = vld [vmem:[%s232_s27] sm:$0x3] }
 0x163   : > { %1077 = vperm.xlu2 %3563, %v3976_v39   ;;  %1067 = vperm.xlu1 %3562, %v3978_v40   ;;  %8751 = vst [vmem:[#allocation11_spill] sm:$0xff] %v3989_v50  ;;  %v4032_v36 = vmul.f32 0.001953125, %v998_v30  ;;  %v1002_v44 = vcvt.s32.f32 %v970_v38  ;;  %v1001_v45 = vcvt.s32.f32 %v969_v42  ;;  %v1000_v46 = vcvt.s32.f32 %v968_v43  ;;  %v1040_v17 = vld [vmem:[%s3734_s24] sm:$0x3] }
 0x164   : > { %1057 = vperm.xlu0 %3561, %v3980_v41   ;;  %8752 = vst [vmem:[#allocation12_spill] sm:$0xff] %v3994_v57  ;;  %v4034_v37 = vmul.f32 0.001953125, %v997_v31  ;;  %v1005_v56 = vcvt.s32.f32 %v973_v53  ;;  %v1004_v60 = vcvt.s32.f32 %v972_v54  ;;  %v1003_v61 = vcvt.s32.f32 %v971_v55 }
 0x165   : > { %8753 = vst [vmem:[#allocation13_spill] sm:$0xff] %v3996_v58  ;;  %v4039_v47 = vmul.f32 0.001953125, %v1002_v44  ;;  %v4041_v51 = vmul.f32 0.001953125, %v1001_v45  ;;  %v4043_v52 = vmul.f32 0.001953125, %v1000_v46  ;;  %v1007_v8 = vcvt.s32.f32 %v975_v1 }
 0x166   : > { %8754 = vst [vmem:[#allocation14_spill] sm:$0xff] %v3998_v59  ;;  %v4048_v62 = vmul.f32 0.001953125, %v1005_v56  ;;  %v4050_v63 = vmul.f32 0.001953125, %v1004_v60  ;;  %v4052_v0 = vmul.f32 0.001953125, %v1003_v61  ;;  %v1006_v9 = vcvt.s32.f32 %v974_v7 }
 0x167   : > { %8755 = vst [vmem:[#allocation15_spill] sm:$0xff] %v4003_v2  ;;  %v4064_v11 = vmul.f32 0.001953125, %v1007_v8  ;;  %vm8335_vm4 = vcmp.gt.f32.partialorder %v4062_v10, 0.5  ;;  %v4075_v20 = vperm.slane %v1040_v17, 0  ;;  %v4077_v21 = vperm.slane %v1040_v17, 1 }
 0x168   : > { %8756 = vst [vmem:[#allocation16_spill] sm:$0xff] %v4005_v5  ;;  %v4066_v12 = vmul.f32 0.001953125, %v1006_v9  ;;  %v1274_v16 = vsel %vm8335_vm4, 1, %v3672_v25  ;;  %v8792_v56 = vmov 0 }
 0x169   : > { %8757 = vst [vmem:[#allocation17_spill] sm:$0xff] %v4007_v6  ;;  %v1275_v18 = vperm.slane %v1274_v16, 0  ;;  %v1276_v19 = vperm.slane %v1274_v16, 1  ;;  %v4174_v16 = vcvt.s32.f32 %v3784_v3 }
 0x16a   : > { %8758 = vst [vmem:[#allocation18_spill] sm:$0xff] %v4012_v13 }
 0x16b   : > { %1092 = vperm.xlu2 %3563, %v3985_v48   ;;  %1087 = vperm.xlu1 %3562, %v3987_v49   ;;  %8759 = vst [vmem:[#allocation19_spill] sm:$0xff] %v4014_v14  ;;  %vm4079_vm5 = vcmp.eq.s32.totalorder %v1275_v18, 1  ;;  %vm4083_vm6 = vcmp.eq.s32.totalorder %v1276_v19, 1  ;;  %v4189_v18 = vcvt.s32.f32 %v3787_v4  ;;  %v8826_v48 = vmov 0 }
 0x16c   : > { %1082 = vperm.xlu0 %3561, %v3989_v50   ;;  %8760 = vst [vmem:[#allocation20_spill] sm:$0xff] %v4016_v15  ;;  %v8828_v49 = vmov 0 }
 0x16d   : > { %8761 = vst [vmem:[#allocation21_spill] sm:$0xff] %v4021_v22 }
 0x16e   : > { %8762 = vst [vmem:[#allocation22_spill] sm:$0xff] %v4023_v23 }
 0x16f   : > { %8763 = vst [vmem:[#allocation23_spill] sm:$0xff] %v4025_v24 }
 0x170   : > { %8764 = vst [vmem:[#allocation24_spill] sm:$0xff] %v4030_v34 }
 0x171   : > { %8765 = vst [vmem:[#allocation25_spill] sm:$0xff] %v4032_v36 }
 0x172   : > { %8766 = vst [vmem:[#allocation26_spill] sm:$0xff] %v4034_v37 }
 0x173   : > { %1107 = vperm.xlu2 %3563, %v3994_v57   ;;  %1102 = vperm.xlu1 %3562, %v3996_v58   ;;  %8767 = vst [vmem:[#allocation27_spill] sm:$0xff] %v4039_v47 }
 0x174   : > { %1097 = vperm.xlu0 %3561, %v3998_v59   ;;  %8768 = vst [vmem:[#allocation28_spill] sm:$0xff] %v4041_v51 }
 0x175   : > { %8769 = vst [vmem:[#allocation29_spill] sm:$0xff] %v4043_v52 }
 0x176   : > { %8770 = vst [vmem:[#allocation30_spill] sm:$0xff] %v4048_v62 }
 0x177   : > { %8771 = vst [vmem:[#allocation31_spill] sm:$0xff] %v4050_v63 }
 0x178   : > { %8772 = vst [vmem:[#allocation32_spill] sm:$0xff] %v4052_v0 }
 0x179   : > { %8773 = vst [vmem:[#allocation33_spill] sm:$0xff] %v4062_v10 }
 0x17a   : > { %8774 = vst [vmem:[#allocation34_spill] sm:$0xff] %v4064_v11 }
 0x17b   : > { %1122 = vperm.xlu2 %3563, %v4003_v2   ;;  %1117 = vperm.xlu1 %3562, %v4005_v5   ;;  %8775 = vst [vmem:[#allocation35_spill] sm:$0xff] %v4066_v12 }
 0x17c   : > { %1112 = vperm.xlu0 %3561, %v4007_v6   ;;  %v8813_v6 = vmov 0 }
 0x183   : > { %1137 = vperm.xlu2 %3563, %v4012_v13   ;;  %1132 = vperm.xlu1 %3562, %v4014_v14  }
 0x184   : > { %1127 = vperm.xlu0 %3561, %v4016_v15   ;;  %v8811_v15 = vmov 0 }
 0x18b   : > { %1152 = vperm.xlu2 %3563, %v4021_v22   ;;  %1147 = vperm.xlu1 %3562, %v4023_v23  }
 0x18c   : > { %1142 = vperm.xlu0 %3561, %v4025_v24  }
 0x193   : > { %1167 = vperm.xlu2 %3563, %v4030_v34   ;;  %1162 = vperm.xlu1 %3562, %v4032_v36  }
 0x194   : > { %1157 = vperm.xlu0 %3561, %v4034_v37  }
 0x19b   : > { %1182 = vperm.xlu2 %3563, %v4039_v47   ;;  %1177 = vperm.xlu1 %3562, %v4041_v51  }
 0x19c   : > { %1172 = vperm.xlu0 %3561, %v4043_v52  }
 0x1a3   : > { %1197 = vperm.xlu2 %3563, %v4048_v62   ;;  %1192 = vperm.xlu1 %3562, %v4050_v63  }
 0x1a4   : > { %1187 = vperm.xlu0 %3561, %v4052_v0  }
 0x1ab   : > { %1207 = vperm.xlu1 %3562, %v4064_v11  }
 0x1ac   : > { %1202 = vperm.xlu0 %3561, %v4066_v12  }
 0x1b5   : > { %v4087_v28 = vpop.permute.xlu2 %1072 }
 0x1b6   : > { %vm1218_vm7 = vcmp.le.f32.partialorder %v4075_v20, %v4087_v28  ;;  %vm1219_vm8 = vcmp.le.f32.partialorder %v4077_v21, %v4087_v28 }
 0x1b7   : > { %vm4095_vm9 = vmand %vm1218_vm7, %vm4079_vm5 }
 0x1b8   : > { %vm4101_vm10 = vmand %vm1219_vm8, %vm4083_vm6  ;;  %v1639_v30 = vsel %vm4095_vm9, %v4075_v20, -1.0 }
 0x1b9   : > { %v1640_v31 = vsel %vm4101_vm10, %v4077_v21, -1.0 }
 0x1ba   : > { %v4111_v38 = vmax.f32 %v1639_v30, %v1640_v31 }
 0x1bd   : > { %v4113_v42 = vpop.permute.xlu2 %1077 }
 0x1be   : > { %8784 = vst [vmem:[#allocation36_spill] sm:$0xff] %v4113_v42  ;;  %vm1220_vm11 = vcmp.le.f32.partialorder %v4075_v20, %v4113_v42  ;;  %vm1221_vm12 = vcmp.le.f32.partialorder %v4077_v21, %v4113_v42 }
 0x1bf   : > { %vm4121_vm13 = vmand %vm1220_vm11, %vm4079_vm5 }
 0x1c0   : > { %vm4127_vm14 = vmand %vm1221_vm12, %vm4083_vm6  ;;  %v1641_v45 = vsel %vm4121_vm13, %v4075_v20, -1.0 }
 0x1c1   : > { %v1642_v46 = vsel %vm4127_vm14, %v4077_v21, -1.0  ;;  %v1482_v22 = vsel %vm4127_vm14, %v4189_v18, -1.0  ;;  %vm1351_vm14 = vcmp.ge.f32.partialorder %v4075_v20, %v4087_v28 }
 0x1c2   : > { %v4137_v53 = vmax.f32 %v1641_v45, %v1642_v46 }
 0x1c5   : > { %v4139_v54 = vpop.permute.xlu2 %1092 }
 0x1c6   : > { %8789 = vst [vmem:[#allocation37_spill] sm:$0xff] %v4139_v54  ;;  %vm1226_vm15 = vcmp.le.f32.partialorder %v4075_v20, %v4139_v54  ;;  %vm1227_vm0 = vcmp.le.f32.partialorder %v4077_v21, %v4139_v54 }
 0x1c7   : > { %vm4147_vm1 = vmand %vm1226_vm15, %vm4079_vm5 }
 0x1c8   : > { %vm4153_vm3 = vmand %vm1227_vm0, %vm4083_vm6  ;;  %v1647_v60 = vsel %vm4147_vm1, %v4075_v20, -1.0 }
 0x1c9   : > { %v8793_v56 = vsel %vm4153_vm3, 4294967295, %v8792_v56  ;;  %v1648_v61 = vsel %vm4153_vm3, %v4077_v21, -1.0 }
 0x1ca   : > { %v4163_v1 = vmax.f32 %v1647_v60, %v1648_v61 }
 0x1cd   : > { %v4165_v7 = vpop.permute.xlu2 %1107  ;;  %v4167_v8 = vpop.permute.xlu1 %1062 }
 0x1ce   : > { %v4169_v9 = vpop.permute.xlu0 %1052  ;;  %vm1214_vm7 = vcmp.le.f32.partialorder %v4075_v20, %v4167_v8  ;;  %vm1215_vm12 = vcmp.le.f32.partialorder %v4077_v21, %v4167_v8  ;;  %vm1232_vm2 = vcmp.le.f32.partialorder %v4075_v20, %v4165_v7  ;;  %vm1233_vm4 = vcmp.le.f32.partialorder %v4077_v21, %v4165_v7 }
 0x1cf   : > { %vm1210_vm8 = vcmp.le.f32.partialorder %v4075_v20, %v4169_v9  ;;  %vm1211_vm11 = vcmp.le.f32.partialorder %v4077_v21, %v4169_v9  ;;  %vm4184_vm15 = vmand %vm1214_vm7, %vm4079_vm5 }
 0x1d0   : > { %vm1279_vm0 = vmand %vm1210_vm8, %vm4079_vm5  ;;  %v1475_v19 = vsel %vm4184_vm15, %v4174_v16, -1.0  ;;  %v1635_v30 = vsel %vm4184_vm15, %v4075_v20, -1.0 }
 0x1d1   : > { %vm1280_vm3 = vmand %vm1211_vm11, %vm4083_vm6  ;;  %v1471_v3 = vsel %vm1279_vm0, %v4174_v16, -1.0  ;;  %v1631_v4 = vsel %vm1279_vm0, %v4075_v20, -1.0 }
 0x1d2   : > { %v1472_v31 = vsel %vm1280_vm3, %v4189_v18, -1.0  ;;  %vm1284_vm7 = vmand %vm1215_vm12, %vm4083_vm6  ;;  %v1632_v45 = vsel %vm1280_vm3, %v4077_v21, -1.0 }
 0x1d3   : > { %v1535_v46 = vmax.f32 %v1471_v3, %v1472_v31  ;;  %v1476_v60 = vsel %vm1284_vm7, %v4189_v18, -1.0  ;;  %vm4214_vm8 = vmand %vm1232_vm2, %vm4079_vm5  ;;  %v4218_v12 = vmax.f32 %v1631_v4, %v1632_v45  ;;  %v1636_v17 = vsel %vm1284_vm7, %v4077_v21, -1.0 }
 0x1d4   : > { %v1541_v11 = vmax.f32 %v1475_v19, %v1476_v60  ;;  %vm4226_vm3 = vmand %vm1233_vm4, %vm4083_vm6  ;;  %v8798_v3 = vmov 0  ;;  %v4230_v31 = vmax.f32 %v1635_v30, %v1636_v17  ;;  %v1653_v62 = vsel %vm4214_vm8, %v4075_v20, -1.0 }
 0x1d5   : > { %v8799_v3 = vsel %vm4226_vm3, 4294967295, %v8798_v3  ;;  %1536 = vmax.xlane.f32.xlu2 %v1535_v46  ;;  %v4235_v4 = vpop.permute.xlu2 %1122  ;;  %v4237_v45 = vpop.permute.xlu1 %1067  ;;  %v1654_v19 = vsel %vm4226_vm3, %v4077_v21, -1.0 }
 0x1d6   : > { %1542 = vmax.xlane.f32.xlu1 %v1541_v11  ;;  %v4242_v60 = vpop.permute.xlu0 %1057  ;;  %vm1216_vm2 = vcmp.le.f32.partialorder %v4075_v20, %v4237_v45  ;;  %vm1217_vm4 = vcmp.le.f32.partialorder %v4077_v21, %v4237_v45  ;;  %v4258_v11 = vmax.f32 %v1653_v62, %v1654_v19  ;;  %vm1238_vm7 = vcmp.le.f32.partialorder %v4075_v20, %v4235_v4 }
 0x1d7   : > { %vm4250_vm11 = vmand %vm1216_vm2, %vm4079_vm5  ;;  %vm1212_vm12 = vcmp.le.f32.partialorder %v4075_v20, %v4242_v60  ;;  %vm1213_vm15 = vcmp.le.f32.partialorder %v4077_v21, %v4242_v60  ;;  %vm1239_vm3 = vcmp.le.f32.partialorder %v4077_v21, %v4235_v4 }
 0x1d8   : > { %vm1286_vm0 = vmand %vm1217_vm4, %vm4083_vm6  ;;  %v1477_v46 = vsel %vm4250_vm11, %v4174_v16, -1.0  ;;  %v1637_v17 = vsel %vm4250_vm11, %v4075_v20, -1.0 }
 0x1d9   : > { %v1478_v0 = vsel %vm1286_vm0, %v4189_v18, -1.0  ;;  %vm1281_vm2 = vmand %vm1212_vm12, %vm4079_vm5  ;;  %v1638_v62 = vsel %vm1286_vm0, %v4077_v21, -1.0 }
 0x1da   : > { %v1544_v19 = vmax.f32 %v1477_v46, %v1478_v0  ;;  %vm1282_vm4 = vmand %vm1213_vm15, %vm4083_vm6  ;;  %v1473_v63 = vsel %vm1281_vm2, %v4174_v16, -1.0  ;;  %v1633_v47 = vsel %vm1281_vm2, %v4075_v20, -1.0  ;;  %v4280_v30 = vmax.f32 %v1637_v17, %v1638_v62 }
 0x1db   : > { %v1474_v52 = vsel %vm1282_vm4, %v4189_v18, -1.0  ;;  %vm4285_vm11 = vmand %vm1238_vm7, %vm4079_vm5  ;;  %v1634_v34 = vsel %vm1282_vm4, %v4077_v21, -1.0 }
 0x1dc   : > { %v1538_v0 = vmax.f32 %v1473_v63, %v1474_v52  ;;  %vm4292_vm12 = vmand %vm1239_vm3, %vm4083_vm6  ;;  %v4296_v37 = vmax.f32 %v1633_v47, %v1634_v34  ;;  %v1659_v17 = vsel %vm4285_vm11, %v4075_v20, -1.0  ;;  %v1479_v34 = vsel %vm4095_vm9, %v4174_v16, -1.0 }
 0x1dd   : > { %1545 = vmax.xlane.f32.xlu2 %v1544_v19  ;;  %v4301_v62 = vpop.permute.xlu2 %1137  ;;  %v4303_v36 = vpop.permute.xlu1 %1087  ;;  %v1660_v52 = vsel %vm4292_vm12, %v4077_v21, -1.0  ;;  %v1480_v19 = vsel %vm4101_vm10, %v4189_v18, -1.0 }
 0x1de   : > { %1539 = vmax.xlane.f32.xlu0 %v1538_v0  ;;  %v4308_v63 = vpop.permute.xlu0 %1082  ;;  %vm1224_vm3 = vcmp.le.f32.partialorder %v4075_v20, %v4303_v36  ;;  %vm1225_vm7 = vcmp.le.f32.partialorder %v4077_v21, %v4303_v36  ;;  %v4327_v25 = vmax.f32 %v1659_v17, %v1660_v52  ;;  %v1481_v0 = vsel %vm4121_vm13, %v4174_v16, -1.0 }
 0x1df   : > { %vm1222_vm15 = vcmp.le.f32.partialorder %v4075_v20, %v4308_v63  ;;  %vm1223_vm0 = vcmp.le.f32.partialorder %v4077_v21, %v4308_v63  ;;  %vm4323_vm2 = vmand %vm1224_vm3, %vm4079_vm5  ;;  %vm1244_vm4 = vcmp.le.f32.partialorder %v4075_v20, %v4301_v62  ;;  %vm1245_vm10 = vcmp.le.f32.partialorder %v4077_v21, %v4301_v62 }
 0x1e0   : > { %8808 = vst [vmem:[#allocation38_spill] sm:$0xff] %v4327_v25  ;;  %vm1291_vm9 = vmand %vm1222_vm15, %vm4079_vm5  ;;  %v1645_v44 = vsel %vm4323_vm2, %v4075_v20, -1.0  ;;  %v1547_v23 = vmax.f32 %v1479_v34, %v1480_v19  ;;  %v1550_v5 = vmax.f32 %v1481_v0, %v1482_v22 }
 0x1e1   : > { %vm1292_vm3 = vmand %vm1223_vm0, %vm4083_vm6  ;;  %v1483_v29 = vsel %vm1291_vm9, %v4174_v16, -1.0  ;;  %v1643_v43 = vsel %vm1291_vm9, %v4075_v20, -1.0 }
 0x1e2   : > { %v1484_v17 = vsel %vm1292_vm3, %v4189_v18, -1.0  ;;  %vm4354_vm13 = vmand %vm1225_vm7, %vm4083_vm6  ;;  %v1644_v24 = vsel %vm1292_vm3, %v4077_v21, -1.0  ;;  %vm8815_vm7 = vnez %v8793_v56  ;;  %v1485_v56 = vsel %vm4323_vm2, %v4174_v16, -1.0 }
 0x1e3   : > { %v1553_v13 = vmax.f32 %v1483_v29, %v1484_v17  ;;  %vm4363_vm15 = vmand %vm1244_vm4, %vm4079_vm5  ;;  %v4367_v14 = vmax.f32 %v1643_v43, %v1644_v24  ;;  %v1646_v2 = vsel %vm4354_vm13, %v4077_v21, -1.0  ;;  %v1486_v43 = vsel %vm4354_vm13, %v4189_v18, -1.0 }
 0x1e4   : > { %v8812_v15 = vsel %vm4363_vm15, 4294967295, %v8811_v15  ;;  %vm4374_vm0 = vmand %vm1245_vm10, %vm4083_vm6  ;;  %v4378_v34 = vmax.f32 %v1645_v44, %v1646_v2  ;;  %v1665_v19 = vsel %vm4363_vm15, %v4075_v20, -1.0  ;;  %v1487_v2 = vsel %vm4147_vm1, %v4174_v16, -1.0 }
 0x1e5   : > { %v8814_v6 = vsel %vm4374_vm0, 4294967295, %v8813_v6  ;;  %1548 = vmax.xlane.f32.xlu2 %v1547_v23  ;;  %1554 = vmax.xlane.f32.xlu1 %v1553_v13  ;;  %v4383_v24 = vpop.permute.xlu2 %1152  ;;  %v4385_v29 = vpop.permute.xlu1 %1102  ;;  %v1666_v22 = vsel %vm4374_vm0, %v4077_v21, -1.0  ;;  %v1488_v23 = vsel %vm8815_vm7, %v4189_v18, -1.0  ;;  %vm4405_vm4 = vmand %vm1351_vm14, %vm4079_vm5  ;;  %v1556_v44 = vmax.f32 %v1485_v56, %v1486_v43 }
 0x1e6   : > { %1551 = vmax.xlane.f32.xlu0 %v1550_v5  ;;  %v4390_v0 = vpop.permute.xlu0 %1097  ;;  %vm1230_vm9 = vcmp.le.f32.partialorder %v4075_v20, %v4385_v29  ;;  %v8816_v5 = vmov 0  ;;  %vm1231_vm10 = vcmp.le.f32.partialorder %v4077_v21, %v4385_v29  ;;  %v4421_v55 = vmax.f32 %v1665_v19, %v1666_v22 }
 0x1e7   : > { %v8817_v5 = vsel %vm4405_vm4, 4294967295, %v8816_v5  ;;  %vm1228_vm3 = vcmp.le.f32.partialorder %v4075_v20, %v4390_v0  ;;  %vm1229_vm1 = vcmp.le.f32.partialorder %v4077_v21, %v4390_v0  ;;  %vm4417_vm7 = vmand %vm1230_vm9, %vm4079_vm5  ;;  %vm1250_vm9 = vcmp.le.f32.partialorder %v4075_v20, %v4383_v24 }
 0x1e8   : > { %8818 = vst [vmem:[#allocation39_spill] sm:$0xff] %v8817_v5  ;;  %vm4431_vm14 = vmand %vm1228_vm3, %vm4079_vm5  ;;  %vm1251_vm2 = vcmp.le.f32.partialorder %v4077_v21, %v4383_v24  ;;  %v1651_v52 = vsel %vm4417_vm7, %v4075_v20, -1.0  ;;  %v1559_v19 = vmax.f32 %v1487_v2, %v1488_v23  ;;  %vm1352_vm3 = vcmp.ge.f32.partialorder %v4077_v21, %v4087_v28 }
 0x1e9   : > { %8821 = vst [vmem:[#allocation40_spill] sm:$0xff] %v4421_v55  ;;  %vm1298_vm0 = vmand %vm1229_vm1, %vm4083_vm6  ;;  %v1489_v47 = vsel %vm4431_vm14, %v4174_v16, -1.0  ;;  %v1649_v17 = vsel %vm4431_vm14, %v4075_v20, -1.0  ;;  %v1959_v61 = vsel %vm4405_vm4, %v4075_v20, 2.0 }
 0x1ea   : > { %v1490_v22 = vsel %vm1298_vm0, %v4189_v18, -1.0  ;;  %vm4453_vm13 = vmand %vm1231_vm10, %vm4083_vm6  ;;  %v1650_v58 = vsel %vm1298_vm0, %v4077_v21, -1.0  ;;  %vm8841_vm10 = vcmp.ge.f32.partialorder %v4077_v21, %v4169_v9 }
 0x1eb   : > { %v1562_v59 = vmax.f32 %v1489_v47, %v1490_v22  ;;  %vm4462_vm1 = vmand %vm1250_vm9, %vm4079_vm5  ;;  %v4466_v2 = vmax.f32 %v1649_v17, %v1650_v58  ;;  %v1652_v23 = vsel %vm4453_vm13, %v4077_v21, -1.0  ;;  %v1493_v22 = vsel %vm4214_vm8, %v4174_v16, -1.0 }
 0x1ec   : > { %v8827_v48 = vsel %vm4462_vm1, 4294967295, %v8826_v48  ;;  %vm4473_vm0 = vmand %vm1251_vm2, %vm4083_vm6  ;;  %v4477_v56 = vmax.f32 %v1651_v52, %v1652_v23  ;;  %v1671_v43 = vsel %vm4462_vm1, %v4075_v20, -1.0  ;;  %vm8830_vm2 = vnez %v8799_v3 }
 0x1ed   : > { %v8829_v49 = vsel %vm4473_vm0, 4294967295, %v8828_v49  ;;  %1557 = vmax.xlane.f32.xlu2 %v1556_v44  ;;  %1563 = vmax.xlane.f32.xlu1 %v1562_v59  ;;  %v4486_v58 = vpop.permute.xlu2 %1167  ;;  %v4488_v47 = vpop.permute.xlu1 %1117  ;;  %v1672_v17 = vsel %vm4473_vm0, %v4077_v21, -1.0  ;;  %v1494_v59 = vsel %vm8830_vm2, %v4189_v18, -1.0  ;;  %vm4510_vm9 = vmand %vm1352_vm3, %vm4083_vm6  ;;  %vm8837_vm3 = vcmp.ge.f32.partialorder %v4075_v20, %v4169_v9 }
 0x1ee   : > { %1560 = vmax.xlane.f32.xlu0 %v1559_v19  ;;  %v4495_v52 = vpop.permute.xlu0 %1112  ;;  %vm1236_vm14 = vcmp.le.f32.partialorder %v4075_v20, %v4488_v47  ;;  %v8831_v19 = vmov 0  ;;  %v4529_v3 = vmax.f32 %v1671_v43, %v1672_v17  ;;  %vm4536_vm4 = vmand %vm8837_vm3, %vm4079_vm5  ;;  %v8838_v44 = vmov 0 }
 0x1ef   : > { %v8832_v19 = vsel %vm4510_vm9, 4294967295, %v8831_v19  ;;  %vm1234_vm8 = vcmp.le.f32.partialorder %v4075_v20, %v4495_v52  ;;  %vm1235_vm2 = vcmp.le.f32.partialorder %v4077_v21, %v4495_v52  ;;  %vm4525_vm0 = vmand %vm1236_vm14, %vm4079_vm5  ;;  %v8839_v44 = vsel %vm4536_vm4, 4294967295, %v8838_v44 }
 0x1f0   : > { %8833 = vst [vmem:[#allocation41_spill] sm:$0xff] %v8832_v19  ;;  %vm4545_vm14 = vmand %vm8841_vm10, %vm4083_vm6  ;;  %v8842_v23 = vmov 0  ;;  %v1491_v43 = vsel %vm4417_vm7, %v4174_v16, -1.0  ;;  %v1492_v17 = vsel %vm4453_vm13, %v4189_v18, -1.0  ;;  %vm1256_vm10 = vcmp.le.f32.partialorder %v4075_v20, %v4486_v58 }
 0x1f1   : > { %8836 = vst [vmem:[#allocation42_spill] sm:$0xff] %v4529_v3  ;;  %v8843_v23 = vsel %vm4545_vm14, 4294967295, %v8842_v23  ;;  %vm4557_vm3 = vmand %vm1234_vm8, %vm4079_vm5  ;;  %vm1257_vm1 = vcmp.le.f32.partialorder %v4077_v21, %v4486_v58  ;;  %v1657_v13 = vsel %vm4525_vm0, %v4075_v20, -1.0  ;;  %v1960_v39 = vsel %vm4510_vm9, %v4077_v21, 2.0 }
 0x1f2   : > { %8840 = vst [vmem:[#allocation43_spill] sm:$0xff] %v8839_v44  ;;  %vm1304_vm15 = vmand %vm1235_vm2, %vm4083_vm6  ;;  %v1495_v57 = vsel %vm4557_vm3, %v4174_v16, -1.0  ;;  %v1655_v9 = vsel %vm4557_vm3, %v4075_v20, -1.0  ;;  %vm8847_vm7 = vcmp.le.f32.partialorder %v4077_v21, %v4488_v47  ;;  %v4592_v33 = vmin.f32 %v1959_v61, %v1960_v39 }
 0x1f3   : > { %8844 = vst [vmem:[#allocation44_spill] sm:$0xff] %v8843_v23  ;;  %v1496_v32 = vsel %vm1304_vm15, %v4189_v18, -1.0  ;;  %vm4585_vm13 = vmand %vm8847_vm7, %vm4083_vm6  ;;  %v1656_v50 = vsel %vm1304_vm15, %v4077_v21, -1.0  ;;  %v1565_v41 = vmax.f32 %v1491_v43, %v1492_v17  ;;  %v1568_v5 = vmax.f32 %v1493_v22, %v1494_v59 }
 0x1f4   : > { %8850 = vst [vmem:[#allocation45_spill] sm:$0xff] %v4592_v33  ;;  %v1571_v35 = vmax.f32 %v1495_v57, %v1496_v32  ;;  %vm4596_vm2 = vmand %vm1256_vm10, %vm4079_vm5  ;;  %v4600_v54 = vmax.f32 %v1655_v9, %v1656_v50  ;;  %v1658_v19 = vsel %vm4585_vm13, %v4077_v21, -1.0  ;;  %v8854_v32 = vmov 0 }
 0x1f5   : > { %vm4610_vm15 = vmand %vm1257_vm1, %vm4083_vm6  ;;  %v4614_v39 = vmax.f32 %v1657_v13, %v1658_v19  ;;  %v1677_v61 = vsel %vm4596_vm2, %v4075_v20, -1.0  ;;  %1566 = vmax.xlane.f32.xlu2 %v1565_v41  ;;  %v4619_v43 = vpop.permute.xlu2 %1182  ;;  %v4621_v22 = vpop.permute.xlu1 %1132  ;;  %vm8857_vm1 = vcmp.ge.f32.partialorder %v4075_v20, %v4167_v8  ;;  %v8858_v19 = vmov 0 }
 0x1f6   : > { %8853 = vst [vmem:[#allocation46_spill] sm:$0xff] %v4600_v54  ;;  %v8855_v32 = vsel %vm4610_vm15, 4294967295, %v8854_v32  ;;  %1572 = vmax.xlane.f32.xlu1 %v1571_v35  ;;  %v1678_v59 = vsel %vm4610_vm15, %v4077_v21, -1.0  ;;  %vm4631_vm3 = vmand %vm8857_vm1, %vm4079_vm5  ;;  %1569 = vmax.xlane.f32.xlu0 %v1568_v5  ;;  %v4635_v41 = vpop.permute.xlu0 %1127  ;;  %v1499_v35 = vsel %vm4285_vm11, %v4174_v16, -1.0  ;;  %vm1242_vm10 = vcmp.le.f32.partialorder %v4075_v20, %v4621_v22 }
 0x1f7   : > { %8856 = vst [vmem:[#allocation47_spill] sm:$0xff] %v4614_v39  ;;  %v8859_v19 = vsel %vm4631_vm3, 4294967295, %v8858_v19  ;;  %vm8861_vm1 = vcmp.ge.f32.partialorder %v4077_v21, %v4167_v8  ;;  %v8862_v5 = vmov 0  ;;  %vm1240_vm11 = vcmp.le.f32.partialorder %v4075_v20, %v4635_v41  ;;  %vm4663_vm8 = vmand %vm1242_vm10, %vm4079_vm5 }
 0x1f8   : > { %8860 = vst [vmem:[#allocation48_spill] sm:$0xff] %v8859_v19  ;;  %vm4651_vm9 = vmand %vm8861_vm1, %vm4083_vm6  ;;  %vm1241_vm15 = vcmp.le.f32.partialorder %v4077_v21, %v4635_v41  ;;  %vm1243_vm7 = vcmp.le.f32.partialorder %v4077_v21, %v4621_v22  ;;  %v4667_v8 = vmax.f32 %v1677_v61, %v1678_v59  ;;  %v1497_v17 = vsel %vm4525_vm0, %v4174_v16, -1.0 }
 0x1f9   : > { %v8863_v5 = vsel %vm4651_vm9, 4294967295, %v8862_v5  ;;  %v1498_v57 = vsel %vm4585_vm13, %v4189_v18, -1.0  ;;  %v1500_v9 = vsel %vm4292_vm12, %v4189_v18, -1.0  ;;  %vm4680_vm10 = vmand %vm1240_vm11, %vm4079_vm5  ;;  %vm1262_vm1 = vcmp.le.f32.partialorder %v4075_v20, %v4619_v43 }
 0x1fa   : > { %8864 = vst [vmem:[#allocation49_spill] sm:$0xff] %v8863_v5  ;;  %vm1310_vm0 = vmand %vm1241_vm15, %vm4083_vm6  ;;  %v1501_v40 = vsel %vm4680_vm10, %v4174_v16, -1.0  ;;  %vm1263_vm13 = vcmp.le.f32.partialorder %v4077_v21, %v4619_v43  ;;  %v1661_v46 = vsel %vm4680_vm10, %v4075_v20, -1.0  ;;  %v1663_v28 = vsel %vm4663_vm8, %v4075_v20, -1.0 }
 0x1fb   : > { %8867 = vst [vmem:[#allocation50_spill] sm:$0xff] %v4667_v8  ;;  %v1502_v50 = vsel %vm1310_vm0, %v4189_v18, -1.0  ;;  %vm4702_vm12 = vmand %vm1243_vm7, %vm4083_vm6  ;;  %v1662_v59 = vsel %vm1310_vm0, %v4077_v21, -1.0  ;;  %v1951_v33 = vsel %vm4536_vm4, %v4075_v20, 2.0  ;;  %v1952_v13 = vsel %vm4545_vm14, %v4077_v21, 2.0 }
 0x1fc   : > { %v1574_v42 = vmax.f32 %v1497_v17, %v1498_v57  ;;  %v1580_v8 = vmax.f32 %v1501_v40, %v1502_v50  ;;  %vm4715_vm15 = vmand %vm1262_vm1, %vm4079_vm5  ;;  %v8872_v3 = vmov 0  ;;  %v4719_v55 = vmax.f32 %v1661_v46, %v1662_v59 }
 0x1fd   : > { %v8873_v3 = vsel %vm4715_vm15, 4294967295, %v8872_v3  ;;  %v1664_v25 = vsel %vm4702_vm12, %v4077_v21, -1.0  ;;  %v1577_v44 = vmax.f32 %v1499_v35, %v1500_v9  ;;  %vm4726_vm7 = vmand %vm1263_vm13, %vm4083_vm6  ;;  %v8875_v23 = vmov 0  ;;  %v4735_v40 = vpop.permute.xlu2 %1197  ;;  %v4737_v46 = vpop.permute.xlu1 %1147 }
 0x1fe   : > { %8874 = vst [vmem:[#allocation51_spill] sm:$0xff] %v4719_v55  ;;  %v8876_v23 = vsel %vm4726_vm7, 4294967295, %v8875_v23  ;;  %v4730_v17 = vmax.f32 %v1663_v28, %v1664_v25  ;;  %v1683_v57 = vsel %vm4715_vm15, %v4075_v20, -1.0  ;;  %1575 = vmax.xlane.f32.xlu2 %v1574_v42  ;;  %1581 = vmax.xlane.f32.xlu1 %v1580_v8  ;;  %v1684_v35 = vsel %vm4726_vm7, %v4077_v21, -1.0  ;;  %v4755_v8 = vpop.permute.xlu0 %1142 }
 0x1ff   : > { %vm8878_vm11 = vcmp.ge.f32.partialorder %v4075_v20, %v4242_v60  ;;  %v8879_v25 = vmov 0  ;;  %v4753_v42 = vmin.f32 %v1951_v33, %v1952_v13  ;;  %1578 = vmax.xlane.f32.xlu0 %v1577_v44  ;;  %vm8883_vm0 = vnez %v8812_v15 }
 0x200   : > { %8877 = vst [vmem:[#allocation52_spill] sm:$0xff] %v4730_v17  ;;  %vm4747_vm10 = vmand %vm8878_vm11, %vm4079_vm5  ;;  %v1505_v9 = vsel %vm8883_vm0, %v4174_v16, -1.0  ;;  %vm1248_vm13 = vcmp.le.f32.partialorder %v4075_v20, %v4737_v46  ;;  %vm8884_vm11 = vcmp.ge.f32.partialorder %v4077_v21, %v4242_v60  ;;  %v8885_v28 = vmov 0 }
 0x201   : > { %v8880_v25 = vsel %vm4747_vm10, 4294967295, %v8879_v25  ;;  %8882 = vst [vmem:[#allocation54_spill] sm:$0xff] %v4753_v42  ;;  %vm4767_vm14 = vmand %vm8884_vm11, %vm4083_vm6  ;;  %v1955_v33 = vsel %vm4631_vm3, %v4075_v20, 2.0  ;;  %v1956_v15 = vsel %vm4651_vm9, %v4077_v21, 2.0  ;;  %vm1246_vm0 = vcmp.le.f32.partialorder %v4075_v20, %v4755_v8 }
 0x202   : > { %8881 = vst [vmem:[#allocation53_spill] sm:$0xff] %v8880_v25  ;;  %v8886_v28 = vsel %vm4767_vm14, 4294967295, %v8885_v28  ;;  %vm1247_vm1 = vcmp.le.f32.partialorder %v4077_v21, %v4755_v8  ;;  %vm1249_vm11 = vcmp.le.f32.partialorder %v4077_v21, %v4737_v46  ;;  %vm4785_vm4 = vmand %vm1248_vm13, %vm4079_vm5  ;;  %v4789_v44 = vmax.f32 %v1683_v57, %v1684_v35 }
 0x203   : > { %8887 = vst [vmem:[#allocation55_spill] sm:$0xff] %v8886_v28  ;;  %v1503_v50 = vsel %vm4663_vm8, %v4174_v16, -1.0  ;;  %v1504_v59 = vsel %vm4702_vm12, %v4189_v18, -1.0  ;;  %vm8891_vm9 = vnez %v8814_v6  ;;  %vm4802_vm13 = vmand %vm1246_vm0, %vm4079_vm5  ;;  %vm1268_vm3 = vcmp.le.f32.partialorder %v4075_v20, %v4735_v40 }
 0x204   : > { %8890 = vst [vmem:[#allocation56_spill] sm:$0xff] %v4789_v44  ;;  %v1506_v13 = vsel %vm8891_vm9, %v4189_v18, -1.0  ;;  %vm1316_vm8 = vmand %vm1247_vm1, %vm4083_vm6  ;;  %v1507_v51 = vsel %vm4802_vm13, %v4174_v16, -1.0  ;;  %vm1269_vm12 = vcmp.le.f32.partialorder %v4077_v21, %v4735_v40  ;;  %v1667_v6 = vsel %vm4802_vm13, %v4075_v20, -1.0 }
 0x205   : > { %v1669_v61 = vsel %vm4785_vm4, %v4075_v20, -1.0  ;;  %v1508_v57 = vsel %vm1316_vm8, %v4189_v18, -1.0  ;;  %vm4824_vm9 = vmand %vm1249_vm11, %vm4083_vm6  ;;  %v1668_v5 = vsel %vm1316_vm8, %v4077_v21, -1.0  ;;  %vm1350_vm1 = vcmp.ge.f32.partialorder %v4077_v21, %v4237_v45 }
 0x206   : > { %v4831_v19 = vmin.f32 %v1955_v33, %v1956_v15  ;;  %v1583_v42 = vmax.f32 %v1503_v50, %v1504_v59  ;;  %v1589_v44 = vmax.f32 %v1507_v51, %v1508_v57  ;;  %vm4835_vm0 = vmand %vm1268_vm3, %vm4079_vm5  ;;  %v8897_v55 = vmov 0 }
 0x207   : > { %v8898_v55 = vsel %vm4835_vm0, 4294967295, %v8897_v55  ;;  %v4839_v17 = vmax.f32 %v1667_v6, %v1668_v5  ;;  %v1670_v54 = vsel %vm4824_vm9, %v4077_v21, -1.0  ;;  %v1586_v39 = vmax.f32 %v1505_v9, %v1506_v13  ;;  %vm4846_vm11 = vmand %vm1269_vm12, %vm4083_vm6  ;;  %v4857_v5 = vpop.permute.xlu1 %1162  ;;  %v4879_v13 = vpop.permute.xlu0 %1157 }
 0x208   : > { %8896 = vst [vmem:[#allocation57_spill] sm:$0xff] %v4831_v19  ;;  %v8900_v33 = vmov 0  ;;  %v4850_v15 = vmax.f32 %v1669_v61, %v1670_v54  ;;  %v1689_v50 = vsel %vm4835_vm0, %v4075_v20, -1.0  ;;  %1584 = vmax.xlane.f32.xlu2 %v1583_v42  ;;  %1590 = vmax.xlane.f32.xlu1 %v1589_v44  ;;  %v1690_v9 = vsel %vm4846_vm11, %v4077_v21, -1.0  ;;  %vm4893_vm12 = vmand %vm1350_vm1, %vm4083_vm6 }
 0x209   : > { %8899 = vst [vmem:[#allocation58_spill] sm:$0xff] %v4839_v17  ;;  %v8901_v33 = vsel %vm4846_vm11, 4294967295, %v8900_v33  ;;  %vm8903_vm13 = vcmp.ge.f32.partialorder %v4075_v20, %v4237_v45  ;;  %v8904_v54 = vmov 0  ;;  %v1953_v44 = vsel %vm4747_vm10, %v4075_v20, 2.0  ;;  %1587 = vmax.xlane.f32.xlu0 %v1586_v39 }
 0x20a   : > { %8902 = vst [vmem:[#allocation59_spill] sm:$0xff] %v4850_v15  ;;  %vm4867_vm8 = vmand %vm8903_vm13, %vm4079_vm5  ;;  %v1954_v59 = vsel %vm4767_vm14, %v4077_v21, 2.0  ;;  %vm8907_vm13 = vnez %v8827_v48  ;;  %vm1254_vm3 = vcmp.le.f32.partialorder %v4075_v20, %v4857_v5  ;;  %v4886_v6 = vmax.f32 %v1689_v50, %v1690_v9 }
 0x20b   : > { %v8905_v54 = vsel %vm4867_vm8, 4294967295, %v8904_v54  ;;  %v1511_v51 = vsel %vm8907_vm13, %v4174_v16, -1.0  ;;  %v8909_v61 = vmov 0  ;;  %vm1357_vm14 = vcmp.ge.f32.partialorder %v4075_v20, %v4303_v36  ;;  %vm4910_vm1 = vmand %vm1254_vm3, %vm4079_vm5 }
 0x20c   : > { %8906 = vst [vmem:[#allocation60_spill] sm:$0xff] %v8905_v54  ;;  %v8910_v61 = vsel %vm4893_vm12, 4294967295, %v8909_v61  ;;  %vm8912_vm13 = vnez %v8829_v49  ;;  %vm1252_vm10 = vcmp.le.f32.partialorder %v4075_v20, %v4879_v13  ;;  %vm1253_vm11 = vcmp.le.f32.partialorder %v4077_v21, %v4879_v13 }
 0x20d   : > { %8908 = vst [vmem:[#allocation61_spill] sm:$0xff] %v4886_v6  ;;  %v1512_v48 = vsel %vm8912_vm13, %v4189_v18, -1.0  ;;  %vm1255_vm0 = vcmp.le.f32.partialorder %v4077_v21, %v4857_v5  ;;  %v1509_v49 = vsel %vm4785_vm4, %v4174_v16, -1.0  ;;  %v1510_v39 = vsel %vm4824_vm9, %v4189_v18, -1.0  ;;  %vm1321_vm13 = vmand %vm1252_vm10, %vm4079_vm5 }
 0x20e   : > { %8911 = vst [vmem:[#allocation62_spill] sm:$0xff] %v8910_v61  ;;  %v1675_v57 = vsel %vm4910_vm1, %v4075_v20, -1.0  ;;  %v4925_v42 = vmin.f32 %v1953_v44, %v1954_v59  ;;  %vm1322_vm3 = vmand %vm1253_vm11, %vm4083_vm6  ;;  %v1513_v50 = vsel %vm1321_vm13, %v4174_v16, -1.0  ;;  %v1673_v60 = vsel %vm1321_vm13, %v4075_v20, -1.0 }
 0x20f   : > { %v1957_v35 = vsel %vm4867_vm8, %v4075_v20, 2.0  ;;  %v1958_v9 = vsel %vm4893_vm12, %v4077_v21, 2.0  ;;  %v1514_v19 = vsel %vm1322_vm3, %v4189_v18, -1.0  ;;  %vm4940_vm4 = vmand %vm1255_vm0, %vm4083_vm6  ;;  %v1674_v59 = vsel %vm1322_vm3, %v4077_v21, -1.0 }
 0x210   : > { %8915 = vst [vmem:[#allocation63_spill] sm:$0xff] %v4925_v42  ;;  %vm1358_vm10 = vcmp.ge.f32.partialorder %v4077_v21, %v4303_v36  ;;  %v4947_v42 = vmin.f32 %v1957_v35, %v1958_v9  ;;  %v1592_v54 = vmax.f32 %v1509_v49, %v1510_v39  ;;  %v1598_v28 = vmax.f32 %v1513_v50, %v1514_v19  ;;  %v4974_v49 = vpop.permute.xlu1 %1177  ;;  %vm4981_vm3 = vmand %vm1357_vm14, %vm4079_vm5 }
 0x211   : > { %v4949_v25 = vmax.f32 %v1673_v60, %v1674_v59  ;;  %v1676_v61 = vsel %vm4940_vm4, %v4077_v21, -1.0  ;;  %vm8920_vm9 = vcmp.ge.f32.partialorder %v4075_v20, %v4308_v63  ;;  %v8921_v6 = vmov 0 }
 0x212   : > { %8918 = vst [vmem:[#allocation64_spill] sm:$0xff] %v4947_v42  ;;  %vm4959_vm0 = vmand %vm8920_vm9, %vm4079_vm5  ;;  %v1595_v17 = vmax.f32 %v1511_v51, %v1512_v48  ;;  %v4963_v35 = vmax.f32 %v1675_v57, %v1676_v61  ;;  %vm8925_vm11 = vcmp.ge.f32.partialorder %v4077_v21, %v4308_v63  ;;  %v8926_v19 = vmov 0  ;;  %1593 = vmax.xlane.f32.xlu2 %v1592_v54  ;;  %v4985_v61 = vpop.permute.xlu0 %1172 }
 0x213   : > { %8919 = vst [vmem:[#allocation65_spill] sm:$0xff] %v4949_v25  ;;  %v8922_v6 = vsel %vm4959_vm0, 4294967295, %v8921_v6  ;;  %vm4970_vm13 = vmand %vm8925_vm11, %vm4083_vm6  ;;  %1599 = vmax.xlane.f32.xlu1 %v1598_v28  ;;  %v8929_v51 = vmov 0  ;;  %vm1260_vm9 = vcmp.le.f32.partialorder %v4075_v20, %v4974_v49  ;;  %v8932_v63 = vmov 0 }
 0x214   : > { %8923 = vst [vmem:[#allocation66_spill] sm:$0xff] %v8922_v6  ;;  %v8927_v19 = vsel %vm4970_vm13, 4294967295, %v8926_v19  ;;  %v8930_v51 = vsel %vm4981_vm3, 4294967295, %v8929_v51  ;;  %1596 = vmax.xlane.f32.xlu0 %v1595_v17  ;;  %vm4994_vm11 = vmand %vm1358_vm10, %vm4083_vm6  ;;  %vm1258_vm12 = vcmp.le.f32.partialorder %v4075_v20, %v4985_v61  ;;  %vm1259_vm8 = vcmp.le.f32.partialorder %v4077_v21, %v4985_v61 }
 0x215   : > { %8924 = vst [vmem:[#allocation67_spill] sm:$0xff] %v4963_v35  ;;  %v8933_v63 = vsel %vm4994_vm11, 4294967295, %v8932_v63  ;;  %vm1261_vm7 = vcmp.le.f32.partialorder %v4077_v21, %v4974_v49  ;;  %vm5008_vm15 = vmand %vm1260_vm9, %vm4079_vm5  ;;  %v1515_v17 = vsel %vm4910_vm1, %v4174_v16, -1.0  ;;  %v1516_v28 = vsel %vm4940_vm4, %v4189_v18, -1.0 }
 0x216   : > { %8928 = vst [vmem:[#allocation68_spill] sm:$0xff] %v8927_v19  ;;  %v1517_v54 = vsel %vm4596_vm2, %v4174_v16, -1.0  ;;  %vm8937_vm9 = vnez %v8855_v32  ;;  %vm1327_vm14 = vmand %vm1258_vm12, %vm4079_vm5  ;;  %v1681_v57 = vsel %vm5008_vm15, %v4075_v20, -1.0  ;;  %v1963_v10 = vsel %vm4959_vm0, %v4075_v20, 2.0 }
 0x217   : > { %8931 = vst [vmem:[#allocation69_spill] sm:$0xff] %v8930_v51  ;;  %v1518_v48 = vsel %vm8937_vm9, %v4189_v18, -1.0  ;;  %vm1328_vm10 = vmand %vm1259_vm8, %vm4083_vm6  ;;  %v1519_v45 = vsel %vm1327_vm14, %v4174_v16, -1.0  ;;  %v1679_v39 = vsel %vm1327_vm14, %v4075_v20, -1.0  ;;  %vm1363_vm8 = vcmp.ge.f32.partialorder %v4075_v20, %v4385_v29 }
 0x218   : > { %8934 = vst [vmem:[#allocation70_spill] sm:$0xff] %v8933_v63  ;;  %v1520_v32 = vsel %vm1328_vm10, %v4189_v18, -1.0  ;;  %vm5041_vm2 = vmand %vm1261_vm7, %vm4083_vm6  ;;  %v1680_v60 = vsel %vm1328_vm10, %v4077_v21, -1.0  ;;  %v1964_v9 = vsel %vm4970_vm13, %v4077_v21, 2.0  ;;  %v1601_v44 = vmax.f32 %v1515_v17, %v1516_v28 }
 0x219   : > { %v1607_v59 = vmax.f32 %v1519_v45, %v1520_v32  ;;  %v5051_v42 = vmax.f32 %v1679_v39, %v1680_v60  ;;  %v1682_v6 = vsel %vm5041_vm2, %v4077_v21, -1.0  ;;  %v1604_v25 = vmax.f32 %v1517_v54, %v1518_v48  ;;  %v5072_v54 = vpop.permute.xlu1 %1192  ;;  %vm5095_vm10 = vmand %vm1363_vm8, %vm4079_vm5 }
 0x21a   : > { %v5056_v35 = vmax.f32 %v1681_v57, %v1682_v6  ;;  %vm8940_vm7 = vcmp.ge.f32.partialorder %v4075_v20, %v4390_v0  ;;  %v8941_v15 = vmov 0  ;;  %v5067_v17 = vmin.f32 %v1963_v10, %v1964_v9  ;;  %1602 = vmax.xlane.f32.xlu2 %v1601_v44  ;;  %v5086_v45 = vpop.permute.xlu0 %1187 }
 0x21b   : > { %vm5063_vm12 = vmand %vm8940_vm7, %vm4079_vm5  ;;  %v1965_v28 = vsel %vm4981_vm3, %v4075_v20, 2.0  ;;  %1608 = vmax.xlane.f32.xlu1 %v1607_v59  ;;  %vm8945_vm1 = vcmp.ge.f32.partialorder %v4077_v21, %v4390_v0  ;;  %v8946_v6 = vmov 0  ;;  %v1966_v48 = vsel %vm4994_vm11, %v4077_v21, 2.0 }
 0x21c   : > { %v8942_v15 = vsel %vm5063_vm12, 4294967295, %v8941_v15  ;;  %8944 = vst [vmem:[#allocation72_spill] sm:$0xff] %v5067_v17  ;;  %vm5079_vm4 = vmand %vm8945_vm1, %vm4083_vm6  ;;  %1605 = vmax.xlane.f32.xlu0 %v1604_v25  ;;  %vm1266_vm14 = vcmp.le.f32.partialorder %v4075_v20, %v5072_v54  ;;  %v8949_v0 = vmov 0  ;;  %vm1264_vm7 = vcmp.le.f32.partialorder %v4075_v20, %v5086_v45 }
 0x21d   : > { %8943 = vst [vmem:[#allocation71_spill] sm:$0xff] %v8942_v15  ;;  %v8947_v6 = vsel %vm5079_vm4, 4294967295, %v8946_v6  ;;  %v8950_v0 = vsel %vm5095_vm10, 4294967295, %v8949_v0  ;;  %vm1265_vm1 = vcmp.le.f32.partialorder %v4077_v21, %v5086_v45  ;;  %vm1267_vm11 = vcmp.le.f32.partialorder %v4077_v21, %v5072_v54  ;;  %vm5109_vm3 = vmand %vm1266_vm14, %vm4079_vm5 }
 0x21e   : > { %8948 = vst [vmem:[#allocation73_spill] sm:$0xff] %v8947_v6  ;;  %v5113_v39 = vmin.f32 %v1965_v28, %v1966_v48  ;;  %v1521_v57 = vsel %vm5008_vm15, %v4174_v16, -1.0  ;;  %v1522_v10 = vsel %vm5041_vm2, %v4189_v18, -1.0  ;;  %vm8955_vm8 = vnez %v8873_v3  ;;  %vm1333_vm14 = vmand %vm1264_vm7, %vm4079_vm5 }
 0x21f   : > { %8951 = vst [vmem:[#allocation74_spill] sm:$0xff] %v8950_v0  ;;  %v1523_v32 = vsel %vm8955_vm8, %v4174_v16, -1.0  ;;  %vm1364_vm9 = vcmp.ge.f32.partialorder %v4077_v21, %v4385_v29  ;;  %vm8956_vm13 = vnez %v8876_v23  ;;  %vm1334_vm15 = vmand %vm1265_vm1, %vm4083_vm6  ;;  %v1525_v36 = vsel %vm1333_vm14, %v4174_v16, -1.0 }
 0x220   : > { %8954 = vst [vmem:[#allocation75_spill] sm:$0xff] %v5113_v39  ;;  %v1524_v60 = vsel %vm8956_vm13, %v4189_v18, -1.0  ;;  %v1685_v50 = vsel %vm1333_vm14, %v4075_v20, -1.0  ;;  %v1687_v3 = vsel %vm5109_vm3, %v4075_v20, -1.0  ;;  %v1526_v9 = vsel %vm1334_vm15, %v4189_v18, -1.0  ;;  %vm5141_vm2 = vmand %vm1267_vm11, %vm4083_vm6 }
 0x221   : > { %v1686_v23 = vsel %vm1334_vm15, %v4077_v21, -1.0  ;;  %vm1366_vm13 = vcmp.ge.f32.partialorder %v4077_v21, %v4165_v7  ;;  %v1610_v59 = vmax.f32 %v1521_v57, %v1522_v10  ;;  %v1616_v28 = vmax.f32 %v1525_v36, %v1526_v9  ;;  %vm5160_vm11 = vmand %vm1364_vm9, %vm4083_vm6  ;;  %v5175_v10 = vpop.permute.xlu1 %1207 }
 0x222   : > { %v5150_v48 = vmax.f32 %v1685_v50, %v1686_v23  ;;  %v1688_v39 = vsel %vm5141_vm2, %v4077_v21, -1.0  ;;  %v8960_v17 = vmov 0  ;;  %v1613_v63 = vmax.f32 %v1523_v32, %v1524_v60  ;;  %vm5182_vm14 = vmand %vm1366_vm13, %vm4083_vm6 }
 0x223   : > { %v8961_v17 = vsel %vm5160_vm11, 4294967295, %v8960_v17  ;;  %v5164_v51 = vmax.f32 %v1687_v3, %v1688_v39  ;;  %vm8963_vm1 = vcmp.ge.f32.partialorder %v4075_v20, %v4165_v7  ;;  %v8964_v57 = vmov 0  ;;  %1611 = vmax.xlane.f32.xlu2 %v1610_v59  ;;  %1617 = vmax.xlane.f32.xlu1 %v1616_v28  ;;  %v5188_v7 = vpop.permute.xlu0 %1202 }
 0x224   : > { %8959 = vst [vmem:[#allocation76_spill] sm:$0xff] %v5150_v48  ;;  %vm5171_vm8 = vmand %vm8963_vm1, %vm4079_vm5  ;;  %vm8966_vm9 = vnez %v8898_v55  ;;  %v8967_v39 = vmov 0  ;;  %1614 = vmax.xlane.f32.xlu0 %v1613_v63  ;;  %vm8969_vm1 = vnez %v8901_v33  ;;  %vm1272_vm7 = vcmp.le.f32.partialorder %v4075_v20, %v5175_v10 }
 0x225   : > { %8962 = vst [vmem:[#allocation77_spill] sm:$0xff] %v8961_v17  ;;  %v8965_v57 = vsel %vm5171_vm8, 4294967295, %v8964_v57  ;;  %v1529_v29 = vsel %vm8966_vm9, %v4174_v16, -1.0  ;;  %v8968_v39 = vsel %vm5182_vm14, 4294967295, %v8967_v39  ;;  %v1530_v32 = vsel %vm8969_vm1, %v4189_v18, -1.0  ;;  %vm5218_vm0 = vmand %vm1272_vm7, %vm4079_vm5 }
 0x226   : > { %vm8970_vm13 = vcmp.ge.f32.partialorder %v4075_v20, %v4495_v52  ;;  %v8971_v55 = vmov 0  ;;  %v1969_v63 = vsel %vm5063_vm12, %v4075_v20, 2.0  ;;  %v1970_v33 = vsel %vm5079_vm4, %v4077_v21, 2.0 }
 0x227   : > { %vm5200_vm9 = vmand %vm8970_vm13, %vm4079_vm5  ;;  %vm1270_vm1 = vcmp.le.f32.partialorder %v4075_v20, %v5188_v7  ;;  %vm1271_vm15 = vcmp.le.f32.partialorder %v4077_v21, %v5188_v7  ;;  %vm1273_vm13 = vcmp.le.f32.partialorder %v4077_v21, %v5175_v10  ;;  %v1527_v36 = vsel %vm5109_vm3, %v4174_v16, -1.0 }
 0x228   : > { %v8972_v55 = vsel %vm5200_vm9, 4294967295, %v8971_v55  ;;  %v1528_v50 = vsel %vm5141_vm2, %v4189_v18, -1.0  ;;  %vm1339_vm4 = vmand %vm1270_vm1, %vm4079_vm5  ;;  %v1693_v3 = vsel %vm5218_vm0, %v4075_v20, -1.0  ;;  %vm1369_vm7 = vcmp.ge.f32.partialorder %v4075_v20, %v4488_v47 }
 0x229   : > { %vm1340_vm12 = vmand %vm1271_vm15, %vm4083_vm6  ;;  %v1531_v25 = vsel %vm1339_vm4, %v4174_v16, -1.0  ;;  %v1691_v9 = vsel %vm1339_vm4, %v4075_v20, -1.0  ;;  %v5241_v23 = vmin.f32 %v1969_v63, %v1970_v33  ;;  %v1971_v44 = vsel %vm5095_vm10, %v4075_v20, 2.0 }
 0x22a   : > { %v1532_v59 = vsel %vm1340_vm12, %v4189_v18, -1.0  ;;  %vm5249_vm3 = vmand %vm1273_vm13, %vm4083_vm6  ;;  %v1692_v6 = vsel %vm1340_vm12, %v4077_v21, -1.0  ;;  %vm1370_vm2 = vcmp.ge.f32.partialorder %v4077_v21, %v4488_v47  ;;  %v1972_v63 = vsel %vm5160_vm11, %v4077_v21, 2.0 }
 0x22b   : > { %8975 = vst [vmem:[#allocation78_spill] sm:$0xff] %v5241_v23  ;;  %v1619_v33 = vmax.f32 %v1527_v36, %v1528_v50  ;;  %v1625_v23 = vmax.f32 %v1531_v25, %v1532_v59  ;;  %v5259_v0 = vmax.f32 %v1691_v9, %v1692_v6  ;;  %v1694_v15 = vsel %vm5249_vm3, %v4077_v21, -1.0  ;;  %vm5280_vm15 = vmand %vm1369_vm7, %vm4079_vm5 }
 0x22c   : > { %vm8978_vm12 = vcmp.ge.f32.partialorder %v4077_v21, %v4495_v52  ;;  %v8979_v19 = vmov 0  ;;  %v1622_v48 = vmax.f32 %v1529_v29, %v1530_v32  ;;  %v5273_v17 = vmax.f32 %v1693_v3, %v1694_v15  ;;  %vm5290_vm13 = vmand %vm1370_vm2, %vm4083_vm6 }
 0x22d   : > { %vm5269_vm4 = vmand %vm8978_vm12, %vm4083_vm6  ;;  %v8981_v6 = vmov 0  ;;  %vm1372_vm1 = vcmp.ge.f32.partialorder %v4077_v21, %v4235_v4  ;;  %v5286_v52 = vmin.f32 %v1971_v44, %v1972_v63  ;;  %1620 = vmax.xlane.f32.xlu2 %v1619_v33  ;;  %1626 = vmax.xlane.f32.xlu1 %v1625_v23  ;;  %v8984_v15 = vmov 0 }
 0x22e   : > { %v8980_v19 = vsel %vm5269_vm4, 4294967295, %v8979_v19  ;;  %v8982_v6 = vsel %vm5280_vm15, 4294967295, %v8981_v6  ;;  %v8985_v15 = vsel %vm5290_vm13, 4294967295, %v8984_v15  ;;  %vm1373_vm12 = vcmp.ge.f32.partialorder %v4075_v20, %v4635_v41  ;;  %1623 = vmax.xlane.f32.xlu0 %v1622_v48  ;;  %vm5312_vm2 = vmand %vm1372_vm1, %vm4083_vm6 }
 0x22f   : > { %8983 = vst [vmem:[#allocation79_spill] sm:$0xff] %v5286_v52  ;;  %vm8986_vm7 = vcmp.ge.f32.partialorder %v4075_v20, %v4235_v4  ;;  %v8987_v47 = vmov 0  ;;  %vm1374_vm10 = vcmp.ge.f32.partialorder %v4077_v21, %v4635_v41  ;;  %v1973_v29 = vsel %vm5171_vm8, %v4075_v20, 2.0  ;;  %vm5328_vm1 = vmand %vm1373_vm12, %vm4079_vm5 }
 0x230   : > { %vm5301_vm11 = vmand %vm8986_vm7, %vm4079_vm5  ;;  %v8989_v48 = vmov 0  ;;  %vm1375_vm13 = vcmp.ge.f32.partialorder %v4075_v20, %v4621_v22  ;;  %vm1377_vm7 = vcmp.ge.f32.partialorder %v4075_v20, %v4301_v62  ;;  %v1533_v4 = vsel %vm5218_vm0, %v4174_v16, -1.0 }
 0x231   : > { %v8988_v47 = vsel %vm5301_vm11, 4294967295, %v8987_v47  ;;  %v8990_v48 = vsel %vm5312_vm2, 4294967295, %v8989_v48  ;;  %v1534_v41 = vsel %vm5249_vm3, %v4189_v18, -1.0  ;;  %vm1378_vm8 = vcmp.ge.f32.partialorder %v4077_v21, %v4301_v62  ;;  %vm5339_vm0 = vmand %vm1374_vm10, %vm4083_vm6 }
 0x232   : > { %v1974_v36 = vsel %vm5182_vm14, %v4077_v21, 2.0  ;;  %v8993_v60 = vmov 0  ;;  %vm1376_vm3 = vcmp.ge.f32.partialorder %v4077_v21, %v4621_v22  ;;  %vm1379_vm12 = vcmp.ge.f32.partialorder %v4075_v20, %v4755_v8  ;;  %vm5354_vm14 = vmand %vm1375_vm13, %vm4079_vm5 }
 0x233   : > { %v8994_v60 = vsel %vm5339_vm0, 4294967295, %v8993_v60  ;;  %v5347_v50 = vmin.f32 %v1973_v29, %v1974_v36  ;;  %v1975_v62 = vsel %vm5200_vm9, %v4075_v20, 2.0  ;;  %v8996_v3 = vmov 0  ;;  %vm5360_vm10 = vmand %vm1377_vm7, %vm4079_vm5 }
 0x234   : > { %v8997_v3 = vsel %vm5354_vm14, 4294967295, %v8996_v3  ;;  %v8998_v25 = vmov 0  ;;  %vm1380_vm0 = vcmp.ge.f32.partialorder %v4077_v21, %v4755_v8  ;;  %v1976_v22 = vsel %vm5269_vm4, %v4077_v21, 2.0  ;;  %vm5371_vm13 = vmand %vm1378_vm8, %vm4083_vm6 }
 0x235   : > { %8995 = vst [vmem:[#allocation80_spill] sm:$0xff] %v5347_v50  ;;  %v8999_v25 = vsel %vm5360_vm10, 4294967295, %v8998_v25  ;;  %v1628_v9 = vmax.f32 %v1533_v4, %v1534_v41  ;;  %v9000_v23 = vmov 0  ;;  %vm1381_vm7 = vcmp.ge.f32.partialorder %v4075_v20, %v4737_v46  ;;  %vm5381_vm9 = vmand %vm1376_vm3, %vm4083_vm6  ;;  %1699 = vmax.xlane.f32.xlu1 %v4296_v37 }
 0x236   : > { %v9001_v23 = vsel %vm5371_vm13, 4294967295, %v9000_v23  ;;  %v5377_v44 = vmin.f32 %v1975_v62, %v1976_v22  ;;  %v9003_v8 = vmov 0  ;;  %vm5387_vm4 = vmand %vm1379_vm12, %vm4079_vm5  ;;  %v9005_v59 = vmov 0  ;;  %1696 = vmax.xlane.f32.xlu0 %v4218_v12 }
 0x237   : > { %v9004_v8 = vsel %vm5381_vm9, 4294967295, %v9003_v8  ;;  %v9006_v59 = vsel %vm5387_vm4, 4294967295, %v9005_v59  ;;  %vm1382_vm8 = vcmp.ge.f32.partialorder %v4077_v21, %v4737_v46  ;;  %v1977_v28 = vsel %vm5280_vm15, %v4075_v20, 2.0  ;;  %1629 = vmax.xlane.f32.xlu2 %v1628_v9  ;;  %vm5402_vm3 = vmand %vm1380_vm0, %vm4083_vm6 }
 0x238   : > { %9002 = vst [vmem:[#allocation81_spill] sm:$0xff] %v5377_v44  ;;  %vm9007_vm14 = vnez %v8985_v15  ;;  %v9008_v33 = vmov 0  ;;  %vm1383_vm12 = vcmp.ge.f32.partialorder %v4075_v20, %v4383_v24  ;;  %vm5411_vm15 = vmand %vm1381_vm7, %vm4079_vm5  ;;  %v9010_v46 = vmov 0 }
 0x239   : > { %v1978_v63 = vsel %vm9007_vm14, %v4077_v21, 2.0  ;;  %v9009_v33 = vsel %vm5402_vm3, 4294967295, %v9008_v33  ;;  %v9011_v46 = vsel %vm5411_vm15, 4294967295, %v9010_v46  ;;  %vm1384_vm14 = vcmp.ge.f32.partialorder %v4077_v21, %v4383_v24  ;;  %vm5419_vm0 = vmand %vm1382_vm8, %vm4083_vm6 }
 0x23a   : > { %9012 = vst [vmem:[#allocation82_spill] sm:$0xff] %v9011_v46  ;;  %v9013_v37 = vmov 0  ;;  %vm1389_vm9 = vcmp.ge.f32.partialorder %v4075_v20, %v4486_v58  ;;  %v5425_v29 = vmin.f32 %v1977_v28, %v1978_v63  ;;  %vm5429_vm7 = vmand %vm1383_vm12, %vm4079_vm5  ;;  %v9017_v12 = vmov 0 }
 0x23b   : > { %v9014_v37 = vsel %vm5419_vm0, 4294967295, %v9013_v37  ;;  %v9018_v12 = vsel %vm5429_vm7, 4294967295, %v9017_v12  ;;  %vm1390_vm15 = vcmp.ge.f32.partialorder %v4077_v21, %v4486_v58  ;;  %v1979_v24 = vsel %vm5301_vm11, %v4075_v20, 2.0  ;;  %vm5443_vm8 = vmand %vm1384_vm14, %vm4083_vm6 }
 0x23c   : > { %9015 = vst [vmem:[#allocation83_spill] sm:$0xff] %v9014_v37  ;;  %v1980_v4 = vsel %vm5312_vm2, %v4077_v21, 2.0  ;;  %v9020_v41 = vmov 0  ;;  %vm1395_vm12 = vcmp.ge.f32.partialorder %v4075_v20, %v4619_v43  ;;  %vm5453_vm7 = vmand %vm1389_vm9, %vm4079_vm5  ;;  %v9024_v58 = vmov 0 }
 0x23d   : > { %9016 = vst [vmem:[#allocation84_spill] sm:$0xff] %v5425_v29  ;;  %v9021_v41 = vsel %vm5443_vm8, 4294967295, %v9020_v41  ;;  %v5449_v36 = vmin.f32 %v1979_v24, %v1980_v4  ;;  %v9025_v58 = vsel %vm5453_vm7, 4294967295, %v9024_v58  ;;  %v1981_v62 = vsel %vm5328_vm1, %v4075_v20, 2.0  ;;  %vm5467_vm11 = vmand %vm1390_vm15, %vm4083_vm6  ;;  %1708 = vmax.xlane.f32.xlu1 %v4111_v38 }
 0x23e   : > { %9019 = vst [vmem:[#allocation85_spill] sm:$0xff] %v9018_v12  ;;  %vm9027_vm14 = vnez %v8994_v60  ;;  %v9028_v9 = vmov 0  ;;  %v1985_v63 = vsel %vm5360_vm10, %v4075_v20, 2.0  ;;  %v1986_v24 = vsel %vm5371_vm13, %v4077_v21, 2.0  ;;  %vm5483_vm2 = vmand %vm1395_vm12, %vm4079_vm5  ;;  %1705 = vmax.xlane.f32.xlu0 %v4280_v30 }
 0x23f   : > { %9022 = vst [vmem:[#allocation86_spill] sm:$0xff] %v9021_v41  ;;  %v1982_v22 = vsel %vm9027_vm14, %v4077_v21, 2.0  ;;  %v9029_v9 = vsel %vm5467_vm11, 4294967295, %v9028_v9  ;;  %v9031_v4 = vmov 0  ;;  %1702 = vmax.xlane.f32.xlu2 %v4230_v31  ;;  %vm1385_vm12 = vcmp.ge.f32.partialorder %v4075_v20, %v4879_v13 }
 0x240   : > { %9023 = vst [vmem:[#allocation87_spill] sm:$0xff] %v5449_v36  ;;  %v5473_v28 = vmin.f32 %v1981_v62, %v1982_v22  ;;  %v9032_v4 = vsel %vm5483_vm2, 4294967295, %v9031_v4  ;;  %v1987_v62 = vsel %vm5387_vm4, %v4075_v20, 2.0  ;;  %v1988_v22 = vsel %vm5402_vm3, %v4077_v21, 2.0 }
 0x241   : > { %9026 = vst [vmem:[#allocation88_spill] sm:$0xff] %v9025_v58  ;;  %vm9033_vm15 = vcmp.ge.f32.partialorder %v4077_v21, %v4619_v43  ;;  %v9034_v31 = vmov 0  ;;  %vm9036_vm13 = vnez %v8997_v3  ;;  %vm9037_vm3 = vnez %v9011_v46 }
 0x242   : > { %9030 = vst [vmem:[#allocation89_spill] sm:$0xff] %v5473_v28  ;;  %vm5504_vm9 = vmand %vm9033_vm15, %vm4083_vm6  ;;  %v1983_v38 = vsel %vm9036_vm13, %v4075_v20, 2.0  ;;  %v1989_v28 = vsel %vm9037_vm3, %v4075_v20, 2.0  ;;  %v1990_v36 = vsel %vm5419_vm0, %v4077_v21, 2.0  ;;  %vm9038_vm15 = vnez %v9018_v12 }
 0x243   : > { %v9035_v31 = vsel %vm5504_vm9, 4294967295, %v9034_v31  ;;  %v1991_v43 = vsel %vm9038_vm15, %v4075_v20, 2.0  ;;  %vm1386_vm4 = vcmp.ge.f32.partialorder %v4077_v21, %v4879_v13  ;;  %vm9039_vm13 = vcmp.ge.f32.partialorder %v4075_v20, %v4735_v40 }
 0x244   : > { %vm5528_vm10 = vmand %vm9039_vm13, %vm4079_vm5  ;;  %v9040_v30 = vmov 0  ;;  %v1992_v29 = vsel %vm5443_vm8, %v4077_v21, 2.0  ;;  %vm1387_vm0 = vcmp.ge.f32.partialorder %v4075_v20, %v4857_v5  ;;  %vm9042_vm15 = vnez %v9004_v8 }
 0x245   : > { %v9041_v30 = vsel %vm5528_vm10, 4294967295, %v9040_v30  ;;  %v1984_v13 = vsel %vm9042_vm15, %v4077_v21, 2.0  ;;  %vm5544_vm13 = vmand %vm1385_vm12, %vm4079_vm5  ;;  %v1997_v44 = vsel %vm5453_vm7, %v4075_v20, 2.0  ;;  %v1998_v52 = vsel %vm5467_vm11, %v4077_v21, 2.0  ;;  %1717 = vmax.xlane.f32.xlu1 %v4378_v34  ;;  %v9198_v8 = vld [vmem:[#allocation85_spill] sm:$0xff] }
 0x246   : > { %v5554_v37 = vmin.f32 %v1983_v38, %v1984_v13  ;;  %v5556_v46 = vmin.f32 %v1985_v63, %v1986_v24  ;;  %vm5560_vm3 = vmand %vm1386_vm4, %vm4083_vm6  ;;  %v2003_v12 = vsel %vm5483_vm2, %v4075_v20, 2.0  ;;  %v2004_v58 = vsel %vm5504_vm9, %v4077_v21, 2.0  ;;  %1714 = vmax.xlane.f32.xlu0 %v4367_v14 }
 0x247   : > { %v2009_v38 = vsel %vm5528_vm10, %v4075_v20, 2.0  ;;  %v5573_v63 = vmin.f32 %v1987_v62, %v1988_v22  ;;  %vm9049_vm4 = vcmp.ge.f32.partialorder %v4077_v21, %v4735_v40  ;;  %v9050_v24 = vmov 0  ;;  %vm5593_vm10 = vmand %vm1387_vm0, %vm4079_vm5  ;;  %1711 = vmax.xlane.f32.xlu2 %v4137_v53 }
 0x248   : > { %9045 = vst [vmem:[#allocation90_spill] sm:$0xff] %v5556_v46  ;;  %vm5580_vm12 = vmand %vm9049_vm4, %vm4083_vm6  ;;  %v5584_v13 = vmin.f32 %v1989_v28, %v1990_v36  ;;  %v5586_v46 = vmin.f32 %v1991_v43, %v1992_v29  ;;  %v9054_v62 = vmov 0  ;;  %v5600_v22 = vmin.f32 %v1997_v44, %v1998_v52  ;;  %v5681_v43 = vpop.xlane.xlu2 %1536 }
 0x249   : > { %9048 = vst [vmem:[#allocation91_spill] sm:$0xff] %v5573_v63  ;;  %v9051_v24 = vsel %vm5580_vm12, 4294967295, %v9050_v24  ;;  %v9055_v62 = vsel %vm5593_vm10, 4294967295, %v9054_v62  ;;  %v2010_v40 = vsel %vm5580_vm12, %v4077_v21, 2.0  ;;  %vm9057_vm4 = vcmp.ge.f32.partialorder %v4077_v21, %v4857_v5 }
 0x24a   : > { %9052 = vst [vmem:[#allocation92_spill] sm:$0xff] %v5584_v13  ;;  %vm5607_vm9 = vmand %vm9057_vm4, %vm4083_vm6  ;;  %v9058_v29 = vmov 0  ;;  %v5611_v36 = vmin.f32 %v2003_v12, %v2004_v58  ;;  %v5613_v28 = vmin.f32 %v2009_v38, %v2010_v40  ;;  %v1993_v52 = vsel %vm5544_vm13, %v4075_v20, 2.0 }
 0x24b   : > { %9053 = vst [vmem:[#allocation93_spill] sm:$0xff] %v5586_v46  ;;  %v9059_v29 = vsel %vm5607_vm9, 4294967295, %v9058_v29  ;;  %v1994_v5 = vsel %vm5560_vm3, %v4077_v21, 2.0  ;;  %v1995_v44 = vsel %vm5593_vm10, %v4075_v20, 2.0  ;;  %v1996_v53 = vsel %vm5607_vm9, %v4077_v21, 2.0 }
 0x24c   : > { %9056 = vst [vmem:[#allocation94_spill] sm:$0xff] %v5600_v22  ;;  %vm1391_vm0 = vcmp.ge.f32.partialorder %v4075_v20, %v4985_v61  ;;  %vm1392_vm4 = vcmp.ge.f32.partialorder %v4077_v21, %v4985_v61  ;;  %vm1393_vm12 = vcmp.ge.f32.partialorder %v4075_v20, %v4974_v49  ;;  %v5636_v14 = vmin.f32 %v1993_v52, %v1994_v5  ;;  %v9104_v22 = vld [vmem:[#allocation40_spill] sm:$0xff] }
 0x24d   : > { %9060 = vst [vmem:[#allocation95_spill] sm:$0xff] %v5611_v36  ;;  %vm5640_vm2 = vmand %vm1391_vm0, %vm4079_vm5  ;;  %v9063_v34 = vmov 0  ;;  %vm1394_vm9 = vcmp.ge.f32.partialorder %v4077_v21, %v4974_v49  ;;  %v5646_v12 = vmin.f32 %v1995_v44, %v1996_v53  ;;  %v9066_v61 = vmov 0  ;;  %1726 = vmax.xlane.f32.xlu1 %v4477_v56  ;;  %v9083_v53 = vld [vmem:[#allocation47_spill] sm:$0xff] }
 0x24e   : > { %9061 = vst [vmem:[#allocation96_spill] sm:$0xff] %v5613_v28  ;;  %v9064_v34 = vsel %vm5640_vm2, 4294967295, %v9063_v34  ;;  %vm5650_vm10 = vmand %vm1392_vm4, %vm4083_vm6  ;;  %v9068_v58 = vmov 0  ;;  %vm1397_vm4 = vcmp.ge.f32.partialorder %v4075_v20, %v5086_v45  ;;  %1723 = vmax.xlane.f32.xlu0 %v4466_v2  ;;  %v9073_v38 = vmov 0 }
 0x24f   : > { %9062 = vst [vmem:[#allocation97_spill] sm:$0xff] %v5636_v14  ;;  %v9067_v61 = vsel %vm5650_vm10, 4294967295, %v9066_v61  ;;  %vm5656_vm11 = vmand %vm1393_vm12, %vm4079_vm5  ;;  %1720 = vmax.xlane.f32.xlu2 %v4163_v1  ;;  %vm1398_vm12 = vcmp.ge.f32.partialorder %v4077_v21, %v5086_v45  ;;  %v1999_v1 = vsel %vm5640_vm2, %v4075_v20, 2.0  ;;  %v2000_v56 = vsel %vm5650_vm10, %v4077_v21, 2.0  ;;  %v9105_v14 = vld [vmem:[#allocation59_spill] sm:$0xff] }
 0x250   : > { %9065 = vst [vmem:[#allocation98_spill] sm:$0xff] %v5646_v12  ;;  %v9069_v58 = vsel %vm5656_vm11, 4294967295, %v9068_v58  ;;  %vm5664_vm0 = vmand %vm1394_vm9, %vm4083_vm6  ;;  %vm1399_vm9 = vcmp.ge.f32.partialorder %v4075_v20, %v5072_v54  ;;  %v2001_v2 = vsel %vm5656_vm11, %v4075_v20, 2.0  ;;  %vm1400_vm10 = vcmp.ge.f32.partialorder %v4077_v21, %v5072_v54  ;;  %v9106_v12 = vld [vmem:[#allocation58_spill] sm:$0xff] }
 0x251   : > { %9072 = vst [vmem:[#allocation99_spill] sm:$0xff] %v5681_v43  ;;  %v2002_v45 = vsel %vm5664_vm0, %v4077_v21, 2.0  ;;  %vm5691_vm2 = vmand %vm1397_vm4, %vm4079_vm5  ;;  %v9075_v40 = vmov 0  ;;  %v9077_v52 = vmov 0  ;;  %v5709_v5 = vmin.f32 %v1999_v1, %v2000_v56  ;;  %v9084_v1 = vld [vmem:[#allocation46_spill] sm:$0xff]  ;;  %v5752_v28 = vpop.xlane.xlu0 %1539 }
 0x252   : > { %v9074_v38 = vsel %vm5691_vm2, 4294967295, %v9073_v38  ;;  %vm5699_vm7 = vmand %vm1398_vm12, %vm4083_vm6  ;;  %v9080_v44 = vmov 0  ;;  %v5717_v54 = vmin.f32 %v2001_v2, %v2002_v45  ;;  %v2005_v43 = vsel %vm5691_vm2, %v4075_v20, 2.0  ;;  %v5740_v45 = vpop.xlane.xlu1 %1542  ;;  %9089 = vst [vmem:[#allocation102_spill] sm:$0xff] %v5752_v28  ;;  %v9098_v28 = vld [vmem:[#allocation38_spill] sm:$0xff] }
 0x253   : > { %v9076_v40 = vsel %vm5699_vm7, 4294967295, %v9075_v40  ;;  %vm5705_vm11 = vmand %vm1399_vm9, %vm4079_vm5  ;;  %9079 = vst [vmem:[#allocation100_spill] sm:$0xff] %v5709_v5  ;;  %vm1403_vm12 = vcmp.ge.f32.partialorder %v4075_v20, %v5188_v7  ;;  %v2006_v56 = vsel %vm5699_vm7, %v4077_v21, 2.0  ;;  %vm1405_vm9 = vcmp.ge.f32.partialorder %v4075_v20, %v5175_v10  ;;  %v9099_v5 = vld [vmem:[#allocation52_spill] sm:$0xff] }
 0x254   : > { %v9078_v52 = vsel %vm5705_vm11, 4294967295, %v9077_v52  ;;  %vm5713_vm4 = vmand %vm1400_vm10, %vm4083_vm6  ;;  %9082 = vst [vmem:[#allocation101_spill] sm:$0xff] %v5717_v54  ;;  %v2007_v2 = vsel %vm5705_vm11, %v4075_v20, 2.0  ;;  %vm1404_vm10 = vcmp.ge.f32.partialorder %v4077_v21, %v5188_v7  ;;  %vm1406_vm11 = vcmp.ge.f32.partialorder %v4077_v21, %v5175_v10 }
 0x255   : > { %v9081_v44 = vsel %vm5713_vm4, 4294967295, %v9080_v44  ;;  %1735 = vmax.xlane.f32.xlu1 %v9083_v53  ;;  %9085 = vst [vmem:[#allocation47_spill] sm:$0xff] %v5740_v45  ;;  %v5742_v53 = vpop.xlane.xlu2 %1545  ;;  %vm5746_vm7 = vmand %vm1403_vm12, %vm4079_vm5  ;;  %v5760_v45 = vmin.f32 %v2005_v43, %v2006_v56  ;;  %v9094_v36 = vmov 0  ;;  %v9096_v10 = vmov 0  ;;  %v9100_v43 = vld [vmem:[#allocation51_spill] sm:$0xff] }
 0x256   : > { %1732 = vmax.xlane.f32.xlu0 %v9084_v1  ;;  %9086 = vst [vmem:[#allocation46_spill] sm:$0xff] %v5742_v53  ;;  %vm5766_vm12 = vmand %vm1405_vm9, %vm4079_vm5  ;;  %v2011_v56 = vsel %vm5746_vm7, %v4075_v20, 2.0  ;;  %v1824_v32 = vsel %vm9042_vm15, %v4189_v18, 512.0  ;;  %vm9199_vm15 = vnez %v9198_v8 }
 0x257   : > { %1729 = vmax.xlane.f32.xlu2 %v4258_v11  ;;  %v2008_v11 = vsel %vm5713_vm4, %v4077_v21, 2.0  ;;  %vm5756_vm4 = vmand %vm1404_vm10, %vm4083_vm6  ;;  %9092 = vst [vmem:[#allocation103_spill] sm:$0xff] %v5760_v45  ;;  %v9095_v36 = vsel %vm5766_vm12, 4294967295, %v9094_v36 }
 0x258   : > { %v5762_v53 = vmin.f32 %v2007_v2, %v2008_v11  ;;  %vm5772_vm2 = vmand %vm1406_vm11, %vm4083_vm6  ;;  %v2012_v2 = vsel %vm5756_vm4, %v4077_v21, 2.0  ;;  %v2013_v11 = vsel %vm5766_vm12, %v4075_v20, 2.0 }
 0x259   : > { %v9097_v10 = vsel %vm5772_vm2, 4294967295, %v9096_v10 }
 0x25a   : > { %9093 = vst [vmem:[#allocation104_spill] sm:$0xff] %v5762_v53  ;;  %v5797_v53 = vmin.f32 %v2011_v56, %v2012_v2  ;;  %v9112_v56 = vld [vmem:[#allocation65_spill] sm:$0xff] }
 0x25d   : > { %1744 = vmax.xlane.f32.xlu1 %v9099_v5  ;;  %v5791_v45 = vpop.xlane.xlu2 %1548  ;;  %v5793_v5 = vpop.xlane.xlu1 %1554 }
 0x25e   : > { %1741 = vmax.xlane.f32.xlu0 %v9100_v43  ;;  %9101 = vst [vmem:[#allocation38_spill] sm:$0xff] %v5791_v45  ;;  %v5795_v43 = vpop.xlane.xlu0 %1551  ;;  %v9110_v45 = vld [vmem:[#allocation42_spill] sm:$0xff] }
 0x25f   : > { %1738 = vmax.xlane.f32.xlu2 %v9098_v28  ;;  %v2014_v28 = vsel %vm5772_vm2, %v4077_v21, 2.0  ;;  %9102 = vst [vmem:[#allocation52_spill] sm:$0xff] %v5793_v5  ;;  %v9111_v5 = vld [vmem:[#allocation67_spill] sm:$0xff] }
 0x260   : > { %9103 = vst [vmem:[#allocation51_spill] sm:$0xff] %v5795_v43  ;;  %v5799_v54 = vmin.f32 %v2013_v11, %v2014_v28 }
 0x265   : > { %1753 = vmax.xlane.f32.xlu1 %v9105_v14  ;;  %v5804_v46 = vpop.xlane.xlu2 %1557  ;;  %v5806_v63 = vpop.xlane.xlu1 %1563  ;;  %v9116_v14 = vld [vmem:[#allocation50_spill] sm:$0xff] }
 0x266   : > { %1750 = vmax.xlane.f32.xlu0 %v9106_v12  ;;  %9107 = vst [vmem:[#allocation40_spill] sm:$0xff] %v5804_v46  ;;  %v5808_v13 = vpop.xlane.xlu0 %1560 }
 0x267   : > { %1747 = vmax.xlane.f32.xlu2 %v9104_v22  ;;  %9108 = vst [vmem:[#allocation59_spill] sm:$0xff] %v5806_v63 }
 0x268   : > { %9109 = vst [vmem:[#allocation58_spill] sm:$0xff] %v5808_v13 }
 0x26d   : > { %1762 = vmax.xlane.f32.xlu1 %v9111_v5  ;;  %v5813_v2 = vpop.xlane.xlu2 %1566  ;;  %v5815_v11 = vpop.xlane.xlu1 %1572  ;;  %v9120_v5 = vld [vmem:[#allocation56_spill] sm:$0xff] }
 0x26e   : > { %1759 = vmax.xlane.f32.xlu0 %v9112_v56  ;;  %9113 = vst [vmem:[#allocation42_spill] sm:$0xff] %v5813_v2  ;;  %v5817_v22 = vpop.xlane.xlu0 %1569  ;;  %v9121_v56 = vld [vmem:[#allocation76_spill] sm:$0xff] }
 0x26f   : > { %1756 = vmax.xlane.f32.xlu2 %v9110_v45  ;;  %9114 = vst [vmem:[#allocation67_spill] sm:$0xff] %v5815_v11 }
 0x270   : > { %9115 = vst [vmem:[#allocation65_spill] sm:$0xff] %v5817_v22 }
 0x275   : > { %1771 = vmax.xlane.f32.xlu1 %v5056_v35  ;;  %v5822_v12 = vpop.xlane.xlu2 %1575  ;;  %v5824_v28 = vpop.xlane.xlu1 %1581  ;;  %v9125_v35 = vld [vmem:[#allocation61_spill] sm:$0xff] }
 0x276   : > { %1768 = vmax.xlane.f32.xlu0 %v5051_v42  ;;  %9117 = vst [vmem:[#allocation50_spill] sm:$0xff] %v5822_v12  ;;  %v5826_v45 = vpop.xlane.xlu0 %1578 }
 0x277   : > { %1765 = vmax.xlane.f32.xlu2 %v9116_v14  ;;  %9118 = vst [vmem:[#allocation105_spill] sm:$0xff] %v5824_v28 }
 0x278   : > { %9119 = vst [vmem:[#allocation106_spill] sm:$0xff] %v5826_v45 }
 0x27d   : > { %1780 = vmax.xlane.f32.xlu1 %v5164_v51  ;;  %v5831_v11 = vpop.xlane.xlu2 %1584  ;;  %v5833_v22 = vpop.xlane.xlu1 %1590  ;;  %v9128_v51 = vld [vmem:[#allocation43_spill] sm:$0xff] }
 0x27e   : > { %1777 = vmax.xlane.f32.xlu0 %v9121_v56  ;;  %9122 = vst [vmem:[#allocation56_spill] sm:$0xff] %v5831_v11  ;;  %v5835_v14 = vpop.xlane.xlu0 %1587  ;;  %vm9129_vm11 = vnez %v9128_v51  ;;  %v9130_v56 = vld [vmem:[#allocation44_spill] sm:$0xff]  ;;  %v9139_v51 = vld [vmem:[#allocation55_spill] sm:$0xff] }
 0x27f   : > { %1774 = vmax.xlane.f32.xlu2 %v9120_v5  ;;  %9123 = vst [vmem:[#allocation76_spill] sm:$0xff] %v5833_v22  ;;  %v1791_v5 = vsel %vm9129_vm11, %v4174_v16, 512.0  ;;  %vm9131_vm10 = vnez %v9130_v56  ;;  %vm9140_vm11 = vnez %v9139_v51  ;;  %v9141_v56 = vld [vmem:[#allocation36_spill] sm:$0xff] }
 0x280   : > { %9124 = vst [vmem:[#allocation107_spill] sm:$0xff] %v5835_v14  ;;  %v1792_v22 = vsel %vm9131_vm10, %v4189_v18, 512.0  ;;  %v9132_v14 = vld [vmem:[#allocation48_spill] sm:$0xff]  ;;  %v1794_v45 = vsel %vm9140_vm11, %v4189_v18, 512.0  ;;  %vm1353_vm10 = vcmp.ge.f32.partialorder %v4075_v20, %v9141_v56 }
 0x281   : > { %vm9133_vm9 = vnez %v9132_v14  ;;  %v1855_v14 = vmin.f32 %v1791_v5, %v1792_v22  ;;  %v9150_v5 = vld [vmem:[#allocation62_spill] sm:$0xff] }
 0x285   : > { %1789 = vmax.xlane.f32.xlu1 %v5273_v17  ;;  %v5840_v42 = vpop.xlane.xlu2 %1593  ;;  %v9134_v17 = vld [vmem:[#allocation49_spill] sm:$0xff] }
 0x286   : > { %1786 = vmax.xlane.f32.xlu0 %v5259_v0  ;;  %9126 = vst [vmem:[#allocation61_spill] sm:$0xff] %v5840_v42  ;;  %v5842_v28 = vpop.xlane.xlu1 %1599  ;;  %vm9135_vm2 = vnez %v9134_v17 }
 0x287   : > { %1783 = vmax.xlane.f32.xlu2 %v9125_v35  ;;  %9127 = vst [vmem:[#allocation108_spill] sm:$0xff] %v5842_v28  ;;  %v1795_v35 = vsel %vm9133_vm9, %v4174_v16, 512.0  ;;  %v1796_v0 = vsel %vm9135_vm2, %v4189_v18, 512.0  ;;  %v5856_v11 = vpop.xlane.xlu0 %1596  ;;  %v9137_v28 = vld [vmem:[#allocation53_spill] sm:$0xff]  ;;  %vm1354_vm9 = vcmp.ge.f32.partialorder %v4077_v21, %v9141_v56  ;;  %vm5870_vm2 = vmand %vm1353_vm10, %vm4079_vm5  ;;  %vm9151_vm10 = vnez %v9150_v5 }
 0x288   : > { %9136 = vst [vmem:[#allocation43_spill] sm:$0xff] %v5856_v11  ;;  %vm9138_vm12 = vnez %v9137_v28  ;;  %v1861_v12 = vmin.f32 %v1795_v35, %v1796_v0  ;;  %v9142_v11 = vmov 0  ;;  %v9144_v28 = vmov 0  ;;  %v9157_v5 = vld [vmem:[#allocation37_spill] sm:$0xff] }
 0x289   : > { %v1793_v42 = vsel %vm9138_vm12, %v4174_v16, 512.0  ;;  %v9143_v11 = vsel %vm5870_vm2, 4294967295, %v9142_v11  ;;  %vm5876_vm12 = vmand %vm1354_vm9, %vm4083_vm6  ;;  %v1798_v35 = vsel %vm9151_vm10, %v4189_v18, 512.0  ;;  %vm1359_vm10 = vcmp.ge.f32.partialorder %v4075_v20, %v9157_v5 }
 0x28a   : > { %v1858_v17 = vmin.f32 %v1793_v42, %v1794_v45  ;;  %v9145_v28 = vsel %vm5876_vm12, 4294967295, %v9144_v28  ;;  %v9148_v45 = vld [vmem:[#allocation60_spill] sm:$0xff]  ;;  %v1802_v0 = vsel %vm5876_vm12, %v4189_v18, 512.0  ;;  %vm5910_vm12 = vmand %vm1359_vm10, %vm4079_vm5 }
 0x28b   : > { %vm9149_vm11 = vnez %v9148_v45  ;;  %v9155_v45 = vld [vmem:[#allocation41_spill] sm:$0xff]  ;;  %v1807_v27 = vsel %vm5910_vm12, %v4174_v16, 512.0 }
 0x28c   : > { %v1797_v42 = vsel %vm9149_vm11, %v4174_v16, 512.0  ;;  %vm9156_vm11 = vnez %v9155_v45 }
 0x28d   : > { %1862 = vmin.xlane.f32.xlu1 %v1861_v12  ;;  %v5880_v51 = vpop.xlane.xlu2 %1602  ;;  %v1801_v12 = vsel %vm5870_vm2, %v4174_v16, 512.0  ;;  %vm1360_vm2 = vcmp.ge.f32.partialorder %v4077_v21, %v9157_v5 }
 0x28e   : > { %1859 = vmin.xlane.f32.xlu0 %v1858_v17  ;;  %9146 = vst [vmem:[#allocation44_spill] sm:$0xff] %v5880_v51  ;;  %v5882_v22 = vpop.xlane.xlu1 %1608  ;;  %v1864_v51 = vmin.f32 %v1797_v42, %v1798_v35  ;;  %v1870_v2 = vmin.f32 %v1801_v12, %v1802_v0  ;;  %v9166_v35 = vld [vmem:[#allocation68_spill] sm:$0xff]  ;;  %v9169_v12 = vld [vmem:[#allocation69_spill] sm:$0xff] }
 0x28f   : > { %1856 = vmin.xlane.f32.xlu2 %v1855_v14  ;;  %9147 = vst [vmem:[#allocation48_spill] sm:$0xff] %v5882_v22  ;;  %v5896_v56 = vpop.xlane.xlu0 %1605  ;;  %v9153_v14 = vld [vmem:[#allocation39_spill] sm:$0xff]  ;;  %v1800_v22 = vsel %vm9156_vm11, %v4189_v18, 512.0  ;;  %vm9167_vm5 = vnez %v9166_v35 }
 0x290   : > { %9152 = vst [vmem:[#allocation49_spill] sm:$0xff] %v5896_v56  ;;  %vm9154_vm9 = vnez %v9153_v14 }
 0x291   : > { %v1799_v17 = vsel %vm9154_vm9, %v4174_v16, 512.0  ;;  %vm5916_vm9 = vmand %vm1360_vm2, %vm4083_vm6  ;;  %vm9170_vm6 = vnez %v9169_v12  ;;  %v9177_v12 = vld [vmem:[#allocation73_spill] sm:$0xff] }
 0x292   : > { %v1867_v13 = vmin.f32 %v1799_v17, %v1800_v22  ;;  %v9164_v22 = vld [vmem:[#allocation66_spill] sm:$0xff]  ;;  %v1805_v0 = vsel %vm9170_vm6, %v4174_v16, 512.0  ;;  %vm9180_vm6 = vnez %v8968_v39 }
 0x293   : > { %vm9165_vm11 = vnez %v9164_v22  ;;  %v9171_v17 = vld [vmem:[#allocation70_spill] sm:$0xff] }
 0x294   : > { %v1803_v26 = vsel %vm9165_vm11, %v4174_v16, 512.0  ;;  %vm9172_vm2 = vnez %v9171_v17  ;;  %vm9178_vm11 = vnez %v9177_v12 }
 0x295   : > { %1871 = vmin.xlane.f32.xlu1 %v1870_v2  ;;  %v1806_v5 = vsel %vm9172_vm2, %v4189_v18, 512.0  ;;  %v1810_v43 = vsel %vm9178_vm11, %v4189_v18, 512.0  ;;  %vm9187_vm11 = vnez %v8972_v55 }
 0x296   : > { %1868 = vmin.xlane.f32.xlu0 %v1867_v13  ;;  %v5920_v45 = vpop.xlane.xlu2 %1611  ;;  %v5922_v42 = vpop.xlane.xlu1 %1617  ;;  %v1808_v13 = vsel %vm5916_vm9, %v4189_v18, 512.0 }
 0x297   : > { %1865 = vmin.xlane.f32.xlu2 %v1864_v51  ;;  %9162 = vst [vmem:[#allocation53_spill] sm:$0xff] %v5920_v45  ;;  %v1804_v51 = vsel %vm9167_vm5, %v4189_v18, 512.0  ;;  %v5936_v2 = vpop.xlane.xlu0 %1614  ;;  %v1879_v35 = vmin.f32 %v1807_v27, %v1808_v13  ;;  %vm9179_vm5 = vnez %v8965_v57  ;;  %v9182_v27 = vld [vmem:[#allocation74_spill] sm:$0xff] }
 0x298   : > { %9163 = vst [vmem:[#allocation55_spill] sm:$0xff] %v5922_v42  ;;  %v1873_v22 = vmin.f32 %v1803_v26, %v1804_v51  ;;  %v1876_v42 = vmin.f32 %v1805_v0, %v1806_v5  ;;  %v1813_v26 = vsel %vm9179_vm5, %v4174_v16, 512.0  ;;  %vm9183_vm2 = vnez %v9182_v27 }
 0x299   : > { %9168 = vst [vmem:[#allocation36_spill] sm:$0xff] %v5936_v2  ;;  %v9175_v2 = vld [vmem:[#allocation71_spill] sm:$0xff]  ;;  %v1811_v13 = vsel %vm9183_vm2, %v4174_v16, 512.0  ;;  %vm9188_vm5 = vnez %v8980_v19  ;;  %vm9190_vm2 = vnez %v8990_v48 }
 0x29a   : > { %vm9176_vm10 = vnez %v9175_v2  ;;  %v9184_v2 = vld [vmem:[#allocation77_spill] sm:$0xff]  ;;  %v1816_v12 = vsel %vm9188_vm5, %v4189_v18, 512.0  ;;  %vm9193_vm5 = vnez %v8999_v25 }
 0x29b   : > { %v1809_v46 = vsel %vm9176_vm10, %v4174_v16, 512.0  ;;  %vm9185_vm10 = vnez %v9184_v2  ;;  %v1821_v2 = vsel %vm5328_vm1, %v4174_v16, 512.0  ;;  %vm9196_vm1 = vnez %v9006_v59  ;;  %v9203_v59 = vld [vmem:[#allocation83_spill] sm:$0xff] }
 0x29c   : > { %v1812_v0 = vsel %vm9185_vm10, %v4189_v18, 512.0  ;;  %v1882_v17 = vmin.f32 %v1809_v46, %v1810_v43  ;;  %v1820_v43 = vsel %vm9190_vm2, %v4189_v18, 512.0  ;;  %vm9191_vm10 = vnez %v8982_v6 }
 0x29d   : > { %1880 = vmin.xlane.f32.xlu1 %v1879_v35  ;;  %v1815_v35 = vsel %vm9187_vm11, %v4174_v16, 512.0  ;;  %vm9192_vm11 = vnez %v8985_v15  ;;  %v1822_v6 = vsel %vm9027_vm14, %v4189_v18, 512.0  ;;  %v1825_v15 = vsel %vm9193_vm5, %v4174_v16, 512.0 }
 0x29e   : > { %1877 = vmin.xlane.f32.xlu0 %v1876_v42  ;;  %v1814_v42 = vsel %vm9180_vm6, %v4189_v18, 512.0  ;;  %vm9189_vm6 = vnez %v8988_v47  ;;  %v1818_v55 = vsel %vm9192_vm11, %v4189_v18, 512.0  ;;  %v1891_v19 = vmin.f32 %v1815_v35, %v1816_v12 }
 0x29f   : > { %1874 = vmin.xlane.f32.xlu2 %v1873_v22  ;;  %v1888_v5 = vmin.f32 %v1813_v26, %v1814_v42  ;;  %v1885_v22 = vmin.f32 %v1811_v13, %v1812_v0  ;;  %v1819_v46 = vsel %vm9189_vm6, %v4174_v16, 512.0  ;;  %v1817_v42 = vsel %vm9191_vm10, %v4174_v16, 512.0 }
 0x2a0   : > { %v5944_v45 = vpop.xlane.xlu2 %1620  ;;  %v5946_v63 = vpop.xlane.xlu1 %1626  ;;  %v1897_v27 = vmin.f32 %v1819_v46, %v1820_v43  ;;  %v1894_v13 = vmin.f32 %v1817_v42, %v1818_v55  ;;  %vm9194_vm6 = vnez %v9001_v23  ;;  %vm9195_vm2 = vnez %v8997_v3 }
 0x2a1   : > { %9173 = vst [vmem:[#allocation60_spill] sm:$0xff] %v5944_v45  ;;  %v5960_v51 = vpop.xlane.xlu0 %1623  ;;  %v1826_v0 = vsel %vm9194_vm6, %v4189_v18, 512.0  ;;  %v1900_v60 = vmin.f32 %v1821_v2, %v1822_v6  ;;  %v1827_v12 = vsel %vm9196_vm1, %v4174_v16, 512.0  ;;  %vm9197_vm14 = vnez %v9009_v33 }
 0x2a2   : > { %9174 = vst [vmem:[#allocation62_spill] sm:$0xff] %v5946_v63  ;;  %v1828_v3 = vsel %vm9197_vm14, %v4189_v18, 512.0  ;;  %v1831_v46 = vsel %vm9199_vm15, %v4174_v16, 512.0  ;;  %v1832_v42 = vsel %vm5443_vm8, %v4189_v18, 512.0  ;;  %vm9204_vm11 = vnez %v9203_v59 }
 0x2a3   : > { %9181 = vst [vmem:[#allocation39_spill] sm:$0xff] %v5960_v51  ;;  %v1909_v33 = vmin.f32 %v1827_v12, %v1828_v3  ;;  %v1915_v2 = vmin.f32 %v1831_v46, %v1832_v42  ;;  %vm9207_vm5 = vnez %v9029_v9  ;;  %vm9208_vm6 = vnez %v9055_v62 }
 0x2a4   : > { %v1835_v3 = vsel %vm9208_vm6, %v4174_v16, 512.0  ;;  %vm9212_vm1 = vnez %v9032_v4  ;;  %vm9213_vm14 = vnez %v9035_v31  ;;  %vm9214_vm15 = vnez %v9069_v58 }
 0x2a5   : > { %1889 = vmin.xlane.f32.xlu1 %v1888_v5  ;;  %v1823_v5 = vsel %vm9195_vm2, %v4174_v16, 512.0  ;;  %vm9211_vm2 = vnez %v9067_v61  ;;  %v1841_v59 = vsel %vm9214_vm15, %v4174_v16, 512.0  ;;  %vm9222_vm6 = vnez %v9081_v44 }
 0x2a6   : > { %1886 = vmin.xlane.f32.xlu0 %v1885_v22  ;;  %v1906_v22 = vmin.f32 %v1825_v15, %v1826_v0  ;;  %v1903_v35 = vmin.f32 %v1823_v5, %v1824_v32  ;;  %v1833_v5 = vsel %vm5544_vm13, %v4174_v16, 512.0  ;;  %v1834_v32 = vsel %vm5560_vm3, %v4189_v18, 512.0 }
 0x2a7   : > { %1883 = vmin.xlane.f32.xlu2 %v1882_v17  ;;  %vm9209_vm13 = vnez %v9059_v29  ;;  %v1918_v41 = vmin.f32 %v1833_v5, %v1834_v32  ;;  %vm9210_vm3 = vnez %v9064_v34  ;;  %v1840_v62 = vsel %vm9211_vm2, %v4189_v18, 512.0 }
 0x2a8   : > { %v5970_v39 = vpop.xlane.xlu1 %1699  ;;  %v1836_v50 = vsel %vm9209_vm13, %v4189_v18, 512.0  ;;  %v1839_v42 = vsel %vm9210_vm3, %v4174_v16, 512.0  ;;  %v1843_v29 = vsel %vm9212_vm1, %v4174_v16, 512.0  ;;  %v1842_v34 = vsel %vm5664_vm0, %v4189_v18, 512.0 }
 0x2a9   : > { %v5984_v26 = vpop.xlane.xlu0 %1696  ;;  %v1921_v46 = vmin.f32 %v1835_v3, %v1836_v50  ;;  %v1927_v61 = vmin.f32 %v1839_v42, %v1840_v62  ;;  %vm9218_vm0 = vnez %v9041_v30  ;;  %vm9226_vm13 = vnez %v9095_v36  ;;  %v9232_v62 = vld [vmem:[#allocation63_spill] sm:$0xff]  ;;  %v9233_v36 = vld [vmem:[#allocation64_spill] sm:$0xff] }
 0x2aa   : > { %v5968_v57 = vpop.xlane.xlu2 %1629  ;;  %v1849_v49 = vsel %vm9218_vm0, %v4174_v16, 512.0  ;;  %v1853_v3 = vsel %vm9226_vm13, %v4174_v16, 512.0  ;;  %vm9227_vm3 = vnez %v9097_v10 }
 0x2ab   : > { %9186 = vst [vmem:[#allocation41_spill] sm:$0xff] %v5968_v57  ;;  %v1854_v50 = vsel %vm9227_vm3, %v4189_v18, 512.0 }
 0x2ad   : > { %1898 = vmin.xlane.f32.xlu1 %v1897_v27 }
 0x2ae   : > { %1895 = vmin.xlane.f32.xlu0 %v1894_v13  ;;  %v1830_v13 = vsel %vm9204_vm11, %v4189_v18, 512.0  ;;  %vm9217_vm11 = vnez %v9076_v40 }
 0x2af   : > { %1892 = vmin.xlane.f32.xlu2 %v1891_v19  ;;  %v9201_v19 = vld [vmem:[#allocation82_spill] sm:$0xff]  ;;  %v1846_v58 = vsel %vm9217_vm11, %v4189_v18, 512.0 }
 0x2b0   : > { %v5994_v48 = vpop.xlane.xlu1 %1708  ;;  %vm9202_vm10 = vnez %v9201_v19  ;;  %v1844_v19 = vsel %vm9213_vm14, %v4189_v18, 512.0 }
 0x2b1   : > { %v6008_v17 = vpop.xlane.xlu0 %1705  ;;  %v1829_v27 = vsel %vm9202_vm10, %v4174_v16, 512.0  ;;  %vm9216_vm10 = vnez %v9074_v38  ;;  %v1848_v38 = vsel %vm9222_vm6, %v4189_v18, 512.0 }
 0x2b2   : > { %v5992_v47 = vpop.xlane.xlu2 %1702  ;;  %v1912_v6 = vmin.f32 %v1829_v27, %v1830_v13  ;;  %v1933_v13 = vmin.f32 %v1843_v29, %v1844_v19  ;;  %v9234_v29 = vld [vmem:[#allocation57_spill] sm:$0xff] }
 0x2b5   : > { %1907 = vmin.xlane.f32.xlu1 %v1906_v22 }
 0x2b6   : > { %1904 = vmin.xlane.f32.xlu0 %v1903_v35  ;;  %v1838_v35 = vsel %vm9207_vm5, %v4189_v18, 512.0  ;;  %vm9221_vm5 = vnez %v9078_v52  ;;  %v1852_v52 = vsel %vm5756_vm4, %v4189_v18, 512.0  ;;  %vm9239_vm4 = vnez %v9145_v28 }
 0x2b7   : > { %1901 = vmin.xlane.f32.xlu2 %v1900_v60  ;;  %v9205_v60 = vld [vmem:[#allocation88_spill] sm:$0xff]  ;;  %v1847_v32 = vsel %vm9221_vm5, %v4174_v16, 512.0  ;;  %v1968_v28 = vsel %vm5916_vm9, %v4077_v21, 2.0  ;;  %vm2114_vm9 = vcmask 1040384  }
 0x2b8   : > { %v6018_v23 = vpop.xlane.xlu1 %1717  ;;  %vm9206_vm8 = vnez %v9205_v60 }
 0x2b9   : > { %v6032_v55 = vpop.xlane.xlu0 %1714  ;;  %v1837_v22 = vsel %vm9206_vm8, %v4174_v16, 512.0  ;;  %vm9219_vm8 = vnez %v9051_v24 }
 0x2ba   : > { %v6016_v25 = vpop.xlane.xlu2 %1711  ;;  %v1924_v8 = vmin.f32 %v1837_v22, %v1838_v35  ;;  %v1939_v22 = vmin.f32 %v1847_v32, %v1848_v38  ;;  %v1851_v35 = vsel %vm5746_vm7, %v4174_v16, 512.0  ;;  %vm9238_vm7 = vnez %v9143_v11  ;;  %v9245_v38 = vld [vmem:[#allocation75_spill] sm:$0xff] }
 0x2bb   : > { %v1967_v11 = vsel %vm5910_vm12, %v4075_v20, 2.0 }
 0x2bc   : > { %v2039_v32 = vmin.f32 %v1967_v11, %v1968_v28 }
 0x2bd   : > { %1916 = vmin.xlane.f32.xlu1 %v1915_v2  ;;  %v1845_v2 = vsel %vm9216_vm10, %v4174_v16, 512.0 }
 0x2be   : > { %1913 = vmin.xlane.f32.xlu0 %v1912_v6  ;;  %v1850_v6 = vsel %vm9219_vm8, %v4189_v18, 512.0  ;;  %v1936_v40 = vmin.f32 %v1845_v2, %v1846_v58  ;;  %v9241_v2 = vld [vmem:[#allocation72_spill] sm:$0xff] }
 0x2bf   : > { %1910 = vmin.xlane.f32.xlu2 %v1909_v33  ;;  %v1930_v33 = vmin.f32 %v1841_v59, %v1842_v34  ;;  %v1942_v60 = vmin.f32 %v1849_v49, %v1850_v6  ;;  %v1961_v34 = vsel %vm9238_vm7, %v4075_v20, 2.0 }
 0x2c0   : > { %v6042_v0 = vpop.xlane.xlu1 %1726 }
 0x2c1   : > { %v6056_v12 = vpop.xlane.xlu0 %1723 }
 0x2c2   : > { %v6040_v15 = vpop.xlane.xlu2 %1720 }
 0x2c5   : > { %1925 = vmin.xlane.f32.xlu1 %v1924_v8  ;;  %v1948_v8 = vmin.f32 %v1853_v3, %v1854_v50 }
 0x2c6   : > { %1922 = vmin.xlane.f32.xlu0 %v1921_v46  ;;  %v9228_v46 = vld [vmem:[#allocation54_spill] sm:$0xff] }
 0x2c7   : > { %1919 = vmin.xlane.f32.xlu2 %v1918_v41  ;;  %v1945_v41 = vmin.f32 %v1851_v35, %v1852_v52 }
 0x2c8   : > { %v6066_v9 = vpop.xlane.xlu1 %1735 }
 0x2c9   : > { %v6080_v27 = vpop.xlane.xlu0 %1732 }
 0x2ca   : > { %v6064_v43 = vpop.xlane.xlu2 %1729 }
 0x2cd   : > { %1934 = vmin.xlane.f32.xlu1 %v1933_v13 }
 0x2ce   : > { %1931 = vmin.xlane.f32.xlu0 %v1930_v33  ;;  %v9240_v33 = vld [vmem:[#allocation45_spill] sm:$0xff] }
 0x2cf   : > { %1928 = vmin.xlane.f32.xlu2 %v1927_v61  ;;  %v1962_v61 = vsel %vm9239_vm4, %v4077_v21, 2.0 }
 0x2d0   : > { %v6090_v31 = vpop.xlane.xlu1 %1744  ;;  %v2030_v13 = vmin.f32 %v1961_v34, %v1962_v61 }
 0x2d1   : > { %9215 = vst [vmem:[#allocation37_spill] sm:$0xff] %v6090_v31  ;;  %v6104_v5 = vpop.xlane.xlu0 %1741 }
 0x2d2   : > { %v6088_v4 = vpop.xlane.xlu2 %1738  ;;  %9220 = vst [vmem:[#allocation66_spill] sm:$0xff] %v6104_v5 }
 0x2d5   : > { %1943 = vmin.xlane.f32.xlu1 %v1942_v60  ;;  %v3628_v60 = vld [vmem:[%s3734_s24] sm:$0x3] }
 0x2d6   : > { %1940 = vmin.xlane.f32.xlu0 %v1939_v22  ;;  %v9247_v22 = vld [vmem:[#allocation33_spill] sm:$0xff] }
 0x2d7   : > { %1937 = vmin.xlane.f32.xlu2 %v1936_v40  ;;  %v9246_v40 = vld [vmem:[#allocation78_spill] sm:$0xff]  ;;  %vm9248_vm2 = vcmp.gt.f32.partialorder %v9247_v22, 0.5 }
 0x2d8   : > { %v6114_v24 = vpop.xlane.xlu1 %1753  ;;  %v2128_v35 = vsel %vm9248_vm2, %v3628_v60, 2.0  ;;  %vm9251_vm12 = vmmov %vm9248_vm2 }
 0x2d9   : > { %9224 = vst [vmem:[#allocation69_spill] sm:$0xff] %v6114_v24  ;;  %v6122_v44 = vpop.xlane.xlu0 %1750  ;;  %v2150_v20 = vsel %vm9251_vm12, %v3628_v60, -1.0  ;;  %v2130_v21 = vperm.slane %v2128_v35, 0  ;;  %v2131_v14 = vperm.slane %v2128_v35, 1  ;;  %v9263_v35 = vld [vmem:[#allocation87_spill] sm:$0xff]  ;;  %vm9289_vm1 = vmmov %vm9248_vm2  ;;  %v9327_v24 = vld [vmem:[#allocation50_spill] sm:$0xff] }
 0x2da   : > { %v6112_v30 = vpop.xlane.xlu2 %1747  ;;  %9225 = vst [vmem:[#allocation70_spill] sm:$0xff] %v6122_v44  ;;  %v2152_v50 = vperm.slane %v2150_v20, 0  ;;  %vm9291_vm14 = vmmov %vm9289_vm1  ;;  %v9325_v44 = vld [vmem:[#allocation67_spill] sm:$0xff] }
 0x2db   : > { %9223 = vst [vmem:[#allocation68_spill] sm:$0xff] %v6112_v30 }
 0x2dc   : > { %v2156_v34 = vsel %vm2114_vm9, %v2152_v50, -inf }
 0x2dd   : > { %2016 = vmin.xlane.f32.xlu1 %v9228_v46  ;;  %v9254_v46 = vld [vmem:[#allocation81_spill] sm:$0xff] }
 0x2de   : > { %1949 = vmin.xlane.f32.xlu0 %v1948_v8  ;;  %v9253_v8 = vld [vmem:[#allocation79_spill] sm:$0xff] }
 0x2df   : > { %1946 = vmin.xlane.f32.xlu2 %v1945_v41  ;;  %v2153_v41 = vperm.slane %v2150_v20, 1  ;;  %v9264_v20 = vld [vmem:[#allocation89_spill] sm:$0xff] }
 0x2e0   : > { %v6133_v7 = vpop.xlane.xlu1 %1762 }
 0x2e1   : > { %9230 = vst [vmem:[#allocation73_spill] sm:$0xff] %v6133_v7  ;;  %v6135_v42 = vpop.xlane.xlu0 %1759  ;;  %v2157_v61 = vsel %vm2114_vm9, %v2153_v41, -inf  ;;  %v9268_v41 = vld [vmem:[#allocation90_spill] sm:$0xff] }
 0x2e2   : > { %v6131_v1 = vpop.xlane.xlu2 %1756  ;;  %9231 = vst [vmem:[#allocation74_spill] sm:$0xff] %v6135_v42  ;;  %v2158_v28 = vmax.f32 %v2156_v34, %v2157_v61  ;;  %v9275_v34 = vld [vmem:[#allocation98_spill] sm:$0xff]  ;;  %v9276_v61 = vld [vmem:[#allocation97_spill] sm:$0xff] }
 0x2e3   : > { %9229 = vst [vmem:[#allocation71_spill] sm:$0xff] %v6131_v1  ;;  %v9316_v7 = vld [vmem:[#allocation46_spill] sm:$0xff]  ;;  %v9319_v1 = vld [vmem:[#allocation52_spill] sm:$0xff] }
 0x2e4   : > { %vm8537_vm11 = vcmp.gt.f32.partialorder %v9316_v7, -1.0 }
 0x2e5   : > { %2025 = vmin.xlane.f32.xlu1 %v9233_v36  ;;  %v2134_v36 = vsel %vm2114_vm9, %v2130_v21, inf }
 0x2e6   : > { %2022 = vmin.xlane.f32.xlu0 %v9234_v29  ;;  %v2135_v29 = vsel %vm2114_vm9, %v2131_v14, inf }
 0x2e7   : > { %2019 = vmin.xlane.f32.xlu2 %v9232_v62  ;;  %v9255_v62 = vld [vmem:[#allocation80_spill] sm:$0xff]  ;;  %v2136_v11 = vmin.f32 %v2134_v36, %v2135_v29 }
 0x2e8   : > { %v6142_v19 = vpop.xlane.xlu1 %1771 }
 0x2e9   : > { %9236 = vst [vmem:[#allocation85_spill] sm:$0xff] %v6142_v19  ;;  %v6144_v59 = vpop.xlane.xlu0 %1768 }
 0x2ea   : > { %v6140_v10 = vpop.xlane.xlu2 %1765  ;;  %9237 = vst [vmem:[#allocation86_spill] sm:$0xff] %v6144_v59 }
 0x2eb   : > { %9235 = vst [vmem:[#allocation77_spill] sm:$0xff] %v6140_v10 }
 0x2ed   : > { %2034 = vmin.xlane.f32.xlu1 %v9241_v2 }
 0x2ee   : > { %2031 = vmin.xlane.f32.xlu0 %v2030_v13 }
 0x2ef   : > { %2028 = vmin.xlane.f32.xlu2 %v9240_v33 }
 0x2f0   : > { %v6156_v49 = vpop.xlane.xlu1 %1780 }
 0x2f1   : > { %9243 = vst [vmem:[#allocation83_spill] sm:$0xff] %v6156_v49  ;;  %v6158_v6 = vpop.xlane.xlu0 %1777 }
 0x2f2   : > { %v6154_v58 = vpop.xlane.xlu2 %1774  ;;  %9244 = vst [vmem:[#allocation88_spill] sm:$0xff] %v6158_v6 }
 0x2f3   : > { %9242 = vst [vmem:[#allocation82_spill] sm:$0xff] %v6154_v58 }
 0x2f5   : > { %2043 = vmin.xlane.f32.xlu1 %v9246_v40 }
 0x2f6   : > { %2040 = vmin.xlane.f32.xlu0 %v2039_v32  ;;  %v9259_v32 = vld [vmem:[#allocation84_spill] sm:$0xff] }
 0x2f7   : > { %2037 = vmin.xlane.f32.xlu2 %v9245_v38 }
 0x2f8   : > { %v6173_v3 = vpop.xlane.xlu1 %1789 }
 0x2f9   : > { %9250 = vst [vmem:[#allocation63_spill] sm:$0xff] %v6173_v3  ;;  %v6177_v56 = vpop.xlane.xlu0 %1786  ;;  %v9287_v3 = vld [vmem:[#allocation104_spill] sm:$0xff] }
 0x2fa   : > { %v6171_v52 = vpop.xlane.xlu2 %1783  ;;  %9252 = vst [vmem:[#allocation64_spill] sm:$0xff] %v6177_v56  ;;  %v9286_v56 = vld [vmem:[#allocation95_spill] sm:$0xff] }
 0x2fb   : > { %9249 = vst [vmem:[#allocation54_spill] sm:$0xff] %v6171_v52 }
 0x2fd   : > { %2052 = vmin.xlane.f32.xlu1 %v9254_v46  ;;  %v9270_v46 = vld [vmem:[#allocation91_spill] sm:$0xff] }
 0x2fe   : > { %2049 = vmin.xlane.f32.xlu0 %v9255_v62 }
 0x2ff   : > { %2046 = vmin.xlane.f32.xlu2 %v9253_v8  ;;  %v9269_v8 = vld [vmem:[#allocation92_spill] sm:$0xff] }
 0x300   : > { %v6188_v33 = vpop.xlane.xlu1 %1862 }
 0x301   : > { %9257 = vst [vmem:[#allocation45_spill] sm:$0xff] %v6188_v33  ;;  %v6190_v2 = vpop.xlane.xlu0 %1859 }
 0x302   : > { %v6186_v13 = vpop.xlane.xlu2 %1856  ;;  %9258 = vst [vmem:[#allocation72_spill] sm:$0xff] %v6190_v2  ;;  %vm8555_vm5 = vcmp.lt.f32.partialorder %v6190_v2, 512.0 }
 0x303   : > { %9256 = vst [vmem:[#allocation57_spill] sm:$0xff] %v6186_v13 }
 0x305   : > { %2055 = vmin.xlane.f32.xlu1 %v9259_v32 }
 0x306   : > { %2159 = vmax.xlane.f32.xlu0 %v2158_v28 }
 0x307   : > { %2137 = vmin.xlane.f32.xlu2 %v2136_v11 }
 0x308   : > { %v6195_v40 = vpop.xlane.xlu1 %1871 }
 0x309   : > { %9261 = vst [vmem:[#allocation78_spill] sm:$0xff] %v6195_v40  ;;  %v6197_v60 = vpop.xlane.xlu0 %1868  ;;  %vm8570_vm4 = vcmp.lt.f32.partialorder %v6195_v40, 512.0  ;;  %v9371_v40 = vld [vmem:[#allocation43_spill] sm:$0xff] }
 0x30a   : > { %v6193_v38 = vpop.xlane.xlu2 %1865  ;;  %9262 = vst [vmem:[#allocation33_spill] sm:$0xff] %v6197_v60  ;;  %vm8565_vm2 = vcmp.lt.f32.partialorder %v6197_v60, 512.0 }
 0x30b   : > { %9260 = vst [vmem:[#allocation75_spill] sm:$0xff] %v6193_v38  ;;  %vm8561_vm13 = vcmp.lt.f32.partialorder %v6193_v38, 512.0 }
 0x30d   : > { %2064 = vmin.xlane.f32.xlu1 %v5554_v37  ;;  %v9274_v37 = vld [vmem:[#allocation93_spill] sm:$0xff] }
 0x30e   : > { %2061 = vmin.xlane.f32.xlu0 %v9264_v20  ;;  %v9281_v20 = vld [vmem:[#allocation101_spill] sm:$0xff] }
 0x30f   : > { %2058 = vmin.xlane.f32.xlu2 %v9263_v35  ;;  %v9280_v35 = vld [vmem:[#allocation94_spill] sm:$0xff] }
 0x310   : > { %v6204_v14 = vpop.xlane.xlu1 %1880 }
 0x311   : > { %9266 = vst [vmem:[#allocation81_spill] sm:$0xff] %v6204_v14  ;;  %v6206_v50 = vpop.xlane.xlu0 %1877 }
 0x312   : > { %v6202_v21 = vpop.xlane.xlu2 %1874  ;;  %9267 = vst [vmem:[#allocation80_spill] sm:$0xff] %v6206_v50 }
 0x313   : > { %9265 = vst [vmem:[#allocation79_spill] sm:$0xff] %v6202_v21 }
 0x315   : > { %2073 = vmin.xlane.f32.xlu1 %v9269_v8 }
 0x316   : > { %2070 = vmin.xlane.f32.xlu0 %v9270_v46  ;;  %v2113_v46 = vrot.slane %v4189_v18, 7 }
 0x317   : > { %2067 = vmin.xlane.f32.xlu2 %v9268_v41  ;;  %v9282_v41 = vld [vmem:[#allocation100_spill] sm:$0xff] }
 0x318   : > { %v6213_v36 = vpop.xlane.xlu1 %1889 }
 0x319   : > { %9272 = vst [vmem:[#allocation87_spill] sm:$0xff] %v6213_v36  ;;  %v6215_v29 = vpop.xlane.xlu0 %1886 }
 0x31a   : > { %v6211_v62 = vpop.xlane.xlu2 %1883  ;;  %9273 = vst [vmem:[#allocation89_spill] sm:$0xff] %v6215_v29 }
 0x31b   : > { %9271 = vst [vmem:[#allocation84_spill] sm:$0xff] %v6211_v62 }
 0x31d   : > { %2082 = vmin.xlane.f32.xlu1 %v9275_v34 }
 0x31e   : > { %2079 = vmin.xlane.f32.xlu0 %v9276_v61  ;;  %v2115_v61 = vsel %vm2114_vm9, %v4174_v16, %v2113_v46 }
 0x31f   : > { %2076 = vmin.xlane.f32.xlu2 %v9274_v37  ;;  %v2139_v18 = vsel %vm9291_vm14, %v2115_v61, -1.0 }
 0x320   : > { %v6222_v28 = vpop.xlane.xlu1 %1898  ;;  %v2141_v57 = vperm.slane %v2139_v18, 0  ;;  %v2142_v6 = vperm.slane %v2139_v18, 1 }
 0x321   : > { %9278 = vst [vmem:[#allocation92_spill] sm:$0xff] %v6222_v28  ;;  %v6224_v32 = vpop.xlane.xlu0 %1895  ;;  %vm8564_vm12 = vcmp.lt.f32.partialorder %v6222_v28, 512.0 }
 0x322   : > { %v6220_v11 = vpop.xlane.xlu2 %1892  ;;  %9279 = vst [vmem:[#allocation91_spill] sm:$0xff] %v6224_v32  ;;  %v2145_v22 = vsel %vm2114_vm9, %v2141_v57, -inf }
 0x323   : > { %9277 = vst [vmem:[#allocation90_spill] sm:$0xff] %v6220_v11 }
 0x325   : > { %2091 = vmin.xlane.f32.xlu1 %v9281_v20  ;;  %v2117_v20 = vsel %vm9289_vm1, %v2115_v61, 512.0  ;;  %v2146_v61 = vsel %vm2114_vm9, %v2142_v6, -inf  ;;  %vm8556_vm1 = vcmp.lt.f32.partialorder %v6186_v13, 512.0 }
 0x326   : > { %2088 = vmin.xlane.f32.xlu0 %v9282_v41  ;;  %v2119_v63 = vperm.slane %v2117_v20, 0  ;;  %v2120_v52 = vperm.slane %v2117_v20, 1  ;;  %v2147_v18 = vmax.f32 %v2145_v22, %v2146_v61 }
 0x327   : > { %2085 = vmin.xlane.f32.xlu2 %v9280_v35  ;;  %v9288_v35 = vld [vmem:[#allocation103_spill] sm:$0xff] }
 0x328   : > { %v6232_v37 = vpop.xlane.xlu1 %1907  ;;  %v2124_v46 = vsel %vm2114_vm9, %v2120_v52, inf }
 0x329   : > { %9284 = vst [vmem:[#allocation98_spill] sm:$0xff] %v6232_v37  ;;  %v6234_v34 = vpop.xlane.xlu0 %1904 }
 0x32a   : > { %v6229_v8 = vpop.xlane.xlu2 %1901  ;;  %9285 = vst [vmem:[#allocation97_spill] sm:$0xff] %v6234_v34  ;;  %vm8574_vm14 = vcmp.lt.f32.partialorder %v6234_v34, 512.0  ;;  %v9375_v34 = vld [vmem:[#allocation37_spill] sm:$0xff] }
 0x32b   : > { %9283 = vst [vmem:[#allocation93_spill] sm:$0xff] %v6229_v8 }
 0x32d   : > { %2100 = vmin.xlane.f32.xlu1 %v9287_v3  ;;  %v2123_v3 = vsel %vm2114_vm9, %v2119_v63, inf  ;;  %vm8558_vm9 = vcmp.gt.f32.partialorder %v9327_v24, -1.0 }
 0x32e   : > { %2097 = vmin.xlane.f32.xlu0 %v9288_v35  ;;  %v2125_v20 = vmin.f32 %v2123_v3, %v2124_v46 }
 0x32f   : > { %2094 = vmin.xlane.f32.xlu2 %v9286_v56  ;;  %v9294_v56 = vld [vmem:[#allocation96_spill] sm:$0xff] }
 0x330   : > { %v6247_v49 = vpop.xlane.xlu1 %1916 }
 0x331   : > { %9292 = vst [vmem:[#allocation101_spill] sm:$0xff] %v6247_v49  ;;  %v6249_v16 = vpop.xlane.xlu0 %1913 }
 0x332   : > { %v6243_v41 = vpop.xlane.xlu2 %1910  ;;  %9293 = vst [vmem:[#allocation100_spill] sm:$0xff] %v6249_v16 }
 0x333   : > { %9290 = vst [vmem:[#allocation94_spill] sm:$0xff] %v6243_v41 }
 0x335   : > { %2109 = vmin.xlane.f32.xlu1 %v5799_v54 }
 0x336   : > { %2106 = vmin.xlane.f32.xlu0 %v5797_v53 }
 0x337   : > { %2103 = vmin.xlane.f32.xlu2 %v9294_v56 }
 0x338   : > { %v6260_v51 = vpop.xlane.xlu1 %1925 }
 0x339   : > { %9296 = vst [vmem:[#allocation104_spill] sm:$0xff] %v6260_v51  ;;  %v6262_v56 = vpop.xlane.xlu0 %1922  ;;  %v9317_v51 = vld [vmem:[#allocation102_spill] sm:$0xff] }
 0x33a   : > { %v6258_v35 = vpop.xlane.xlu2 %1919  ;;  %9297 = vst [vmem:[#allocation103_spill] sm:$0xff] %v6262_v56  ;;  %vm8536_vm0 = vcmp.gt.f32.partialorder %v9317_v51, -1.0  ;;  %v9318_v56 = vld [vmem:[#allocation38_spill] sm:$0xff] }
 0x33b   : > { %9295 = vst [vmem:[#allocation95_spill] sm:$0xff] %v6258_v35  ;;  %vm8538_vm8 = vcmp.gt.f32.partialorder %v9318_v56, -1.0 }
 0x33e   : > { %2148 = vmax.xlane.f32.xlu0 %v2147_v18 }
 0x33f   : > { %2126 = vmin.xlane.f32.xlu2 %v2125_v20 }
 0x340   : > { %v6266_v53 = vpop.xlane.xlu1 %1934 }
 0x341   : > { %9299 = vst [vmem:[#allocation109_spill] sm:$0xff] %v6266_v53  ;;  %v6268_v63 = vpop.xlane.xlu0 %1931 }
 0x342   : > { %v6264_v54 = vpop.xlane.xlu2 %1928  ;;  %9300 = vst [vmem:[#allocation110_spill] sm:$0xff] %v6268_v63  ;;  %v9315_v63 = vld [vmem:[#allocation47_spill] sm:$0xff] }
 0x343   : > { %9298 = vst [vmem:[#allocation96_spill] sm:$0xff] %v6264_v54  ;;  %v9314_v54 = vld [vmem:[#allocation99_spill] sm:$0xff]  ;;  %vm8541_vm10 = vcmp.gt.f32.partialorder %v9315_v63, -1.0 }
 0x344   : > { %vm8545_vm15 = vcmp.gt.f32.partialorder %v9314_v54, -1.0 }
 0x348   : > { %v6272_v57 = vpop.xlane.xlu1 %1943 }
 0x349   : > { %9302 = vst [vmem:[#allocation112_spill] sm:$0xff] %v6272_v57  ;;  %v6274_v6 = vpop.xlane.xlu0 %1940  ;;  %v9431_v63 = vld [vmem:[#allocation110_spill] sm:$0xff] }
 0x34a   : > { %v6270_v52 = vpop.xlane.xlu2 %1937  ;;  %9303 = vst [vmem:[#allocation113_spill] sm:$0xff] %v6274_v6 }
 0x34b   : > { %9301 = vst [vmem:[#allocation111_spill] sm:$0xff] %v6270_v52 }
 0x350   : > { %v2017_v46 = vpop.xlane.xlu1 %2016 }
 0x351   : > { %v6278_v22 = vpop.xlane.xlu0 %1949 }
 0x352   : > { %v6276_v3 = vpop.xlane.xlu2 %1946  ;;  %9305 = vst [vmem:[#allocation115_spill] sm:$0xff] %v6278_v22 }
 0x353   : > { %9304 = vst [vmem:[#allocation114_spill] sm:$0xff] %v6276_v3 }
 0x358   : > { %v6282_v20 = vpop.xlane.xlu1 %2025 }
 0x359   : > { %v6284_v18 = vpop.xlane.xlu0 %2022 }
 0x35a   : > { %v6280_v61 = vpop.xlane.xlu2 %2019 }
 0x360   : > { %v6288_v59 = vpop.xlane.xlu1 %2034 }
 0x361   : > { %9306 = vst [vmem:[#allocation116_spill] sm:$0xff] %v6288_v59  ;;  %v6290_v52 = vpop.xlane.xlu0 %2031  ;;  %v9328_v59 = vld [vmem:[#allocation106_spill] sm:$0xff] }
 0x362   : > { %v6286_v58 = vpop.xlane.xlu2 %2028  ;;  %vm8571_vm3 = vcmp.gt.f32.partialorder %v9328_v59, -1.0 }
 0x368   : > { %v6294_v45 = vpop.xlane.xlu1 %2043 }
 0x369   : > { %9308 = vst [vmem:[#allocation118_spill] sm:$0xff] %v6294_v45  ;;  %v6296_v3 = vpop.xlane.xlu0 %2040  ;;  %v9323_v45 = vld [vmem:[#allocation58_spill] sm:$0xff] }
 0x36a   : > { %v6292_v57 = vpop.xlane.xlu2 %2037  ;;  %9309 = vst [vmem:[#allocation119_spill] sm:$0xff] %v6296_v3  ;;  %vm8542_vm7 = vcmp.gt.f32.partialorder %v9323_v45, -1.0  ;;  %v9324_v3 = vld [vmem:[#allocation42_spill] sm:$0xff] }
 0x36b   : > { %9307 = vst [vmem:[#allocation117_spill] sm:$0xff] %v6292_v57  ;;  %v9326_v57 = vld [vmem:[#allocation65_spill] sm:$0xff] }
 0x370   : > { %v6300_v22 = vpop.xlane.xlu1 %2052 }
 0x371   : > { %9311 = vst [vmem:[#allocation121_spill] sm:$0xff] %v6300_v22  ;;  %v6302_v6 = vpop.xlane.xlu0 %2049  ;;  %v9320_v22 = vld [vmem:[#allocation51_spill] sm:$0xff] }
 0x372   : > { %v6298_v19 = vpop.xlane.xlu2 %2046  ;;  %9312 = vst [vmem:[#allocation122_spill] sm:$0xff] %v6302_v6  ;;  %vm8540_vm6 = vcmp.gt.f32.partialorder %v9320_v22, -1.0 }
 0x373   : > { %9310 = vst [vmem:[#allocation120_spill] sm:$0xff] %v6298_v19  ;;  %v9322_v19 = vld [vmem:[#allocation59_spill] sm:$0xff] }
 0x378   : > { %v6304_v10 = vpop.xlane.xlu1 %2055 }
 0x379   : > { %9313 = vst [vmem:[#allocation123_spill] sm:$0xff] %v6304_v10  ;;  %v2160_v42 = vpop.xlane.xlu0 %2159  ;;  %v9321_v10 = vld [vmem:[#allocation40_spill] sm:$0xff] }
 0x37a   : > { %v2138_v53 = vpop.xlane.xlu2 %2137 }
 0x37b   : > { %v6315_v6 = vperm.slane %v2138_v53, 0  ;;  %v6328_v53 = vperm.slane %v2160_v42, 0 }
 0x37d   : > { %v6338_v30 = vsel %vm8545_vm15, %v5984_v26, %v6315_v6  ;;  %v6345_v42 = vsel %vm8536_vm0, %v5970_v39, %v6315_v6  ;;  %v6351_v31 = vsel %vm8541_vm10, %v5992_v47, %v6315_v6  ;;  %v6357_v26 = vsel %vm8537_vm11, %v6008_v17, %v6315_v6 }
 0x37e   : > { %9329 = vst [vmem:[#allocation124_spill] sm:$0xff] %v6338_v30  ;;  %v6363_v54 = vsel %vm8538_vm8, %v5994_v48, %v6315_v6  ;;  %vm8633_vm0 = vcmp.lt.f32.partialorder %v6229_v8, 512.0  ;;  %v6370_v47 = vsel %vm8540_vm6, %v6016_v25, %v6315_v6  ;;  %vm9335_vm11 = vcmp.gt.f32.partialorder %v9319_v1, -1.0  ;;  %v9340_v25 = vld [vmem:[#allocation56_spill] sm:$0xff] }
 0x37f   : > { %9330 = vst [vmem:[#allocation125_spill] sm:$0xff] %v6345_v42  ;;  %v6376_v17 = vsel %vm9335_vm11, %v6032_v55, %v6315_v6  ;;  %vm9337_vm8 = vcmp.gt.f32.partialorder %v9321_v10, -1.0  ;;  %v6388_v56 = vsel %vm8542_vm7, %v6040_v15, %v6315_v6  ;;  %vm8685_vm6 = vcmp.gt.f32.partialorder %v9340_v25, -1.0  ;;  %v9347_v10 = vld [vmem:[#allocation105_spill] sm:$0xff] }
 0x380   : > { %v2065_v5 = vpop.xlane.xlu1 %2064  ;;  %9331 = vst [vmem:[#allocation126_spill] sm:$0xff] %v6351_v31  ;;  %v6382_v48 = vsel %vm9337_vm8, %v6018_v23, %v6315_v6  ;;  %vm9341_vm11 = vcmp.gt.f32.partialorder %v9322_v19, -1.0  ;;  %vm9343_vm8 = vcmp.gt.f32.partialorder %v9324_v3, -1.0  ;;  %vm9345_vm7 = vcmp.gt.f32.partialorder %v9326_v57, -1.0  ;;  %v9352_v57 = vld [vmem:[#allocation107_spill] sm:$0xff] }
 0x381   : > { %9332 = vst [vmem:[#allocation127_spill] sm:$0xff] %v6357_v26  ;;  %v2062_v39 = vpop.xlane.xlu0 %2061  ;;  %v6396_v55 = vsel %vm9341_vm11, %v6056_v12, %v6315_v6  ;;  %v6402_v23 = vsel %vm9343_vm8, %v6042_v0, %v6315_v6  ;;  %v6408_v15 = vsel %vm9345_vm7, %v6064_v43, %v6315_v6  ;;  %v2325_v45 = vsel %vm8556_vm1, %v2017_v46, %v6328_v53 }
 0x382   : > { %v6310_v35 = vpop.xlane.xlu2 %2058  ;;  %9333 = vst [vmem:[#allocation128_spill] sm:$0xff] %v6363_v54  ;;  %vm8686_vm15 = vcmp.gt.f32.partialorder %v9347_v10, -1.0  ;;  %vm8614_vm11 = vcmp.lt.f32.partialorder %v6249_v16, 512.0  ;;  %vm9348_vm10 = vcmp.gt.f32.partialorder %v9325_v44, -1.0  ;;  %v6425_v12 = vsel %vm8558_vm9, %v6066_v9, %v6315_v6  ;;  %v9380_v16 = vld [vmem:[#allocation69_spill] sm:$0xff] }
 0x383   : > { %9334 = vst [vmem:[#allocation129_spill] sm:$0xff] %v6370_v47  ;;  %v6419_v0 = vsel %vm9348_vm10, %v6080_v27, %v6315_v6  ;;  %v2326_v46 = vsel %vm8555_vm5, %v6280_v61, %v6328_v53  ;;  %vm8681_vm7 = vcmp.gt.f32.partialorder %v9352_v57, -1.0  ;;  %vm8624_vm8 = vcmp.lt.f32.partialorder %v6243_v41, 512.0  ;;  %v9357_v61 = vld [vmem:[#allocation61_spill] sm:$0xff] }
 0x384   : > { %9336 = vst [vmem:[#allocation130_spill] sm:$0xff] %v6376_v17  ;;  %vm9356_vm10 = vcmp.lt.f32.partialorder %v6188_v33, 512.0  ;;  %vm8676_vm5 = vcmp.gt.f32.partialorder %v9357_v61, -1.0  ;;  %vm8675_vm1 = vcmp.lt.f32.partialorder %v6202_v21, 512.0  ;;  %v2328_v19 = vsel %vm8561_vm13, %v6282_v20, %v6328_v53  ;;  %v9387_v33 = vld [vmem:[#allocation119_spill] sm:$0xff] }
 0x385   : > { %9338 = vst [vmem:[#allocation131_spill] sm:$0xff] %v6382_v48  ;;  %v2327_v13 = vsel %vm9356_vm10, %v6284_v18, %v6328_v53  ;;  %v6456_v24 = vsub.f32 %v2325_v45, %v6338_v30  ;;  %v9361_v18 = vld [vmem:[#allocation76_spill] sm:$0xff]  ;;  %vm8674_vm9 = vcmp.lt.f32.partialorder %v6206_v50, 512.0  ;;  %v6465_v27 = vsub.f32 %v2326_v46, %v6345_v42  ;;  %v9394_v45 = vld [vmem:[#allocation122_spill] sm:$0xff] }
 0x386   : > { %9339 = vst [vmem:[#allocation132_spill] sm:$0xff] %v6388_v56  ;;  %v2339_v20 = vsel %vm8564_vm12, %v6310_v35, %v6328_v53  ;;  %vm8663_vm13 = vcmp.lt.f32.partialorder %v6204_v14, 512.0  ;;  %v2329_v43 = vsel %vm8565_vm2, %v6286_v58, %v6328_v53  ;;  %v6481_v46 = vsub.f32 %v2327_v13, %v6351_v31  ;;  %v9412_v31 = vld [vmem:[#allocation44_spill] sm:$0xff] }
 0x387   : > { %9342 = vst [vmem:[#allocation133_spill] sm:$0xff] %v6396_v55  ;;  %vm8662_vm10 = vcmp.lt.f32.partialorder %v6211_v62, 512.0  ;;  %v2330_v3 = vsel %vm8570_vm4, %v6290_v52, %v6328_v53  ;;  %v6492_v38 = vsub.f32 %v2328_v19, %v6357_v26  ;;  %v6498_v58 = vsel %vm8571_vm3, %v6088_v4, %v6315_v6  ;;  %v9379_v4 = vld [vmem:[#allocation116_spill] sm:$0xff] }
 0x388   : > { %9344 = vst [vmem:[#allocation134_spill] sm:$0xff] %v6402_v23  ;;  %vm8647_vm2 = vcmp.lt.f32.partialorder %v6213_v36, 512.0  ;;  %vm8657_vm12 = vcmp.lt.f32.partialorder %v6215_v29, 512.0  ;;  %3564 = vrcp.f32 %v6456_v24  ;;  %v6506_v52 = vsub.f32 %v2339_v20, %v6498_v58  ;;  %v2074_v28 = vpop.xlane.xlu1 %2073  ;;  %v9402_v36 = vld [vmem:[#allocation123_spill] sm:$0xff]  ;;  %v9413_v30 = vld [vmem:[#allocation20_spill] sm:$0xff] }
 0x389   : > { %9346 = vst [vmem:[#allocation135_spill] sm:$0xff] %v6408_v15  ;;  %v2341_v19 = vsel %vm8574_vm14, %v2065_v5, %v6328_v53  ;;  %vm8640_vm3 = vcmp.lt.f32.partialorder %v6220_v11, 512.0  ;;  %v6516_v35 = vsub.f32 %v2329_v43, %v6363_v54  ;;  %3566 = vrcp.f32 %v6465_v27  ;;  %v2071_v9 = vpop.xlane.xlu0 %2070 }
 0x38a   : > { %9349 = vst [vmem:[#allocation136_spill] sm:$0xff] %v6419_v0  ;;  %v2068_v2 = vpop.xlane.xlu2 %2067  ;;  %v2340_v20 = vsel %vm8633_vm0, %v2062_v39, %v6328_v53  ;;  %vm8639_vm14 = vcmp.lt.f32.partialorder %v6224_v32, 512.0  ;;  %v6524_v5 = vsub.f32 %v2330_v3, %v6370_v47  ;;  %3568 = vrcp.f32 %v6481_v46  ;;  %v9377_v3 = vld [vmem:[#allocation66_spill] sm:$0xff]  ;;  %v9407_v32 = vld [vmem:[#allocation103_spill] sm:$0xff] }
 0x38b   : > { %9350 = vst [vmem:[#allocation137_spill] sm:$0xff] %v6425_v12  ;;  %v6531_v43 = vsel %vm8685_vm6, %v9375_v34, %v6315_v6  ;;  %vm9376_vm4 = vcmp.lt.f32.partialorder %v6232_v37, 512.0  ;;  %3570 = vrcp.f32 %v6492_v38  ;;  %v6544_v8 = vsel %vm8686_vm15, %v9377_v3, %v6315_v6 }
 0x38c   : > { %9360 = vst [vmem:[#allocation138_spill] sm:$0xff] %v6456_v24  ;;  %v2342_v60 = vsel %vm9376_vm4, %v2068_v2, %v6328_v53  ;;  %v6538_v39 = vsub.f32 %v2341_v19, %v6531_v43  ;;  %v2344_v34 = vsel %vm8614_vm11, %v2074_v28, %v6328_v53  ;;  %3572 = vrcp.f32 %v6506_v52  ;;  %v9378_v2 = vld [vmem:[#allocation68_spill] sm:$0xff]  ;;  %v9436_v24 = vld [vmem:[#allocation53_spill] sm:$0xff] }
 0x38d   : > { %9364 = vst [vmem:[#allocation139_spill] sm:$0xff] %v6465_v27  ;;  %v6551_v37 = vsub.f32 %v2340_v20, %v6544_v8  ;;  %v6557_v19 = vsel %vm8681_vm7, %v9378_v2, %v6315_v6  ;;  %v2343_v3 = vsel %vm8624_vm8, %v2071_v9, %v6328_v53  ;;  %v2331_v28 = vsel %vm8675_vm1, %v9379_v4, %v6328_v53  ;;  %v9382_v9 = vld [vmem:[#allocation117_spill] sm:$0xff] }
 0x38e   : > { %9367 = vst [vmem:[#allocation140_spill] sm:$0xff] %v6481_v46  ;;  %3574 = vrcp.f32 %v6516_v35  ;;  %v6568_v20 = vsub.f32 %v2342_v60, %v6557_v19  ;;  %v6574_v2 = vsel %vm8676_vm5, %v9380_v16, %v6315_v6  ;;  %v6576_v44 = vpop.eup %3564  ;;  %v2332_v41 = vsel %vm8674_vm9, %v9382_v9, %v6328_v53  ;;  %v9383_v60 = vld [vmem:[#allocation70_spill] sm:$0xff] }
 0x38f   : > { %9369 = vst [vmem:[#allocation141_spill] sm:$0xff] %v6492_v38  ;;  %3576 = vrcp.f32 %v6524_v5  ;;  %v6584_v4 = vsub.f32 %v2344_v34, %v6574_v2  ;;  %vm9384_vm4 = vcmp.gt.f32.partialorder %v9361_v18, -1.0  ;;  %v6592_v16 = vpop.eup %3566  ;;  %v2333_v9 = vsel %vm8663_vm13, %v9387_v33, %v6328_v53  ;;  %v9422_v38 = vld [vmem:[#allocation49_spill] sm:$0xff] }
 0x390   : > { %9373 = vst [vmem:[#allocation142_spill] sm:$0xff] %v6516_v35  ;;  %v6590_v21 = vsel %vm9384_vm4, %v9383_v60, %v6315_v6  ;;  %3578 = vrcp.f32 %v6538_v39  ;;  %v6604_v50 = vpop.eup %3568  ;;  %v9389_v60 = vld [vmem:[#allocation118_spill] sm:$0xff]  ;;  %v6611_v54 = vsub.f32 %v2331_v28, %v6376_v17  ;;  %vm9391_vm4 = vcmp.lt.f32.partialorder %v6247_v49, 512.0  ;;  %v9417_v35 = vld [vmem:[#allocation104_spill] sm:$0xff]  ;;  %v2083_v25 = vpop.xlane.xlu1 %2082 }
 0x391   : > { %9374 = vst [vmem:[#allocation143_spill] sm:$0xff] %v6524_v5  ;;  %v6602_v34 = vsub.f32 %v2343_v3, %v6590_v21  ;;  %v2334_v47 = vsel %vm8662_vm10, %v9389_v60, %v6328_v53  ;;  %3580 = vrcp.f32 %v6551_v37  ;;  %v6617_v1 = vpop.eup %3570  ;;  %v9393_v3 = vld [vmem:[#allocation120_spill] sm:$0xff]  ;;  %v2336_v60 = vsel %vm8647_vm2, %v9394_v45, %v6328_v53  ;;  %v9415_v5 = vld [vmem:[#allocation18_spill] sm:$0xff]  ;;  %v2080_v7 = vpop.xlane.xlu0 %2079 }
 0x392   : > { %v2077_v13 = vpop.xlane.xlu2 %2076  ;;  %9381 = vst [vmem:[#allocation37_spill] sm:$0xff] %v6576_v44  ;;  %v2335_v14 = vsel %vm8657_vm12, %v9393_v3, %v6328_v53  ;;  %v6628_v28 = vsub.f32 %v2332_v41, %v6382_v48  ;;  %3582 = vrcp.f32 %v6568_v20  ;;  %v6631_v62 = vpop.eup %3572  ;;  %v6638_v29 = vsub.f32 %v2333_v9, %v6388_v56  ;;  %v9398_v3 = vld [vmem:[#allocation71_spill] sm:$0xff] }
 0x393   : > { %9385 = vst [vmem:[#allocation66_spill] sm:$0xff] %v6592_v16  ;;  %v2345_v33 = vsel %vm9391_vm4, %v2077_v13, %v6328_v53  ;;  %v9396_v13 = vld [vmem:[#allocation121_spill] sm:$0xff]  ;;  %3584 = vrcp.f32 %v6584_v4  ;;  %vm9399_vm4 = vcmp.gt.f32.partialorder %v9371_v40, -1.0  ;;  %v2338_v48 = vsel %vm8639_vm14, %v9402_v36, %v6328_v53 }
 0x394   : > { %9388 = vst [vmem:[#allocation68_spill] sm:$0xff] %v6604_v50  ;;  %v2337_v49 = vsel %vm8640_vm3, %v9396_v13, %v6328_v53  ;;  %v6645_v41 = vsel %vm9399_vm4, %v9398_v3, %v6315_v6  ;;  %v6647_v45 = vpop.eup %3574  ;;  %v2674_v13 = vand.u32 2147483648, %v6506_v52  ;;  %3586 = vrcp.f32 %v6602_v34 }
 0x395   : > { %9390 = vst [vmem:[#allocation116_spill] sm:$0xff] %v6611_v54  ;;  %v6656_v9 = vsub.f32 %v2345_v33, %v6645_v41  ;;  %v6658_v11 = vpop.eup %3576  ;;  %v6661_v56 = vsub.f32 %v2334_v47, %v6396_v55  ;;  %v6664_v3 = vsub.f32 %v2335_v14, %v6402_v23  ;;  %v6667_v17 = vsub.f32 %v2336_v60, %v6408_v15  ;;  %v9410_v15 = vld [vmem:[#allocation15_spill] sm:$0xff] }
 0x396   : > { %9392 = vst [vmem:[#allocation69_spill] sm:$0xff] %v6617_v1  ;;  %3588 = vrcp.f32 %v6611_v54  ;;  %v6670_v36 = vpop.eup %3578  ;;  %vm8670_vm4 = vcmp.lt.f32.partialorder %v9407_v32, 512.0  ;;  %v6674_v33 = vsub.f32 %v2337_v49, %v6419_v0  ;;  %v2664_v47 = vmul.f32 %v6631_v62, %v6506_v52  ;;  %v9411_v49 = vld [vmem:[#allocation19_spill] sm:$0xff] }
 0x397   : > { %9395 = vst [vmem:[#allocation117_spill] sm:$0xff] %v6628_v28  ;;  %3590 = vrcp.f32 %v6628_v28  ;;  %v2704_v14 = vand.u32 2147483648, %v6538_v39  ;;  %v6680_v23 = vpop.eup %3580  ;;  %v6683_v60 = vsub.f32 %v2338_v48, %v6425_v12  ;;  %vm8678_vm11 = vcmp.gt.f32.partialorder %v9412_v31, -1.0 }
 0x398   : > { %9397 = vst [vmem:[#allocation70_spill] sm:$0xff] %v6638_v29  ;;  %3592 = vrcp.f32 %v6638_v29  ;;  %v6690_v26 = vpop.eup %3582  ;;  %v2672_v42 = vand.u32 2147483647, %v6506_v52  ;;  %v6694_v28 = vor.u32 1.1754944e-38, %v2674_v13  ;;  %v2694_v0 = vmul.f32 %v6670_v36, %v6538_v39  ;;  %v9414_v13 = vld [vmem:[#allocation95_spill] sm:$0xff] }
 0x399   : > { %9400 = vst [vmem:[#allocation119_spill] sm:$0xff] %v6645_v41  ;;  %3594 = vrcp.f32 %v6656_v9  ;;  %v6699_v12 = vpop.eup %3584  ;;  %v2702_v55 = vand.u32 2147483647, %v6538_v39  ;;  %v2689_v29 = vand.u32 2147483648, %v6551_v37  ;;  %vm8687_vm8 = vcmp.lt.f32.partialorder %v9414_v13, 512.0  ;;  %v9445_v41 = vld [vmem:[#allocation74_spill] sm:$0xff] }
 0x39a   : > { %9401 = vst [vmem:[#allocation118_spill] sm:$0xff] %v6647_v45  ;;  %3596 = vrcp.f32 %v6661_v56  ;;  %v6706_v54 = vpop.eup %3586  ;;  %v2665_v48 = vsub.f32 1.0, %v2664_v47  ;;  %vm8694_vm0 = vcmp.lt.f32.partialorder %v9417_v35, 512.0  ;;  %v2679_v40 = vmul.f32 %v6680_v23, %v6551_v37  ;;  %v9420_v45 = vld [vmem:[#allocation22_spill] sm:$0xff] }
 0x39b   : > { %9403 = vst [vmem:[#allocation120_spill] sm:$0xff] %v6658_v11  ;;  %3598 = vrcp.f32 %v6664_v3  ;;  %v6710_v11 = vor.u32 1.1754944e-38, %v2704_v14  ;;  %v2709_v18 = vmul.f32 %v6690_v26, %v6568_v20  ;;  %v9419_v14 = vld [vmem:[#allocation108_spill] sm:$0xff]  ;;  %vm2668_vm3 = vweird.f32 %v6506_v52 }
 0x39c   : > { %9404 = vst [vmem:[#allocation122_spill] sm:$0xff] %v6661_v56  ;;  %v6714_v56 = vpop.eup %3588  ;;  %vm8695_vm14 = vcmp.gt.f32.partialorder %v9419_v14, -1.0  ;;  %3600 = vrcp.f32 %v6667_v17  ;;  %v2739_v57 = vmul.f32 %v6699_v12, %v6584_v4  ;;  %v2749_v61 = vand.u32 2147483648, %v6584_v4  ;;  %v9451_v14 = vld [vmem:[#allocation109_spill] sm:$0xff] }
 0x39d   : > { %9405 = vst [vmem:[#allocation121_spill] sm:$0xff] %v6664_v3  ;;  %v2719_v3 = vand.u32 2147483648, %v6568_v20  ;;  %v6723_v47 = vpop.eup %3590  ;;  %vm8696_vm2 = vcmp.gt.f32.partialorder %v9422_v38, -1.0  ;;  %3602 = vrcp.f32 %v6674_v33  ;;  %v6737_v10 = vor.u32 1.1754944e-38, %v2689_v29 }
 0x39e   : > { %9406 = vst [vmem:[#allocation71_spill] sm:$0xff] %v6667_v17  ;;  %v6733_v1 = vpop.eup %3592  ;;  %v2724_v17 = vmul.f32 %v6706_v54, %v6602_v34  ;;  %3604 = vrcp.f32 %v6683_v60  ;;  %v2717_v50 = vand.u32 2147483647, %v6568_v20  ;;  %vm2698_vm12 = vweird.f32 %v6538_v39 }
 0x39f   : > { %9408 = vst [vmem:[#allocation123_spill] sm:$0xff] %v6674_v33  ;;  %v6741_v59 = vpop.eup %3594  ;;  %v2710_v29 = vsub.f32 1.0, %v2709_v18  ;;  %v6750_v33 = vor.u32 1.1754944e-38, %v2719_v3  ;;  %v2347_v22 = vsel %vm8670_vm4, %v2083_v25, %v6328_v53  ;;  %vm6757_vm10 = vcmp.eq.f32.partialorder %v2672_v42, 8.507059e+37 }
 0x3a0   : > { %9409 = vst [vmem:[#allocation144_spill] sm:$0xff] %v6683_v60  ;;  %v6747_v46 = vpop.eup %3596  ;;  %vm2683_vm13 = vweird.f32 %v6551_v37  ;;  %v2740_v60 = vsub.f32 1.0, %v2739_v57  ;;  %vm2713_vm4 = vweird.f32 %v6568_v20  ;;  %v2725_v42 = vsub.f32 1.0, %v2724_v17 }
 0x3a1   : > { %9416 = vst [vmem:[#allocation15_spill] sm:$0xff] %v6714_v56  ;;  %v2666_v56 = vmul.f32 %v6631_v62, %v2665_v48  ;;  %v6755_v16 = vpop.eup %3598  ;;  %v2754_v32 = vmul.f32 %v6741_v59, %v6656_v9  ;;  %vm2669_vm1 = vweird.f32 %v6631_v62  ;;  %v2732_v17 = vand.u32 2147483647, %v6602_v34  ;;  %v2089_v48 = vpop.xlane.xlu0 %2088 }
 0x3a2   : > { %9418 = vst [vmem:[#allocation19_spill] sm:$0xff] %v6723_v47  ;;  %v2695_v47 = vsub.f32 1.0, %v2694_v0  ;;  %v2680_v0 = vsub.f32 1.0, %v2679_v40  ;;  %v9427_v40 = vld [vmem:[#allocation23_spill] sm:$0xff]  ;;  %v6778_v18 = vpop.eup %3600  ;;  %v2711_v31 = vmul.f32 %v6690_v26, %v2710_v29  ;;  %v2346_v44 = vsel %vm8687_vm8, %v2080_v7, %v6328_v53  ;;  %vm6815_vm8 = vmor %vm2668_vm3, %vm2669_vm1 }
 0x3a3   : > { %9421 = vst [vmem:[#allocation20_spill] sm:$0xff] %v6733_v1  ;;  %v2747_v1 = vand.u32 2147483647, %v6584_v4  ;;  %v2667_v27 = vadd.f32 %v6631_v62, %v2666_v56  ;;  %v6788_v51 = vpop.eup %3602  ;;  %v2734_v56 = vand.u32 2147483648, %v6602_v34  ;;  %vm2699_vm9 = vweird.f32 %v6670_v36 }
 0x3a4   : > { %9423 = vst [vmem:[#allocation18_spill] sm:$0xff] %v6747_v46  ;;  %v6762_v46 = vor.u32 1.1754944e-38, %v2749_v61  ;;  %v2696_v25 = vmul.f32 %v6670_v36, %v2695_v47  ;;  %v2086_v61 = vpop.xlane.xlu2 %2085  ;;  %vm2684_vm5 = vweird.f32 %v6680_v23  ;;  %vm6826_vm6 = vcmp.eq.f32.partialorder %v2717_v50, 8.507059e+37  ;;  %vm6867_vm3 = vmor %vm2698_vm12, %vm2699_vm9 }
 0x3a5   : > { %9424 = vst [vmem:[#allocation22_spill] sm:$0xff] %v6755_v16  ;;  %v9429_v16 = vld [vmem:[#allocation73_spill] sm:$0xff]  ;;  %v2348_v29 = vsel %vm8694_vm0, %v2086_v61, %v6328_v53  ;;  %v2726_v61 = vmul.f32 %v6706_v54, %v2725_v42  ;;  %v2755_v35 = vsub.f32 1.0, %v2754_v32  ;;  %v6835_v3 = vsel %vm8695_vm14, %v9445_v41, %v6315_v6  ;;  %vm6889_vm12 = vmor %vm2683_vm13, %vm2684_vm5 }
 0x3a6   : > { %v6776_v57 = vsel %vm8678_vm11, %v9429_v16, %v6315_v6  ;;  %9430 = vst [vmem:[#allocation23_spill] sm:$0xff] %v6778_v18  ;;  %vm6790_vm11 = vcmp.eq.f32.partialorder %v2702_v55, 8.507059e+37  ;;  %v2681_v18 = vmul.f32 %v6680_v23, %v2680_v0  ;;  %v9437_v55 = vld [vmem:[#allocation96_spill] sm:$0xff]  ;;  %v2741_v0 = vmul.f32 %v6699_v12, %v2740_v60  ;;  %v9449_v42 = vld [vmem:[#allocation77_spill] sm:$0xff]  ;;  %v9476_v60 = vld [vmem:[#allocation86_spill] sm:$0xff] }
 0x3a7   : > { %v6786_v47 = vsub.f32 %v2347_v22, %v6776_v57  ;;  %9432 = vst [vmem:[#allocation73_spill] sm:$0xff] %v6788_v51  ;;  %v6801_v22 = vpop.eup %3604  ;;  %v2697_v13 = vadd.f32 %v6670_v36, %v2696_v25  ;;  %v9446_v25 = vld [vmem:[#allocation48_spill] sm:$0xff]  ;;  %vm6841_vm1 = vcmp.eq.f32.partialorder %v2747_v1, 8.507059e+37  ;;  %v6847_v32 = vsub.f32 %v2346_v44, %v6835_v3 }
 0x3a8   : > { %9435 = vst [vmem:[#allocation145_spill] sm:$0xff] %v6801_v22  ;;  %v9440_v22 = vand.u32 2147483647, %v6551_v37  ;;  %v6853_v41 = vsel %vm8696_vm2, %v9449_v42, %v6315_v6  ;;  %v2682_v7 = vadd.f32 %v6680_v23, %v2681_v18  ;;  %v2712_v1 = vadd.f32 %v6690_v26, %v2711_v31  ;;  %v2092_v18 = vpop.xlane.xlu1 %2091 }
 0x3a9   : > { %3606 = vrcp.f32 %v6786_v47  ;;  %9450 = vst [vmem:[#allocation53_spill] sm:$0xff] %v6853_v41  ;;  %vm2744_vm2 = vweird.f32 %v6699_v12  ;;  %vm2729_vm0 = vweird.f32 %v6706_v54  ;;  %vm6874_vm7 = vcmp.eq.f32.partialorder %v2732_v17, 8.507059e+37 }
 0x3aa   : > { %vm6822_vm15 = vcmp.eq.f32.partialorder %v9440_v22, 8.507059e+37  ;;  %v2671_v22 = vsel %vm6815_vm8, %v6631_v62, %v2667_v27  ;;  %vm2714_vm8 = vweird.f32 %v6690_v26  ;;  %v6860_v62 = vsub.f32 %v2348_v29, %v6853_v41  ;;  %v9456_v29 = vld [vmem:[#allocation36_spill] sm:$0xff] }
 0x3ab   : > { %v2742_v27 = vadd.f32 %v6699_v12, %v2741_v0  ;;  %vm2187_vm14 = vcmp.gt.f32.partialorder %v9456_v29, -1.0  ;;  %v2676_v42 = vsel %vm6757_vm10, %v6694_v28, %v2671_v22  ;;  %v2701_v38 = vsel %vm6867_vm3, %v6670_v36, %v2697_v13  ;;  %vm6900_vm10 = vmor %vm2713_vm4, %vm2714_vm8  ;;  %v9474_v28 = vld [vmem:[#allocation111_spill] sm:$0xff] }
 0x3ac   : > { %v2727_v0 = vadd.f32 %v6706_v54, %v2726_v61  ;;  %v2756_v41 = vmul.f32 %v6741_v59, %v2755_v35  ;;  %vm2405_vm9 = vcmp.gt.f32.partialorder %v6538_v39, 0.0  ;;  %v2735_v36 = vor.u32 1.1754944e-38, %v2734_v56 }
 0x3ad   : > { %vm2758_vm5 = vweird.f32 %v6656_v9  ;;  %v2762_v13 = vand.u32 2147483647, %v6656_v9  ;;  %3608 = vrcp.f32 %v6847_v32  ;;  %v2686_v35 = vsel %vm6889_vm12, %v6680_v23, %v2682_v7 }
 0x3ae   : > { %v2716_v61 = vsel %vm6900_vm10, %v6690_v26, %v2712_v1  ;;  %vm9461_vm13 = vweird.f32 %v6584_v4  ;;  %3610 = vrcp.f32 %v6860_v62  ;;  %vm9464_vm3 = vcmp.lt.f32.partialorder %v9431_v63, 512.0 }
 0x3af   : > { %vm6917_vm4 = vmor %vm9461_vm13, %vm2744_vm2  ;;  %v2350_v22 = vsel %vm9464_vm3, %v2092_v18, %v6328_v53  ;;  %v6925_v44 = vpop.eup %3606  ;;  %v9465_v23 = vsub.f32 %v9410_v15, %v6498_v58  ;;  %v2706_v7 = vsel %vm6790_vm11, %v6710_v11, %v2701_v38  ;;  %vm2404_vm2 = vcmp.gt.f32.partialorder %v6551_v37, 0.0  ;;  %v9469_v15 = vld [vmem:[#allocation113_spill] sm:$0xff] }
 0x3b0   : > { %vm2406_vm8 = vcmp.gt.f32.partialorder %v6568_v20, 0.0  ;;  %v2746_v1 = vsel %vm6917_vm4, %v6699_v12, %v2742_v27  ;;  %vm9466_vm12 = vweird.f32 %v6602_v34  ;;  %vm2759_vm13 = vweird.f32 %v6741_v59  ;;  %v9470_v12 = vld [vmem:[#allocation85_spill] sm:$0xff]  ;;  %v2095_v27 = vpop.xlane.xlu2 %2094 }
 0x3b1   : > { %v2677_v26 = vmul.f32 %v2676_v42, %v9465_v23  ;;  %vm6942_vm10 = vmor %vm9466_vm12, %vm2729_vm0  ;;  %vm8702_vm11 = vcmp.lt.f32.partialorder %v9469_v15, 512.0  ;;  %vm2408_vm3 = vcmp.gt.f32.partialorder %v6584_v4, 0.0  ;;  %v2757_v11 = vadd.f32 %v6741_v59, %v2756_v41 }
 0x3b2   : > { %v2731_v38 = vsel %vm6942_vm10, %v6706_v54, %v2727_v0  ;;  %vm9471_vm4 = vcmp.gt.f32.partialorder %v9436_v24, -1.0  ;;  %vm9472_vm0 = vcmp.lt.f32.partialorder %v9437_v55, 512.0  ;;  %v2691_v42 = vsel %vm6822_vm15, %v6737_v10, %v2686_v35  ;;  %v9473_v0 = vld [vmem:[#allocation60_spill] sm:$0xff] }
 0x3b3   : > { %v6957_v58 = vsel %vm9471_vm4, %v9470_v12, %v6315_v6  ;;  %v2349_v16 = vsel %vm9472_vm0, %v2089_v48, %v6328_v53  ;;  %v2721_v54 = vsel %vm6826_vm6, %v6750_v33, %v2716_v61  ;;  %vm2407_vm12 = vcmp.gt.f32.partialorder %v6602_v34, 0.0  ;;  %v6989_v61 = vpop.eup %3608  ;;  %vm6997_vm6 = vmor %vm2758_vm5, %vm2759_vm13 }
 0x3b4   : > { %v2764_v41 = vand.u32 2147483648, %v6656_v9  ;;  %v6971_v17 = vsub.f32 %v2350_v22, %v6957_v58  ;;  %vm8740_vm10 = vcmp.gt.f32.partialorder %v9473_v0, -1.0  ;;  %vm8703_vm4 = vcmp.lt.f32.partialorder %v9474_v28, 512.0  ;;  %v7011_v31 = vpop.eup %3610 }
 0x3b5   : > { %v9475_v48 = vsub.f32 %v9411_v49, %v6531_v43  ;;  %v2751_v10 = vsel %vm6841_vm1, %v6762_v46, %v2746_v1  ;;  %v2784_v33 = vmul.f32 %v6925_v44, %v6786_v47  ;;  %vm9477_vm15 = vcmp.gt.f32.partialorder %v9446_v25, -1.0 }
 0x3b6   : > { %v6987_v35 = vsel %vm9477_vm15, %v9476_v60, %v6315_v6  ;;  %v2736_v56 = vsel %vm6874_vm7, %v2735_v36, %v2731_v38  ;;  %vm7001_vm1 = vcmp.eq.f32.partialorder %v2762_v13, 8.507059e+37  ;;  %vm9482_vm0 = vcmp.lt.f32.partialorder %v9451_v14, 512.0  ;;  %v9483_v36 = vld [vmem:[#allocation55_spill] sm:$0xff]  ;;  %v9488_v38 = vld [vmem:[#allocation112_spill] sm:$0xff]  ;;  %v9499_v60 = vld [vmem:[#allocation21_spill] sm:$0xff] }
 0x3b7   : > { %v2707_v51 = vmul.f32 %v2706_v7, %v9475_v48  ;;  %v7006_v49 = vsub.f32 %v2349_v16, %v6987_v35  ;;  %v2351_v50 = vsel %vm9482_vm0, %v2095_v27, %v6328_v53  ;;  %vm2188_vm7 = vcmp.gt.f32.partialorder %v9483_v36, -1.0  ;;  %v9493_v16 = vld [vmem:[#allocation39_spill] sm:$0xff] }
 0x3b8   : > { %vm9484_vm5 = vcmp.gt.f32.partialorder %v6506_v52, 0.0  ;;  %v9486_v13 = vsub.f32 %v9413_v30, %v6544_v8  ;;  %v9487_v7 = vsub.f32 %v9415_v5, %v6557_v19  ;;  %v2761_v18 = vsel %vm6997_vm6, %v6741_v59, %v2757_v11  ;;  %v9490_v30 = vld [vmem:[#allocation82_spill] sm:$0xff]  ;;  %v2101_v11 = vpop.xlane.xlu1 %2100 }
 0x3b9   : > { %v7016_v22 = vsel %vm9484_vm5, %v2677_v26, 0.0  ;;  %vm8701_vm13 = vcmp.lt.f32.partialorder %v9488_v38, 512.0  ;;  %v9489_v12 = vsub.f32 %v9420_v45, %v6574_v2  ;;  %vm2409_vm15 = vcmp.gt.f32.partialorder %v6656_v9, 0.0 }
 0x3ba   : > { %9485 = vst [vmem:[#allocation74_spill] sm:$0xff] %v7016_v22  ;;  %v2692_v23 = vmul.f32 %v2691_v42, %v9486_v13  ;;  %v2722_v1 = vmul.f32 %v2721_v54, %v9487_v7  ;;  %v2765_v26 = vor.u32 1.1754944e-38, %v2764_v41  ;;  %3612 = vrcp.f32 %v6971_v17  ;;  %v9496_v54 = vld [vmem:[#allocation25_spill] sm:$0xff]  ;;  %v9502_v7 = vld [vmem:[#allocation83_spill] sm:$0xff] }
 0x3bb   : > { %v2752_v52 = vmul.f32 %v2751_v10, %v9489_v12  ;;  %v7037_v8 = vsel %vm2187_vm14, %v9490_v30, %v6315_v6  ;;  %v7041_v59 = vsel %vm2405_vm9, %v2707_v51, 0.0  ;;  %v9492_v5 = vsub.f32 %v9427_v40, %v6590_v21  ;;  %v2098_v51 = vpop.xlane.xlu0 %2097  ;;  %v9504_v30 = vld [vmem:[#allocation53_spill] sm:$0xff] }
 0x3bc   : > { %9491 = vst [vmem:[#allocation48_spill] sm:$0xff] %v7041_v59  ;;  %v2785_v2 = vsub.f32 1.0, %v2784_v33  ;;  %v7047_v45 = vsub.f32 %v2351_v50, %v7037_v8  ;;  %vm8739_vm6 = vcmp.gt.f32.partialorder %v9493_v16, -1.0  ;;  %v2766_v27 = vsel %vm7001_vm1, %v2765_v26, %v2761_v18  ;;  %v2104_v18 = vpop.xlane.xlu2 %2103  ;;  %v9696_v59 = vld [vmem:[#allocation3_spill] sm:$0xff]  ;;  %v9704_v22 = vld [vmem:[#allocation145_spill] sm:$0xff] }
 0x3bd   : > { %v2737_v19 = vmul.f32 %v2736_v56, %v9492_v5  ;;  %v2769_v42 = vmul.f32 %v6989_v61, %v6847_v32  ;;  %v2799_v39 = vmul.f32 %v7011_v31, %v6860_v62  ;;  %3614 = vrcp.f32 %v7006_v49  ;;  %v9500_v56 = vld [vmem:[#allocation119_spill] sm:$0xff]  ;;  %v9505_v5 = vld [vmem:[#allocation24_spill] sm:$0xff] }
 0x3be   : > { %v7059_v21 = vsel %vm2404_vm2, %v2692_v23, 0.0  ;;  %v7063_v40 = vsel %vm2406_vm8, %v2722_v1, 0.0  ;;  %v2794_v48 = vand.u32 2147483648, %v6786_v47  ;;  %v7070_v10 = vsel %vm2408_vm3, %v2752_v52, 0.0  ;;  %v9503_v52 = vld [vmem:[#allocation26_spill] sm:$0xff] }
 0x3bf   : > { %9494 = vst [vmem:[#allocation77_spill] sm:$0xff] %v7059_v21  ;;  %vm2788_vm9 = vweird.f32 %v6786_v47  ;;  %v2792_v37 = vand.u32 2147483647, %v6786_v47  ;;  %v2353_v20 = vsel %vm8702_vm11, %v2101_v11, %v6328_v53  ;;  %v7079_v33 = vsel %vm2407_vm12, %v2737_v19, 0.0 }
 0x3c0   : > { %9495 = vst [vmem:[#allocation36_spill] sm:$0xff] %v7063_v40  ;;  %v9501_v46 = vsub.f32 %v9499_v60, %v9500_v56  ;;  %v2786_v4 = vmul.f32 %v6925_v44, %v2785_v2  ;;  %3616 = vrcp.f32 %v7047_v45  ;;  %v7086_v50 = vpop.eup %3612  ;;  %v2770_v13 = vsub.f32 1.0, %v2769_v42 }
 0x3c1   : > { %9497 = vst [vmem:[#allocation85_spill] sm:$0xff] %v7070_v10  ;;  %v2800_v23 = vsub.f32 1.0, %v2799_v39  ;;  %v7092_v1 = vsel %vm8740_vm10, %v9502_v7, %v6315_v6  ;;  %v2352_v34 = vsel %vm8703_vm4, %v2098_v51, %v6328_v53  ;;  %v2795_v12 = vor.u32 1.1754944e-38, %v2794_v48  ;;  %v9509_v51 = vld [vmem:[#allocation88_spill] sm:$0xff]  ;;  %v9511_v7 = vld [vmem:[#allocation41_spill] sm:$0xff] }
 0x3c2   : > { %9498 = vst [vmem:[#allocation86_spill] sm:$0xff] %v7079_v33  ;;  %v2767_v43 = vmul.f32 %v2766_v27, %v9501_v46  ;;  %v7102_v2 = vsub.f32 %v2353_v20, %v7092_v1  ;;  %v9506_v27 = vld [vmem:[#allocation115_spill] sm:$0xff]  ;;  %vm7107_vm8 = vcmp.eq.f32.partialorder %v2792_v37, 8.507059e+37  ;;  %vm2773_vm3 = vweird.f32 %v6847_v32  ;;  %v9520_v33 = vld [vmem:[#allocation62_spill] sm:$0xff] }
 0x3c3   : > { %v7104_v11 = vpop.eup %3614  ;;  %vm8712_vm2 = vcmp.lt.f32.partialorder %v9506_v27, 512.0  ;;  %v2777_v39 = vand.u32 2147483647, %v6847_v32  ;;  %v2779_v48 = vand.u32 2147483648, %v6847_v32  ;;  %v7118_v20 = vsel %vm2188_vm7, %v9509_v51, %v6315_v6  ;;  %v9529_v27 = vld [vmem:[#allocation27_spill] sm:$0xff] }
 0x3c4   : > { %v7122_v60 = vsel %vm2409_vm15, %v2767_v43, 0.0  ;;  %v2829_v37 = vmul.f32 %v7086_v50, %v6971_v17  ;;  %v7127_v56 = vsub.f32 %v2352_v34, %v7118_v20  ;;  %v2354_v46 = vsel %vm8701_vm13, %v2104_v18, %v6328_v53  ;;  %v9512_v18 = vld [vmem:[#allocation54_spill] sm:$0xff]  ;;  %v2127_v63 = vpop.xlane.xlu2 %2126 }
 0x3c5   : > { %9510 = vst [vmem:[#allocation55_spill] sm:$0xff] %v7122_v60  ;;  %vm8737_vm12 = vcmp.gt.f32.partialorder %v9511_v7, -1.0  ;;  %v2787_v19 = vadd.f32 %v6925_v44, %v2786_v4  ;;  %vm2789_vm1 = vweird.f32 %v6925_v44  ;;  %v2771_v9 = vmul.f32 %v6989_v61, %v2770_v13  ;;  %v2110_v60 = vpop.xlane.xlu1 %2109  ;;  %v9657_v7 = vld [vmem:[#allocation143_spill] sm:$0xff] }
 0x3c6   : > { %v2801_v43 = vmul.f32 %v7011_v31, %v2800_v23  ;;  %v7137_v51 = vpop.eup %3616  ;;  %v2807_v26 = vand.u32 2147483647, %v6860_v62  ;;  %v2814_v34 = vmul.f32 %v7104_v11, %v7006_v49  ;;  %3618 = vrcp.f32 %v7102_v2  ;;  %vm7160_vm15 = vmor %vm2788_vm9, %vm2789_vm1 }
 0x3c7   : > { %v7147_v4 = vsel %vm8739_vm6, %v9512_v18, %v6315_v6  ;;  %vm7149_vm0 = vcmp.eq.f32.partialorder %v2777_v39, 8.507059e+37  ;;  %vm2803_vm5 = vweird.f32 %v6860_v62  ;;  %v2809_v13 = vand.u32 2147483648, %v6860_v62  ;;  %v9517_v18 = vld [vmem:[#allocation114_spill] sm:$0xff] }
 0x3c8   : > { %v7156_v23 = vsub.f32 %v2354_v46, %v7147_v4  ;;  %vm2774_vm13 = vweird.f32 %v6989_v61  ;;  %vm2804_vm11 = vweird.f32 %v7011_v31  ;;  %v2830_v39 = vsub.f32 1.0, %v2829_v37 }
 0x3c9   : > { %3620 = vrcp.f32 %v7127_v56  ;;  %vm8713_vm4 = vcmp.lt.f32.partialorder %v9517_v18, 512.0  ;;  %v2791_v46 = vsel %vm7160_vm15, %v6925_v44, %v2787_v19  ;;  %v2772_v15 = vadd.f32 %v6989_v61, %v2771_v9  ;;  %vm7185_vm15 = vmor %vm2773_vm3, %vm2774_vm13  ;;  %v9523_v19 = vld [vmem:[#allocation28_spill] sm:$0xff]  ;;  %v2107_v44 = vpop.xlane.xlu0 %2106  ;;  %v9636_v18 = vld [vmem:[#allocation43_spill] sm:$0xff] }
 0x3ca   : > { %v2802_v28 = vadd.f32 %v7011_v31, %v2801_v43  ;;  %v2844_v14 = vmul.f32 %v7137_v51, %v7047_v45  ;;  %v2780_v16 = vor.u32 1.1754944e-38, %v2779_v48  ;;  %vm7175_vm9 = vcmp.eq.f32.partialorder %v2807_v26, 8.507059e+37  ;;  %vm7201_vm13 = vmor %vm2803_vm5, %vm2804_vm11  ;;  %v9526_v26 = vld [vmem:[#allocation29_spill] sm:$0xff] }
 0x3cb   : > { %v2837_v37 = vand.u32 2147483647, %v6971_v17  ;;  %v2815_v0 = vsub.f32 1.0, %v2814_v34  ;;  %vm8738_vm1 = vcmp.gt.f32.partialorder %v9520_v33, -1.0  ;;  %v2810_v38 = vor.u32 1.1754944e-38, %v2809_v13 }
 0x3cc   : > { %v2839_v48 = vand.u32 2147483648, %v6971_v17  ;;  %3622 = vrcp.f32 %v7156_v23  ;;  %v7193_v9 = vpop.eup %3618  ;;  %v2796_v43 = vsel %vm7107_vm8, %v2795_v12, %v2791_v46  ;;  %v2831_v13 = vmul.f32 %v7086_v50, %v2830_v39 }
 0x3cd   : > { %v2356_v40 = vsel %vm8712_vm2, %v2110_v60, %v6328_v53  ;;  %vm2411_vm3 = vcmp.gt.f32.partialorder %v6786_v47, 0.0  ;;  %v2776_v12 = vsel %vm7185_vm15, %v6989_v61, %v2772_v15  ;;  %v2806_v42 = vsel %vm7201_vm13, %v7011_v31, %v2802_v28  ;;  %v9530_v15 = vld [vmem:[#allocation63_spill] sm:$0xff] }
 0x3ce   : > { %vm2833_vm11 = vweird.f32 %v6971_v17  ;;  %v2845_v39 = vsub.f32 1.0, %v2844_v14  ;;  %vm7221_vm8 = vcmp.eq.f32.partialorder %v2837_v37, 8.507059e+37  ;;  %v2816_v60 = vmul.f32 %v7104_v11, %v2815_v0 }
 0x3cf   : > { %v7219_v46 = vpop.eup %3620  ;;  %v2447_v55 = vsub.f32 %v9529_v27, %v7037_v8  ;;  %v7232_v61 = vsel %vm8737_vm12, %v9530_v15, %v6315_v6  ;;  %v9531_v14 = vsub.f32 %v9496_v54, %v6776_v57  ;;  %vm2410_vm5 = vcmp.gt.f32.partialorder %v6847_v32, 0.0 }
 0x3d0   : > { %vm2412_vm15 = vcmp.gt.f32.partialorder %v6860_v62, 0.0  ;;  %v2840_v31 = vor.u32 1.1754944e-38, %v2839_v48  ;;  %v2874_v0 = vmul.f32 %v7193_v9, %v7102_v2  ;;  %v7242_v37 = vsub.f32 %v2356_v40, %v7232_v61 }
 0x3d1   : > { %v2797_v28 = vmul.f32 %v2796_v43, %v9531_v14  ;;  %v2781_v34 = vsel %vm7149_vm0, %v2780_v16, %v2776_v12  ;;  %v2811_v15 = vsel %vm7175_vm9, %v2810_v38, %v2806_v42  ;;  %v2832_v57 = vadd.f32 %v7086_v50, %v2831_v13 }
 0x3d2   : > { %9532 = vst [vmem:[#allocation82_spill] sm:$0xff] %v7242_v37  ;;  %vm2834_vm13 = vweird.f32 %v7086_v50  ;;  %v7250_v54 = vpop.eup %3622  ;;  %vm2818_vm2 = vweird.f32 %v7006_v49  ;;  %v2822_v48 = vand.u32 2147483647, %v7006_v49  ;;  %v2846_v40 = vmul.f32 %v7137_v51, %v2845_v39 }
 0x3d3   : > { %v2859_v43 = vmul.f32 %v7219_v46, %v7127_v56  ;;  %v2817_v16 = vadd.f32 %v7104_v11, %v2816_v60  ;;  %vm2819_vm0 = vweird.f32 %v7104_v11  ;;  %v2824_v41 = vand.u32 2147483648, %v7006_v49  ;;  %vm7271_vm9 = vmor %vm2833_vm11, %vm2834_vm13 }
 0x3d4   : > { %v2355_v10 = vsel %vm8713_vm4, %v2107_v44, %v6328_v53  ;;  %v9533_v38 = vsub.f32 %v9503_v52, %v6835_v3  ;;  %v9534_v12 = vsub.f32 %v9505_v5, %v9504_v30  ;;  %v2875_v60 = vsub.f32 1.0, %v2874_v0  ;;  %v9537_v30 = vld [vmem:[#allocation64_spill] sm:$0xff]  ;;  %vm7291_vm13 = vmor %vm2818_vm2, %vm2819_vm0 }
 0x3d5   : > { %3624 = vrcp.f32 %v7242_v37  ;;  %v2836_v53 = vsel %vm7271_vm9, %v7086_v50, %v2832_v57  ;;  %v2852_v3 = vand.u32 2147483647, %v7047_v45  ;;  %v2889_v52 = vmul.f32 %v7250_v54, %v7156_v23 }
 0x3d6   : > { %v2782_v13 = vmul.f32 %v2781_v34, %v9533_v38  ;;  %v2812_v42 = vmul.f32 %v2811_v15, %v9534_v12  ;;  %v7286_v5 = vsel %vm8738_vm1, %v9537_v30, %v6315_v6  ;;  %vm2414_vm11 = vcmp.gt.f32.partialorder %v6971_v17, 0.0 }
 0x3d7   : > { %v2847_v50 = vadd.f32 %v7137_v51, %v2846_v40  ;;  %vm2849_vm9 = vweird.f32 %v7137_v51  ;;  %v2860_v0 = vsub.f32 1.0, %v2859_v43  ;;  %v7298_v44 = vsub.f32 %v2355_v10, %v7286_v5 }
 0x3d8   : > { %v7302_v6 = vsel %vm2411_vm3, %v2797_v28, 0.0  ;;  %v2821_v34 = vsel %vm7291_vm13, %v7104_v11, %v2817_v16  ;;  %vm2823_vm2 = vcmp.eq.f32.partialorder %v2822_v48, 8.507059e+37  ;;  %v2854_v15 = vand.u32 2147483648, %v7047_v45  ;;  %v9574_v28 = vld [vmem:[#allocation102_spill] sm:$0xff] }
 0x3d9   : > { %9540 = vst [vmem:[#allocation25_spill] sm:$0xff] %v7298_v44  ;;  %v2841_v57 = vsel %vm7221_vm8, %v2840_v31, %v2836_v53  ;;  %vm2413_vm0 = vcmp.gt.f32.partialorder %v7006_v49, 0.0  ;;  %v2825_v40 = vor.u32 1.1754944e-38, %v2824_v41  ;;  %vm2848_vm4 = vweird.f32 %v7047_v45 }
 0x3da   : > { %9541 = vst [vmem:[#allocation21_spill] sm:$0xff] %v7302_v6  ;;  %v2876_v43 = vmul.f32 %v7193_v9, %v2875_v60  ;;  %v7315_v47 = vsel %vm2410_vm5, %v2782_v13, 0.0  ;;  %v7319_v11 = vsel %vm2412_vm15, %v2812_v42, 0.0  ;;  %vm7321_vm3 = vmor %vm2848_vm4, %vm2849_vm9  ;;  %vm7325_vm8 = vcmp.eq.f32.partialorder %v2852_v3, 8.507059e+37  ;;  %v9549_v42 = vld [vmem:[#allocation31_spill] sm:$0xff]  ;;  %v9550_v60 = vld [vmem:[#allocation32_spill] sm:$0xff] }
 0x3db   : > { %9542 = vst [vmem:[#allocation119_spill] sm:$0xff] %v7315_v47  ;;  %v2890_v31 = vsub.f32 1.0, %v2889_v52  ;;  %v7329_v48 = vpop.eup %3624  ;;  %v2826_v16 = vsel %vm2823_vm2, %v2825_v40, %v2821_v34  ;;  %v2851_v32 = vsel %vm7321_vm3, %v7137_v51, %v2847_v50  ;;  %v2861_v62 = vmul.f32 %v7219_v46, %v2860_v0  ;;  %v9658_v6 = vld [vmem:[#allocation120_spill] sm:$0xff] }
 0x3dc   : > { %9543 = vst [vmem:[#allocation83_spill] sm:$0xff] %v7319_v11  ;;  %3626 = vrcp.f32 %v7298_v44  ;;  %v9548_v41 = vsub.f32 %v9523_v19, %v6957_v58  ;;  %vm2415_vm4 = vcmp.gt.f32.partialorder %v7047_v45, 0.0  ;;  %v2855_v38 = vor.u32 1.1754944e-38, %v2854_v15 }
 0x3dd   : > { %v2882_v13 = vand.u32 2147483647, %v7102_v2  ;;  %v2884_v12 = vand.u32 2147483648, %v7102_v2  ;;  %v2449_v39 = vsub.f32 %v9549_v42, %v7092_v1  ;;  %v2877_v51 = vadd.f32 %v7193_v9, %v2876_v43 }
 0x3de   : > { %v2842_v10 = vmul.f32 %v2841_v57, %v9548_v41  ;;  %vm2879_vm5 = vweird.f32 %v7193_v9  ;;  %v2448_v53 = vsub.f32 %v9550_v60, %v7118_v20  ;;  %v9551_v58 = vsub.f32 %v9526_v26, %v6987_v35  ;;  %v9557_v57 = vld [vmem:[#allocation30_spill] sm:$0xff]  ;;  %v9570_v26 = vld [vmem:[#allocation37_spill] sm:$0xff] }
 0x3df   : > { %v2856_v3 = vsel %vm7325_vm8, %v2855_v38, %v2851_v32  ;;  %v2891_v52 = vmul.f32 %v7250_v54, %v2890_v31  ;;  %v2919_v30 = vmul.f32 %v7329_v48, %v7242_v37  ;;  %vm2878_vm15 = vweird.f32 %v7102_v2  ;;  %v9564_v41 = vld [vmem:[#allocation34_spill] sm:$0xff] }
 0x3e0   : > { %v2827_v19 = vmul.f32 %v2826_v16, %v9551_v58  ;;  %v2862_v1 = vadd.f32 %v7219_v46, %v2861_v62  ;;  %vm2864_vm13 = vweird.f32 %v7219_v46  ;;  %v2869_v20 = vand.u32 2147483648, %v7127_v56  ;;  %vm7364_vm9 = vmor %vm2878_vm15, %vm2879_vm5  ;;  %v9585_v62 = vld [vmem:[#allocation139_spill] sm:$0xff] }
 0x3e1   : > { %v7362_v35 = vsel %vm2414_vm11, %v2842_v10, 0.0  ;;  %vm7368_vm2 = vcmp.eq.f32.partialorder %v2882_v13, 8.507059e+37  ;;  %v2885_v50 = vor.u32 1.1754944e-38, %v2884_v12  ;;  %vm2863_vm3 = vweird.f32 %v7127_v56  ;;  %v9619_v10 = vld [vmem:[#allocation69_spill] sm:$0xff] }
 0x3e2   : > { %9552 = vst [vmem:[#allocation26_spill] sm:$0xff] %v7362_v35  ;;  %v7373_v0 = vpop.eup %3626  ;;  %v2857_v34 = vmul.f32 %v2856_v3, %v2447_v55  ;;  %v2881_v17 = vsel %vm7364_vm9, %v7193_v9, %v2877_v51  ;;  %v2867_v15 = vand.u32 2147483647, %v7127_v56  ;;  %v2450_v40 = vsub.f32 %v9557_v57, %v7147_v4  ;;  %vm7389_vm8 = vmor %vm2863_vm3, %vm2864_vm13  ;;  %v9568_v3 = vld [vmem:[#allocation35_spill] sm:$0xff] }
 0x3e3   : > { %v7386_v43 = vsel %vm2413_vm0, %v2827_v19, 0.0  ;;  %vm2417_vm11 = vcmp.gt.f32.partialorder %v7102_v2, 0.0  ;;  %v2892_v55 = vadd.f32 %v7250_v54, %v2891_v52  ;;  %vm2894_vm5 = vweird.f32 %v7250_v54  ;;  %v9578_v2 = vld [vmem:[#allocation46_spill] sm:$0xff] }
 0x3e4   : > { %9558 = vst [vmem:[#allocation53_spill] sm:$0xff] %v7386_v43  ;;  %v2920_v8 = vsub.f32 1.0, %v2919_v30  ;;  %v2866_v27 = vsel %vm7389_vm8, %v7219_v46, %v2862_v1  ;;  %v2870_v4 = vor.u32 1.1754944e-38, %v2869_v20  ;;  %v2897_v49 = vand.u32 2147483647, %v7156_v23  ;;  %v9639_v43 = vld [vmem:[#allocation108_spill] sm:$0xff] }
 0x3e5   : > { %v2899_v9 = vand.u32 2147483648, %v7156_v23  ;;  %v2886_v31 = vsel %vm7368_vm2, %v2885_v50, %v2881_v17  ;;  %vm2416_vm0 = vcmp.gt.f32.partialorder %v7127_v56, 0.0  ;;  %vm2893_vm15 = vweird.f32 %v7156_v23  ;;  %v9571_v17 = vld [vmem:[#allocation99_spill] sm:$0xff] }
 0x3e6   : > { %v2927_v16 = vand.u32 2147483647, %v7242_v37  ;;  %v2904_v32 = vmul.f32 %v7373_v0, %v7298_v44  ;;  %v7409_v46 = vsel %vm2415_vm4, %v2857_v34, 0.0  ;;  %vm2868_vm13 = vcmp.eq.f32.partialorder %v2867_v15, 8.507059e+37  ;;  %vm7411_vm9 = vmor %vm2893_vm15, %vm2894_vm5 }
 0x3e7   : > { %9561 = vst [vmem:[#allocation24_spill] sm:$0xff] %v7409_v46  ;;  %v2929_v38 = vand.u32 2147483648, %v7242_v37  ;;  %v2871_v13 = vsel %vm2868_vm13, %v2870_v4, %v2866_v27  ;;  %v2896_v12 = vsel %vm7411_vm9, %v7250_v54, %v2892_v55  ;;  %v2921_v42 = vmul.f32 %v7329_v48, %v2920_v8  ;;  %v9576_v8 = vld [vmem:[#allocation47_spill] sm:$0xff] }
 0x3e8   : > { %v7422_v45 = vperm.slane %v2127_v63, 0  ;;  %v2887_v51 = vmul.f32 %v2886_v31, %v2449_v39  ;;  %vm2418_vm4 = vcmp.gt.f32.partialorder %v7156_v23, 0.0  ;;  %vm2898_vm2 = vcmp.eq.f32.partialorder %v2897_v49, 8.507059e+37  ;;  %v9569_v39 = vld [vmem:[#allocation138_spill] sm:$0xff] }
 0x3e9   : > { %v2900_v60 = vor.u32 1.1754944e-38, %v2899_v9  ;;  %v2914_v58 = vand.u32 2147483648, %v7298_v44  ;;  %vm2923_vm3 = vweird.f32 %v7242_v37  ;;  %vm7427_vm8 = vcmp.eq.f32.partialorder %v2927_v16, 8.507059e+37  ;;  %v9580_v63 = vld [vmem:[#allocation38_spill] sm:$0xff] }
 0x3ea   : > { %9565 = vst [vmem:[#allocation88_spill] sm:$0xff] %v7422_v45  ;;  %v2905_v52 = vsub.f32 1.0, %v2904_v32  ;;  %v2872_v30 = vmul.f32 %v2871_v13, %v2448_v53  ;;  %v2930_v20 = vor.u32 1.1754944e-38, %v2929_v38  ;;  %v2454_v14 = vmul.f32 %v9570_v26, %v9569_v39  ;;  %v9586_v38 = vld [vmem:[#allocation66_spill] sm:$0xff] }
 0x3eb   : > { %v2901_v1 = vsel %vm2898_vm2, %v2900_v60, %v2896_v12  ;;  %v2922_v50 = vadd.f32 %v7329_v48, %v2921_v42  ;;  %vm2924_vm5 = vweird.f32 %v7329_v48  ;;  %vm2908_vm15 = vweird.f32 %v7298_v44  ;;  %v9589_v42 = vld [vmem:[#allocation51_spill] sm:$0xff]  ;;  %v9591_v60 = vld [vmem:[#allocation52_spill] sm:$0xff]  ;;  %v9609_v23 = vld [vmem:[#allocation50_spill] sm:$0xff] }
 0x3ec   : > { %v2912_v34 = vand.u32 2147483647, %v7298_v44  ;;  %vm9572_vm13 = vcmp.gt.f32.partialorder %v9571_v17, -1.0  ;;  %v7447_v53 = vsel %vm2417_vm11, %v2887_v51, 0.0  ;;  %v2915_v57 = vor.u32 1.1754944e-38, %v2914_v58  ;;  %v9695_v44 = vld [vmem:[#allocation23_spill] sm:$0xff] }
 0x3ed   : > { %v7443_v15 = vsel %vm9572_vm13, %v9571_v17, %v7422_v45  ;;  %9573 = vst [vmem:[#allocation54_spill] sm:$0xff] %v7447_v53  ;;  %vm9575_vm9 = vcmp.gt.f32.partialorder %v9574_v28, -1.0  ;;  %vm9577_vm2 = vcmp.gt.f32.partialorder %v9576_v8, -1.0  ;;  %v2902_v4 = vmul.f32 %v2901_v1, %v2450_v40  ;;  %v9599_v17 = vld [vmem:[#allocation59_spill] sm:$0xff] }
 0x3ee   : > { %v7453_v55 = vsel %vm9575_vm9, %v9574_v28, %v7422_v45  ;;  %v7459_v27 = vsel %vm9577_vm2, %v9576_v8, %v7422_v45  ;;  %v2906_v49 = vmul.f32 %v7373_v0, %v2905_v52  ;;  %vm9579_vm11 = vcmp.gt.f32.partialorder %v9578_v2, -1.0  ;;  %vm7480_vm9 = vmor %vm2923_vm3, %vm2924_vm5  ;;  %v9593_v52 = vld [vmem:[#allocation140_spill] sm:$0xff]  ;;  %v9601_v8 = vld [vmem:[#allocation42_spill] sm:$0xff] }
 0x3ef   : > { %v7466_v9 = vsel %vm9579_vm11, %v9578_v2, %v7422_v45  ;;  %vm9581_vm13 = vcmp.gt.f32.partialorder %v9580_v63, -1.0  ;;  %v7476_v16 = vsel %vm2416_vm0, %v2872_v30, 0.0  ;;  %vm2909_vm2 = vweird.f32 %v7373_v0  ;;  %v9594_v30 = vld [vmem:[#allocation68_spill] sm:$0xff] }
 0x3f0   : > { %v7472_v31 = vsel %vm9581_vm13, %v9580_v63, %v7422_v45  ;;  %9582 = vst [vmem:[#allocation28_spill] sm:$0xff] %v7476_v16  ;;  %v2455_v32 = vsub.f32 1.0, %v2454_v14  ;;  %v2469_v13 = vmul.f32 %v9586_v38, %v9585_v62  ;;  %v2926_v12 = vsel %vm7480_vm9, %v7329_v48, %v2922_v50  ;;  %v9595_v48 = vld [vmem:[#allocation40_spill] sm:$0xff]  ;;  %v9597_v50 = vld [vmem:[#allocation58_spill] sm:$0xff]  ;;  %v9631_v16 = vld [vmem:[#allocation61_spill] sm:$0xff] }
 0x3f1   : > { %vm7490_vm11 = vcmp.eq.f32.partialorder %v2912_v34, 8.507059e+37  ;;  %vm9590_vm0 = vcmp.gt.f32.partialorder %v9589_v42, -1.0  ;;  %vm9592_vm3 = vcmp.gt.f32.partialorder %v9591_v60, -1.0  ;;  %v2484_v1 = vmul.f32 %v9594_v30, %v9593_v52 }
 0x3f2   : > { %v7498_v51 = vsel %vm9590_vm0, %v9589_v42, %v7422_v45  ;;  %v7504_v58 = vsel %vm9592_vm3, %v9591_v60, %v7422_v45  ;;  %vm9596_vm5 = vcmp.gt.f32.partialorder %v9595_v48, -1.0  ;;  %vm9598_vm13 = vcmp.gt.f32.partialorder %v9597_v50, -1.0  ;;  %v9604_v42 = vld [vmem:[#allocation65_spill] sm:$0xff] }
 0x3f3   : > { %v7512_v14 = vsel %vm9596_vm5, %v9595_v48, %v7422_v45  ;;  %v7518_v34 = vsel %vm9598_vm13, %v9597_v50, %v7422_v45  ;;  %vm9600_vm9 = vcmp.gt.f32.partialorder %v9599_v17, -1.0  ;;  %vm9602_vm0 = vcmp.gt.f32.partialorder %v9601_v8, -1.0  ;;  %v9606_v48 = vld [vmem:[#allocation67_spill] sm:$0xff] }
 0x3f4   : > { %v7524_v28 = vsel %vm9600_vm9, %v9599_v17, %v7422_v45  ;;  %v7530_v2 = vsel %vm9602_vm0, %v9601_v8, %v7422_v45  ;;  %v7534_v63 = vsel %vm2418_vm4, %v2902_v4, 0.0  ;;  %v2907_v40 = vadd.f32 %v7373_v0, %v2906_v49 }
 0x3f5   : > { %9603 = vst [vmem:[#allocation29_spill] sm:$0xff] %v7534_v63  ;;  %vm9605_vm3 = vcmp.gt.f32.partialorder %v9604_v42, -1.0  ;;  %vm9607_vm5 = vcmp.gt.f32.partialorder %v9606_v48, -1.0  ;;  %v2931_v17 = vsel %vm7427_vm8, %v2930_v20, %v2926_v12  ;;  %vm9610_vm4 = vcmp.gt.f32.partialorder %v9609_v23, -1.0  ;;  %v9618_v12 = vld [vmem:[#allocation141_spill] sm:$0xff]  ;;  %vm7576_vm8 = vmor %vm2908_vm15, %vm2909_vm2  ;;  %v9628_v63 = vld [vmem:[#allocation76_spill] sm:$0xff] }
 0x3f6   : > { %v7541_v60 = vsel %vm9605_vm3, %v9604_v42, %v7422_v45  ;;  %v7547_v50 = vsel %vm9607_vm5, %v9606_v48, %v7422_v45  ;;  %v7555_v4 = vsel %vm9610_vm4, %v9609_v23, %v7422_v45  ;;  %v2456_v49 = vmul.f32 %v9570_v26, %v2455_v32  ;;  %v9612_v42 = vld [vmem:[#allocation106_spill] sm:$0xff]  ;;  %v9615_v48 = vld [vmem:[#allocation105_spill] sm:$0xff] }
 0x3f7   : > { %9608 = vst [vmem:[#allocation27_spill] sm:$0xff] %v7547_v50  ;;  %v2470_v8 = vsub.f32 1.0, %v2469_v13  ;;  %vm9613_vm13 = vcmp.gt.f32.partialorder %v9612_v42, -1.0  ;;  %vm9616_vm9 = vcmp.gt.f32.partialorder %v9615_v48, -1.0  ;;  %v2485_v20 = vsub.f32 1.0, %v2484_v1  ;;  %v9622_v13 = vld [vmem:[#allocation56_spill] sm:$0xff] }
 0x3f8   : > { %9611 = vst [vmem:[#allocation63_spill] sm:$0xff] %v7555_v4  ;;  %v7562_v54 = vsel %vm9613_vm13, %v9612_v42, %v7422_v45  ;;  %v7568_v19 = vsel %vm9616_vm9, %v9615_v48, %v7422_v45  ;;  %v2499_v23 = vmul.f32 %v9619_v10, %v9618_v12  ;;  %vm9623_vm0 = vcmp.gt.f32.partialorder %v9622_v13, -1.0  ;;  %v9625_v48 = vld [vmem:[#allocation107_spill] sm:$0xff] }
 0x3f9   : > { %9614 = vst [vmem:[#allocation64_spill] sm:$0xff] %v7562_v54  ;;  %v7584_v42 = vsel %vm9623_vm0, %v9622_v13, %v7422_v45  ;;  %vm9626_vm3 = vcmp.gt.f32.partialorder %v9625_v48, -1.0  ;;  %vm9629_vm5 = vcmp.gt.f32.partialorder %v9628_v63, -1.0  ;;  %vm9632_vm15 = vcmp.gt.f32.partialorder %v9631_v16, -1.0 }
 0x3fa   : > { %9617 = vst [vmem:[#allocation31_spill] sm:$0xff] %v7568_v19  ;;  %v7590_v1 = vsel %vm9626_vm3, %v9625_v48, %v7422_v45  ;;  %v7596_v53 = vsel %vm9629_vm5, %v9628_v63, %v7422_v45  ;;  %v7602_v46 = vsel %vm9632_vm15, %v9631_v16, %v7422_v45  ;;  %v9634_v13 = vsub.f32 %v9564_v41, %v7232_v61  ;;  %v9642_v61 = vld [vmem:[#allocation44_spill] sm:$0xff] }
 0x3fb   : > { %9624 = vst [vmem:[#allocation32_spill] sm:$0xff] %v7584_v42  ;;  %v2911_v48 = vsel %vm7576_vm8, %v7373_v0, %v2907_v40  ;;  %vm9637_vm2 = vcmp.gt.f32.partialorder %v9636_v18, -1.0  ;;  %vm9640_vm4 = vcmp.gt.f32.partialorder %v9639_v43, -1.0  ;;  %vm9643_vm13 = vcmp.gt.f32.partialorder %v9642_v61, -1.0  ;;  %v9706_v42 = vld [vmem:[#allocation129_spill] sm:$0xff] }
 0x3fc   : > { %9627 = vst [vmem:[#allocation30_spill] sm:$0xff] %v7590_v1  ;;  %v7607_v35 = vmul.f32 %v2931_v17, %v9634_v13  ;;  %v7616_v63 = vsel %vm9637_vm2, %v9636_v18, %v7422_v45  ;;  %v7622_v16 = vsel %vm9640_vm4, %v9639_v43, %v7422_v45  ;;  %v7628_v41 = vsel %vm9643_vm13, %v9642_v61, %v7422_v45  ;;  %v9645_v18 = vld [vmem:[#allocation49_spill] sm:$0xff]  ;;  %v9648_v13 = vld [vmem:[#allocation142_spill] sm:$0xff] }
 0x3fd   : > { %9630 = vst [vmem:[#allocation34_spill] sm:$0xff] %v7596_v53  ;;  %v2457_v0 = vadd.f32 %v9570_v26, %v2456_v49  ;;  %vm2459_vm9 = vweird.f32 %v9570_v26  ;;  %v2471_v40 = vmul.f32 %v9586_v38, %v2470_v8  ;;  %vm9646_vm8 = vcmp.gt.f32.partialorder %v9645_v18, -1.0  ;;  %v9705_v1 = vld [vmem:[#allocation6_spill] sm:$0xff] }
 0x3fe   : > { %9633 = vst [vmem:[#allocation35_spill] sm:$0xff] %v7602_v46  ;;  %v7637_v17 = vsel %vm9646_vm8, %v9645_v18, %v7422_v45  ;;  %v2486_v43 = vmul.f32 %v9594_v30, %v2485_v20  ;;  %v2500_v32 = vsub.f32 1.0, %v2499_v23  ;;  %v2916_v61 = vsel %vm7490_vm11, %v2915_v57, %v2911_v48 }
 0x3ff   : > { %9635 = vst [vmem:[#allocation138_spill] sm:$0xff] %v7607_v35  ;;  %v9649_v35 = vld [vmem:[#allocation118_spill] sm:$0xff]  ;;  %vm9650_vm0 = vcmp.gt.f32.partialorder %v9446_v25, -1.0  ;;  %vm2458_vm3 = vweird.f32 %v9569_v39  ;;  %v2464_v8 = vand.u32 2147483648, %v9569_v39  ;;  %vm9652_vm5 = vcmp.gt.f32.partialorder %v9436_v24, -1.0 }
 0x400   : > { %9638 = vst [vmem:[#allocation37_spill] sm:$0xff] %v7616_v63  ;;  %v2514_v11 = vmul.f32 %v9649_v35, %v9648_v13  ;;  %v7648_v49 = vsel %vm9650_vm0, %v9446_v25, %v7422_v45  ;;  %v7656_v20 = vsel %vm9652_vm5, %v9436_v24, %v7422_v45  ;;  %v7662_v57 = vsel %vm2187_vm14, %v9456_v29, %v7422_v45  ;;  %vm7664_vm11 = vmor %vm2458_vm3, %vm2459_vm9 }
 0x401   : > { %9641 = vst [vmem:[#allocation99_spill] sm:$0xff] %v7622_v16  ;;  %v2462_v25 = vand.u32 2147483647, %v9569_v39  ;;  %vm2474_vm15 = vweird.f32 %v9586_v38  ;;  %v2461_v23 = vsel %vm7664_vm11, %v9570_v26, %v2457_v0  ;;  %v2472_v24 = vadd.f32 %v9586_v38, %v2471_v40 }
 0x402   : > { %9644 = vst [vmem:[#allocation102_spill] sm:$0xff] %v7628_v41  ;;  %v2479_v48 = vand.u32 2147483648, %v9585_v62  ;;  %vm2489_vm2 = vweird.f32 %v9594_v30  ;;  %v2487_v29 = vadd.f32 %v9594_v30, %v2486_v43  ;;  %v2501_v18 = vmul.f32 %v9619_v10, %v2500_v32 }
 0x403   : > { %9647 = vst [vmem:[#allocation47_spill] sm:$0xff] %v7637_v17  ;;  %v2529_v33 = vmul.f32 %v9658_v6, %v9657_v7  ;;  %v2465_v47 = vor.u32 1.1754944e-38, %v2464_v8  ;;  %vm2473_vm14 = vweird.f32 %v9585_v62  ;;  %v2477_v56 = vand.u32 2147483647, %v9585_v62  ;;  %v9677_v17 = vld [vmem:[#allocation126_spill] sm:$0xff] }
 0x404   : > { %9651 = vst [vmem:[#allocation46_spill] sm:$0xff] %v7648_v49  ;;  %v2494_v26 = vand.u32 2147483648, %v9593_v52  ;;  %v9659_v0 = vsub.f32 %v9568_v3, %v7286_v5  ;;  %vm2463_vm4 = vcmp.eq.f32.partialorder %v2462_v25, 8.507059e+37  ;;  %vm7690_vm13 = vmor %vm2473_vm14, %vm2474_vm15  ;;  %vm2488_vm9 = vweird.f32 %v9593_v52  ;;  %v9674_v49 = vld [vmem:[#allocation125_spill] sm:$0xff] }
 0x405   : > { %9653 = vst [vmem:[#allocation38_spill] sm:$0xff] %v7656_v20  ;;  %v2492_v43 = vand.u32 2147483647, %v9593_v52  ;;  %v2466_v32 = vsel %vm2463_vm4, %v2465_v47, %v2461_v23  ;;  %v2476_v8 = vsel %vm7690_vm13, %v9586_v38, %v2472_v24  ;;  %v2480_v20 = vor.u32 1.1754944e-38, %v2479_v48  ;;  %vm7701_vm8 = vmor %vm2488_vm9, %vm2489_vm2  ;;  %v9665_v24 = vld [vmem:[#allocation116_spill] sm:$0xff]  ;;  %v9666_v48 = vld [vmem:[#allocation15_spill] sm:$0xff] }
 0x406   : > { %9654 = vst [vmem:[#allocation139_spill] sm:$0xff] %v7662_v57  ;;  %v2515_v57 = vsub.f32 1.0, %v2514_v11  ;;  %v7686_v40 = vmul.f32 %v2916_v61, %v9659_v0  ;;  %vm2504_vm0 = vweird.f32 %v9619_v10  ;;  %v2491_v3 = vsel %vm7701_vm8, %v9594_v30, %v2487_v29 }
 0x407   : > { %v2502_v61 = vadd.f32 %v9619_v10, %v2501_v18  ;;  %v2530_v25 = vsub.f32 1.0, %v2529_v33  ;;  %vm2478_vm3 = vcmp.eq.f32.partialorder %v2477_v56, 8.507059e+37  ;;  %v2495_v38 = vor.u32 1.1754944e-38, %v2494_v26  ;;  %v9668_v33 = vld [vmem:[#allocation5_spill] sm:$0xff] }
 0x408   : > { %9660 = vst [vmem:[#allocation66_spill] sm:$0xff] %v7686_v40  ;;  %v2516_v47 = vmul.f32 %v9649_v35, %v2515_v57  ;;  %v2509_v23 = vand.u32 2147483648, %v9618_v12  ;;  %v2544_v0 = vmul.f32 %v9666_v48, %v9665_v24  ;;  %v2481_v11 = vsel %vm2478_vm3, %v2480_v20, %v2476_v8  ;;  %v9669_v57 = vld [vmem:[#allocation124_spill] sm:$0xff]  ;;  %v9671_v8 = vld [vmem:[#allocation117_spill] sm:$0xff] }
 0x409   : > { %vm2493_vm5 = vcmp.eq.f32.partialorder %v2492_v43, 8.507059e+37  ;;  %vm2503_vm11 = vweird.f32 %v9618_v12  ;;  %v2507_v40 = vand.u32 2147483647, %v9618_v12  ;;  %v7720_v30 = vsel %vm2188_vm7, %v9483_v36, %v7422_v45  ;;  %v9672_v36 = vld [vmem:[#allocation19_spill] sm:$0xff] }
 0x40a   : > { %9667 = vst [vmem:[#allocation51_spill] sm:$0xff] %v7720_v30  ;;  %v9670_v29 = vsub.f32 %v9668_v33, %v9669_v57  ;;  %v2496_v56 = vsel %vm2493_vm5, %v2495_v38, %v2491_v3  ;;  %vm2505_vm15 = vmor %vm2503_vm11, %vm2504_vm0  ;;  %vm2519_vm2 = vweird.f32 %v9649_v35  ;;  %v2517_v26 = vadd.f32 %v9649_v35, %v2516_v47  ;;  %v9673_v30 = vld [vmem:[#allocation8_spill] sm:$0xff] }
 0x40b   : > { %v2506_v20 = vsel %vm2505_vm15, %v9619_v10, %v2502_v61  ;;  %v2531_v43 = vmul.f32 %v9658_v6, %v2530_v25  ;;  %v2559_v5 = vmul.f32 %v9672_v36, %v9671_v8  ;;  %v9675_v33 = vsub.f32 %v9673_v30, %v9674_v49 }
 0x40c   : > { %v7725_v18 = vmul.f32 %v2466_v32, %v9670_v29  ;;  %v2510_v3 = vor.u32 1.1754944e-38, %v2509_v23  ;;  %v2524_v38 = vand.u32 2147483648, %v9648_v13  ;;  %v2545_v57 = vsub.f32 1.0, %v2544_v0  ;;  %v9676_v29 = vld [vmem:[#allocation4_spill] sm:$0xff]  ;;  %v9681_v23 = vld [vmem:[#allocation70_spill] sm:$0xff] }
 0x40d   : > { %v7738_v32 = vmul.f32 %v2481_v11, %v9675_v33  ;;  %v9678_v45 = vsub.f32 %v9676_v29, %v9677_v17  ;;  %vm2508_vm7 = vcmp.eq.f32.partialorder %v2507_v40, 8.507059e+37  ;;  %vm2518_vm14 = vweird.f32 %v9648_v13  ;;  %v9682_v0 = vld [vmem:[#allocation20_spill] sm:$0xff]  ;;  %v9684_v29 = vld [vmem:[#allocation127_spill] sm:$0xff] }
 0x40e   : > { %v2522_v61 = vand.u32 2147483647, %v9648_v13  ;;  %v2511_v47 = vsel %vm2508_vm7, %v2510_v3, %v2506_v20  ;;  %vm7748_vm4 = vmor %vm2518_vm14, %vm2519_vm2  ;;  %vm2533_vm13 = vweird.f32 %v9657_v7  ;;  %v2537_v49 = vand.u32 2147483647, %v9657_v7  ;;  %v9683_v3 = vld [vmem:[#allocation7_spill] sm:$0xff] }
 0x40f   : > { %v7744_v10 = vmul.f32 %v2496_v56, %v9678_v45  ;;  %v2574_v11 = vmul.f32 %v9682_v0, %v9681_v23  ;;  %v2521_v45 = vsel %vm7748_vm4, %v9649_v35, %v2517_v26  ;;  %v2532_v17 = vadd.f32 %v9658_v6, %v2531_v43  ;;  %v9697_v43 = vld [vmem:[#allocation128_spill] sm:$0xff] }
 0x410   : > { %vm2534_vm9 = vweird.f32 %v9658_v6  ;;  %v2560_v40 = vsub.f32 1.0, %v2559_v5  ;;  %v2525_v30 = vor.u32 1.1754944e-38, %v2524_v38  ;;  %v2539_v56 = vand.u32 2147483648, %v9657_v7  ;;  %v9688_v38 = vld [vmem:[#allocation122_spill] sm:$0xff] }
 0x411   : > { %v2546_v20 = vmul.f32 %v9666_v48, %v2545_v57  ;;  %v2552_v33 = vand.u32 2147483647, %v9665_v24  ;;  %v9685_v37 = vsub.f32 %v9683_v3, %v9684_v29  ;;  %vm2523_vm8 = vcmp.eq.f32.partialorder %v2522_v61, 8.507059e+37  ;;  %vm7773_vm3 = vmor %vm2533_vm13, %vm2534_vm9  ;;  %v9689_v57 = vld [vmem:[#allocation18_spill] sm:$0xff] }
 0x412   : > { %vm2548_vm0 = vweird.f32 %v9665_v24  ;;  %v2554_v35 = vand.u32 2147483648, %v9665_v24  ;;  %v2526_v26 = vsel %vm2523_vm8, %v2525_v30, %v2521_v45  ;;  %vm2538_vm5 = vcmp.eq.f32.partialorder %v2537_v49, 8.507059e+37  ;;  %v9691_v45 = vld [vmem:[#allocation22_spill] sm:$0xff] }
 0x413   : > { %v7767_v41 = vmul.f32 %v2511_v47, %v9685_v37  ;;  %v2575_v5 = vsub.f32 1.0, %v2574_v11  ;;  %v2589_v25 = vmul.f32 %v9689_v57, %v9688_v38  ;;  %v2536_v37 = vsel %vm7773_vm3, %v9658_v6, %v2532_v17  ;;  %v9690_v47 = vld [vmem:[#allocation121_spill] sm:$0xff]  ;;  %v9694_v11 = vld [vmem:[#allocation71_spill] sm:$0xff] }
 0x414   : > { %vm2549_vm11 = vweird.f32 %v9666_v48  ;;  %v2561_v61 = vmul.f32 %v9672_v36, %v2560_v40  ;;  %v2604_v30 = vmul.f32 %v9691_v45, %v9690_v47  ;;  %v2540_v3 = vor.u32 1.1754944e-38, %v2539_v56 }
 0x415   : > { %v2547_v29 = vadd.f32 %v9666_v48, %v2546_v20  ;;  %vm7787_vm15 = vcmp.eq.f32.partialorder %v2552_v33, 8.507059e+37  ;;  %v2619_v16 = vmul.f32 %v9695_v44, %v9694_v11  ;;  %v9698_v6 = vsub.f32 %v9696_v59, %v9697_v43  ;;  %vm7806_vm7 = vmor %vm2548_vm0, %vm2549_vm11 }
 0x416   : > { %v2555_v63 = vor.u32 1.1754944e-38, %v2554_v35  ;;  %vm2563_vm2 = vweird.f32 %v9671_v8  ;;  %v2567_v40 = vand.u32 2147483647, %v9671_v8  ;;  %v2541_v56 = vsel %vm2538_vm5, %v2540_v3, %v2536_v37  ;;  %v9702_v37 = vld [vmem:[#allocation73_spill] sm:$0xff] }
 0x417   : > { %v7796_v17 = vmul.f32 %v2526_v26, %v9698_v6  ;;  %v2569_v20 = vand.u32 2147483648, %v9671_v8  ;;  %v2576_v33 = vmul.f32 %v9682_v0, %v2575_v5  ;;  %v2590_v21 = vsub.f32 1.0, %v2589_v25  ;;  %v9701_v26 = vld [vmem:[#allocation123_spill] sm:$0xff]  ;;  %v9703_v6 = vld [vmem:[#allocation144_spill] sm:$0xff] }
 0x418   : > { %v2562_v59 = vadd.f32 %v9672_v36, %v2561_v61  ;;  %vm2564_vm14 = vweird.f32 %v9672_v36  ;;  %v2605_v35 = vsub.f32 1.0, %v2604_v30  ;;  %v2634_v3 = vmul.f32 %v9702_v37, %v9701_v26 }
 0x419   : > { %v2551_v5 = vsel %vm7806_vm7, %v9666_v48, %v2547_v29  ;;  %v2582_v25 = vand.u32 2147483647, %v9681_v23  ;;  %v2620_v43 = vsub.f32 1.0, %v2619_v16  ;;  %v2649_v53 = vmul.f32 %v9704_v22, %v9703_v6  ;;  %vm7833_vm9 = vmor %vm2563_vm2, %vm2564_vm14 }
 0x41a   : > { %v9707_v19 = vsub.f32 %v9705_v1, %v9706_v42  ;;  %vm7825_vm4 = vcmp.eq.f32.partialorder %v2567_v40, 8.507059e+37  ;;  %vm2578_vm13 = vweird.f32 %v9681_v23  ;;  %v2584_v46 = vand.u32 2147483648, %v9681_v23 }
 0x41b   : > { %v2570_v48 = vor.u32 1.1754944e-38, %v2569_v20  ;;  %v2577_v29 = vadd.f32 %v9682_v0, %v2576_v33  ;;  %vm2579_vm8 = vweird.f32 %v9682_v0  ;;  %v7842_v42 = vsel %vm7787_vm15, %v2555_v63, %v2551_v5 }
 0x41c   : > { %v7823_v61 = vmul.f32 %v2541_v56, %v9707_v19  ;;  %v2591_v19 = vmul.f32 %v9689_v57, %v2590_v21  ;;  %v2566_v1 = vsel %vm7833_vm9, %v9672_v36, %v2562_v59  ;;  %v2606_v40 = vmul.f32 %v9691_v45, %v2605_v35  ;;  %vm7856_vm5 = vmor %vm2578_vm13, %vm2579_vm8 }
 0x41d   : > { %v2635_v56 = vsub.f32 1.0, %v2634_v3  ;;  %vm7848_vm0 = vcmp.eq.f32.partialorder %v2582_v25, 8.507059e+37  ;;  %vm2593_vm3 = vweird.f32 %v9688_v38  ;;  %v2621_v20 = vmul.f32 %v9695_v44, %v2620_v43 }
 0x41e   : > { %v2650_v21 = vsub.f32 1.0, %v2649_v53  ;;  %v2585_v49 = vor.u32 1.1754944e-38, %v2584_v46  ;;  %vm2594_vm11 = vweird.f32 %v9689_v57  ;;  %v2597_v36 = vand.u32 2147483647, %v9688_v38 }
 0x41f   : > { %v2599_v33 = vand.u32 2147483648, %v9688_v38  ;;  %v2571_v59 = vsel %vm7825_vm4, %v2570_v48, %v2566_v1  ;;  %v2581_v53 = vsel %vm7856_vm5, %v9682_v0, %v2577_v29  ;;  %v2592_v35 = vadd.f32 %v9689_v57, %v2591_v19  ;;  %vm7884_vm14 = vmor %vm2593_vm3, %vm2594_vm11  ;;  %v9733_v1 = vld [vmem:[#allocation10_spill] sm:$0xff] }
 0x420   : > { %v2612_v3 = vand.u32 2147483647, %v9690_v47  ;;  %v2607_v5 = vadd.f32 %v9691_v45, %v2606_v40  ;;  %vm2609_vm15 = vweird.f32 %v9691_v45  ;;  %v2614_v25 = vand.u32 2147483648, %v9690_v47 }
 0x421   : > { %v2636_v43 = vmul.f32 %v9702_v37, %v2635_v56  ;;  %vm2608_vm2 = vweird.f32 %v9690_v47  ;;  %v2622_v30 = vadd.f32 %v9695_v44, %v2621_v20  ;;  %vm2624_vm7 = vweird.f32 %v9695_v44 }
 0x422   : > { %v2651_v0 = vmul.f32 %v9704_v22, %v2650_v21  ;;  %v2586_v46 = vsel %vm7848_vm0, %v2585_v49, %v2581_v53  ;;  %vm7888_vm4 = vcmp.eq.f32.partialorder %v2597_v36, 8.507059e+37  ;;  %v2600_v29 = vor.u32 1.1754944e-38, %v2599_v33  ;;  %vm7901_vm0 = vmor %vm2608_vm2, %vm2609_vm15  ;;  %v9736_v21 = vld [vmem:[#allocation9_spill] sm:$0xff] }
 0x423   : > { %v2629_v19 = vand.u32 2147483648, %v9694_v11  ;;  %vm2389_vm13 = vcmp.gt.f32.partialorder %v9569_v39, 0.0  ;;  %vm2390_vm9 = vcmp.gt.f32.partialorder %v9585_v62, 0.0  ;;  %vm2391_vm8 = vcmp.gt.f32.partialorder %v9593_v52, 0.0  ;;  %v9750_v62 = vld [vmem:[#allocation72_spill] sm:$0xff]  ;;  %v9752_v52 = vld [vmem:[#allocation17_spill] sm:$0xff] }
 0x424   : > { %v2596_v54 = vsel %vm7884_vm14, %v9689_v57, %v2592_v35  ;;  %vm7905_vm3 = vcmp.eq.f32.partialorder %v2612_v3, 8.507059e+37  ;;  %vm2623_vm5 = vweird.f32 %v9694_v11  ;;  %v2627_v56 = vand.u32 2147483647, %v9694_v11  ;;  %v2149_v3 = vpop.xlane.xlu0 %2148 }
 0x425   : > { %vm2392_vm11 = vcmp.gt.f32.partialorder %v9618_v12, 0.0  ;;  %vm2393_vm12 = vcmp.gt.f32.partialorder %v9648_v13, 0.0  ;;  %v2611_v57 = vsel %vm7901_vm0, %v9691_v45, %v2607_v5  ;;  %v2615_v20 = vor.u32 1.1754944e-38, %v2614_v25  ;;  %vm7918_vm15 = vmor %vm2623_vm5, %vm2624_vm7  ;;  %v9739_v5 = vld [vmem:[#allocation14_spill] sm:$0xff] }
 0x426   : > { %v2637_v63 = vadd.f32 %v9702_v37, %v2636_v43  ;;  %vm2639_vm2 = vweird.f32 %v9702_v37  ;;  %vm2394_vm14 = vcmp.gt.f32.partialorder %v9657_v7, 0.0  ;;  %v2626_v49 = vsel %vm7918_vm15, %v9695_v44, %v2622_v30  ;;  %v9728_v43 = vld [vmem:[#allocation11_spill] sm:$0xff]  ;;  %v9729_v30 = vld [vmem:[#allocation130_spill] sm:$0xff] }
 0x427   : > { %v2644_v36 = vand.u32 2147483648, %v9701_v26  ;;  %v2652_v45 = vadd.f32 %v9704_v22, %v2651_v0  ;;  %vm2654_vm0 = vweird.f32 %v9704_v22  ;;  %v2630_v33 = vor.u32 1.1754944e-38, %v2629_v19 }
 0x428   : > { %vm2638_vm1 = vweird.f32 %v9701_v26  ;;  %v2642_v53 = vand.u32 2147483647, %v9701_v26  ;;  %v2659_v35 = vand.u32 2147483648, %v9703_v6  ;;  %vm2397_vm15 = vcmp.gt.f32.partialorder %v9681_v23, 0.0 }
 0x429   : > { %v2601_v44 = vsel %vm7888_vm4, %v2600_v29, %v2596_v54  ;;  %vm2628_vm6 = vcmp.eq.f32.partialorder %v2627_v56, 8.507059e+37  ;;  %vm7941_vm10 = vmor %vm2638_vm1, %vm2639_vm2  ;;  %vm2653_vm5 = vweird.f32 %v9703_v6  ;;  %v2657_v25 = vand.u32 2147483647, %v9703_v6 }
 0x42a   : > { %vm2398_vm7 = vcmp.gt.f32.partialorder %v9688_v38, 0.0  ;;  %v9730_v0 = vsub.f32 %v9728_v43, %v9729_v30  ;;  %v2616_v48 = vsel %vm7905_vm3, %v2615_v20, %v2611_v57  ;;  %v2631_v29 = vsel %vm2628_vm6, %v2630_v33, %v2626_v49  ;;  %vm7959_vm1 = vmor %vm2653_vm5, %vm2654_vm0  ;;  %v9740_v43 = vld [vmem:[#allocation133_spill] sm:$0xff] }
 0x42b   : > { %v2641_v19 = vsel %vm7941_vm10, %v9702_v37, %v2637_v63  ;;  %vm2399_vm4 = vcmp.gt.f32.partialorder %v9690_v47, 0.0  ;;  %vm2400_vm2 = vcmp.gt.f32.partialorder %v9694_v11, 0.0  ;;  %v2645_v57 = vor.u32 1.1754944e-38, %v2644_v36  ;;  %v9737_v63 = vld [vmem:[#allocation132_spill] sm:$0xff]  ;;  %v9742_v36 = vld [vmem:[#allocation13_spill] sm:$0xff] }
 0x42c   : > { %v2557_v16 = vmul.f32 %v7842_v42, %v9730_v0  ;;  %v9734_v42 = vld [vmem:[#allocation131_spill] sm:$0xff]  ;;  %v2656_v20 = vsel %vm7959_vm1, %v9704_v22, %v2652_v45  ;;  %v7971_v37 = vperm.slane %v2149_v3, 0  ;;  %vm2401_vm10 = vcmp.gt.f32.partialorder %v9701_v26, 0.0  ;;  %v9745_v45 = vld [vmem:[#allocation12_spill] sm:$0xff] }
 0x42d   : > { %v9735_v56 = vsub.f32 %v9733_v1, %v9734_v42  ;;  %vm2402_vm6 = vcmp.gt.f32.partialorder %v9703_v6, 0.0  ;;  %v9738_v49 = vsub.f32 %v9736_v21, %v9737_v63  ;;  %v9741_v30 = vsub.f32 %v9739_v5, %v9740_v43  ;;  %v9743_v1 = vld [vmem:[#allocation134_spill] sm:$0xff]  ;;  %v9746_v3 = vld [vmem:[#allocation135_spill] sm:$0xff] }
 0x42e   : > { %vm2643_vm3 = vcmp.eq.f32.partialorder %v2642_v53, 8.507059e+37  ;;  %v9744_v54 = vsub.f32 %v9742_v36, %v9743_v1  ;;  %v9747_v42 = vsub.f32 %v9745_v45, %v9746_v3  ;;  %vm2658_vm0 = vcmp.eq.f32.partialorder %v2657_v25, 8.507059e+37  ;;  %v9766_v43 = vld [vmem:[#allocation78_spill] sm:$0xff]  ;;  %v9770_v1 = vld [vmem:[#allocation80_spill] sm:$0xff]  ;;  %v9772_v3 = vld [vmem:[#allocation81_spill] sm:$0xff] }
 0x42f   : > { %v2572_v40 = vmul.f32 %v2571_v59, %v9735_v56  ;;  %v2587_v33 = vmul.f32 %v2586_v46, %v9738_v49  ;;  %v2602_v0 = vmul.f32 %v2601_v44, %v9741_v30  ;;  %v2660_v59 = vor.u32 1.1754944e-38, %v2659_v35 }
 0x430   : > { %v2617_v22 = vmul.f32 %v2616_v48, %v9744_v54  ;;  %v2632_v56 = vmul.f32 %v2631_v29, %v9747_v42  ;;  %v2646_v4 = vsel %vm2643_vm3, %v2645_v57, %v2641_v19  ;;  %v2933_v46 = vsel %vm2389_vm13, %v7725_v18, 0.0  ;;  %v9748_v48 = vld [vmem:[#allocation57_spill] sm:$0xff]  ;;  %v9759_v57 = vld [vmem:[#allocation16_spill] sm:$0xff] }
 0x431   : > { %v2661_v50 = vsel %vm2658_vm0, %v2660_v59, %v2656_v20  ;;  %v2934_v53 = vsel %vm2390_vm9, %v7738_v32, 0.0  ;;  %v2935_v35 = vsel %vm2391_vm8, %v7744_v10, 0.0  ;;  %v2936_v44 = vsel %vm2392_vm11, %v7767_v41, 0.0  ;;  %v9753_v32 = vld [vmem:[#allocation136_spill] sm:$0xff]  ;;  %v9755_v41 = vld [vmem:[#allocation45_spill] sm:$0xff] }
 0x432   : > { %v2937_v25 = vsel %vm2393_vm12, %v7796_v17, 0.0  ;;  %vm9749_vm13 = vcmp.lt.f32.partialorder %v9748_v48, 512.0  ;;  %vm9751_vm9 = vcmp.lt.f32.partialorder %v9750_v62, 512.0  ;;  %v9754_v10 = vsub.f32 %v9752_v52, %v9753_v32  ;;  %v9757_v17 = vld [vmem:[#allocation75_spill] sm:$0xff]  ;;  %v9760_v20 = vld [vmem:[#allocation137_spill] sm:$0xff] }
 0x433   : > { %v2292_v39 = vsel %vm9749_vm13, %v9748_v48, %v7971_v37  ;;  %v2293_v18 = vsel %vm9751_vm9, %v9750_v62, %v7971_v37  ;;  %v2938_v12 = vsel %vm2394_vm14, %v7823_v61, 0.0  ;;  %vm9756_vm12 = vcmp.lt.f32.partialorder %v9755_v41, 512.0  ;;  %v9764_v61 = vld [vmem:[#allocation33_spill] sm:$0xff]  ;;  %v9778_v32 = vld [vmem:[#allocation87_spill] sm:$0xff] }
 0x434   : > { %v2647_v29 = vmul.f32 %v2646_v4, %v9754_v10  ;;  %v2294_v13 = vsel %vm9756_vm12, %v9755_v41, %v7971_v37  ;;  %vm9758_vm8 = vcmp.lt.f32.partialorder %v9757_v17, 512.0  ;;  %v9761_v21 = vsub.f32 %v9759_v57, %v9760_v20 }
 0x435   : > { %v2295_v19 = vsel %vm9758_vm8, %v9757_v17, %v7971_v37  ;;  %vm9762_vm11 = vcmp.gt.f32.partialorder %v9665_v24, 0.0  ;;  %vm9763_vm5 = vcmp.gt.f32.partialorder %v9671_v8, 0.0  ;;  %vm9765_vm14 = vcmp.lt.f32.partialorder %v9764_v61, 512.0 }
 0x436   : > { %v2662_v63 = vmul.f32 %v2661_v50, %v9761_v21  ;;  %v2939_v4 = vsel %vm9762_vm11, %v2557_v16, 0.0  ;;  %v2940_v7 = vsel %vm9763_vm5, %v2572_v40, 0.0  ;;  %v2296_v49 = vsel %vm9765_vm14, %v9764_v61, %v7971_v37  ;;  %v9768_v16 = vld [vmem:[#allocation79_spill] sm:$0xff] }
 0x437   : > { %v2941_v5 = vsel %vm2397_vm15, %v2587_v33, 0.0  ;;  %vm9767_vm1 = vcmp.lt.f32.partialorder %v9766_v43, 512.0  ;;  %v2965_v50 = vsub.f32 %v2292_v39, %v7443_v15  ;;  %v2966_v24 = vsub.f32 %v2293_v18, %v7453_v55  ;;  %v9776_v39 = vld [vmem:[#allocation89_spill] sm:$0xff] }
 0x438   : > { %v2297_v30 = vsel %vm9767_vm1, %v9766_v43, %v7971_v37  ;;  %v2942_v8 = vsel %vm2398_vm7, %v2602_v0, 0.0  ;;  %vm9769_vm3 = vcmp.lt.f32.partialorder %v9768_v16, 512.0  ;;  %v2967_v23 = vsub.f32 %v2294_v13, %v7459_v27  ;;  %v9782_v13 = vld [vmem:[#allocation91_spill] sm:$0xff] }
 0x439   : > { %v2298_v40 = vsel %vm9769_vm3, %v9768_v16, %v7971_v37  ;;  %v2968_v33 = vsub.f32 %v2295_v19, %v7466_v9  ;;  %v2943_v59 = vsel %vm2399_vm4, %v2617_v22, 0.0  ;;  %v2944_v36 = vsel %vm2400_vm2, %v2632_v56, 0.0  ;;  %v9774_v22 = vld [vmem:[#allocation84_spill] sm:$0xff] }
 0x43a   : > { %vm9771_vm15 = vcmp.lt.f32.partialorder %v9770_v1, 512.0  ;;  %v2969_v0 = vsub.f32 %v2296_v49, %v7472_v31  ;;  %v2945_v54 = vsel %vm2401_vm10, %v2647_v29, 0.0  ;;  %v2946_v45 = vsel %vm2402_vm6, %v2662_v63, 0.0  ;;  %v9780_v29 = vld [vmem:[#allocation90_spill] sm:$0xff] }
 0x43b   : > { %v2299_v38 = vsel %vm9771_vm15, %v9770_v1, %v7971_v37  ;;  %vm9773_vm7 = vcmp.lt.f32.partialorder %v9772_v3, 512.0  ;;  %v2970_v11 = vsub.f32 %v2297_v30, %v7498_v51  ;;  %vm9775_vm4 = vcmp.lt.f32.partialorder %v9774_v22, 512.0 }
 0x43c   : > { %v2300_v47 = vsel %vm9773_vm7, %v9772_v3, %v7971_v37  ;;  %v2301_v42 = vsel %vm9775_vm4, %v9774_v22, %v7971_v37  ;;  %v2971_v56 = vsub.f32 %v2298_v40, %v7504_v58  ;;  %v2997_v48 = vmul.f32 %v2965_v50, %v2933_v46  ;;  %v9786_v50 = vld [vmem:[#allocation93_spill] sm:$0xff]  ;;  %v9800_v3 = vld [vmem:[#allocation31_spill] sm:$0xff] }
 0x43d   : > { %v2998_v26 = vmul.f32 %v2966_v24, %v2934_v53  ;;  %vm9777_vm2 = vcmp.lt.f32.partialorder %v9776_v39, 512.0  ;;  %v2972_v62 = vsub.f32 %v2299_v38, %v7512_v14  ;;  %v2999_v18 = vmul.f32 %v2967_v23, %v2935_v35  ;;  %v9784_v35 = vld [vmem:[#allocation92_spill] sm:$0xff]  ;;  %v9788_v24 = vld [vmem:[#allocation27_spill] sm:$0xff] }
 0x43e   : > { %v2302_v6 = vsel %vm9777_vm2, %v9776_v39, %v7971_v37  ;;  %v3000_v52 = vmul.f32 %v2968_v33, %v2936_v44  ;;  %vm9779_vm10 = vcmp.lt.f32.partialorder %v9778_v32, 512.0  ;;  %vm9781_vm6 = vcmp.lt.f32.partialorder %v9780_v29, 512.0  ;;  %v9796_v33 = vld [vmem:[#allocation64_spill] sm:$0xff]  ;;  %v9808_v39 = vld [vmem:[#allocation30_spill] sm:$0xff] }
 0x43f   : > { %v2303_v10 = vsel %vm9779_vm10, %v9778_v32, %v7971_v37  ;;  %v2304_v46 = vsel %vm9781_vm6, %v9780_v29, %v7971_v37  ;;  %v2973_v53 = vsub.f32 %v2300_v47, %v7518_v34  ;;  %v3001_v41 = vmul.f32 %v2969_v0, %v2937_v25 }
 0x440   : > { %vm9783_vm0 = vcmp.lt.f32.partialorder %v9782_v13, 512.0  ;;  %vm9785_vm13 = vcmp.lt.f32.partialorder %v9784_v35, 512.0  ;;  %v2974_v19 = vsub.f32 %v2301_v42, %v7524_v28  ;;  %v3002_v57 = vmul.f32 %v2970_v11, %v2938_v12  ;;  %v9804_v42 = vld [vmem:[#allocation32_spill] sm:$0xff] }
 0x441   : > { %v2305_v17 = vsel %vm9783_vm0, %v9782_v13, %v7971_v37  ;;  %v2306_v44 = vsel %vm9785_vm13, %v9784_v35, %v7971_v37  ;;  %v2975_v20 = vsub.f32 %v2302_v6, %v7530_v2  ;;  %v3003_v21 = vmul.f32 %v2971_v56, %v2939_v4  ;;  %v9818_v13 = vld [vmem:[#allocation77_spill] sm:$0xff] }
 0x442   : > { %v3029_v25 = vadd.f32 %v2997_v48, %v7443_v15  ;;  %v3030_v63 = vadd.f32 %v2998_v26, %v7453_v55  ;;  %v2976_v61 = vsub.f32 %v2303_v10, %v7541_v60  ;;  %v3004_v49 = vmul.f32 %v2972_v62, %v2940_v7  ;;  %v9790_v55 = vld [vmem:[#allocation97_spill] sm:$0xff]  ;;  %v9792_v7 = vld [vmem:[#allocation63_spill] sm:$0xff]  ;;  %v9813_v10 = vld [vmem:[#allocation74_spill] sm:$0xff] }
 0x443   : > { %v3031_v43 = vadd.f32 %v2999_v18, %v7459_v27  ;;  %v3032_v30 = vadd.f32 %v3000_v52, %v7466_v9  ;;  %vm9787_vm9 = vcmp.lt.f32.partialorder %v9786_v50, 512.0  ;;  %v2977_v4 = vsub.f32 %v2304_v46, %v9788_v24  ;;  %v9812_v52 = vld [vmem:[#allocation34_spill] sm:$0xff] }
 0x444   : > { %v2307_v12 = vsel %vm9787_vm9, %v9786_v50, %v7971_v37  ;;  %v3005_v16 = vmul.f32 %v2973_v53, %v2941_v5  ;;  %v3033_v15 = vadd.f32 %v3001_v41, %v7472_v31  ;;  %vm9789_vm12 = vcmask 7168   ;;  %v9794_v5 = vld [vmem:[#allocation98_spill] sm:$0xff]  ;;  %v9817_v53 = vld [vmem:[#allocation35_spill] sm:$0xff] }
 0x445   : > { %3061 = vst.msk [vmem:[%s3743_s4] sm:$0xff] %vm9789_vm12, %v3029_v25  ;;  %vm9791_vm8 = vcmp.lt.f32.partialorder %v9790_v55, 512.0  ;;  %v2978_v9 = vsub.f32 %v2305_v17, %v9792_v7  ;;  %v3006_v40 = vmul.f32 %v2974_v19, %v2942_v8  ;;  %v3034_v23 = vadd.f32 %v3002_v57, %v7498_v51  ;;  %vm9793_vm11 = vmmov %vm9789_vm12  ;;  %v9798_v8 = vld [vmem:[#allocation94_spill] sm:$0xff]  ;;  %v9822_v19 = vld [vmem:[#allocation37_spill] sm:$0xff] }
 0x446   : > { %v2308_v27 = vsel %vm9791_vm8, %v9790_v55, %v7971_v37  ;;  %3062 = vst.msk [vmem:[%s3743_s4 + $0x8] sm:$0xff] %vm9793_vm11, %v3030_v63  ;;  %vm9795_vm5 = vcmp.lt.f32.partialorder %v9794_v5, 512.0  ;;  %v2979_v1 = vsub.f32 %v2306_v44, %v9796_v33  ;;  %v3007_v38 = vmul.f32 %v2975_v20, %v2943_v59  ;;  %vm9797_vm14 = vmmov %vm9793_vm11  ;;  %v9802_v59 = vld [vmem:[#allocation100_spill] sm:$0xff]  ;;  %v9834_v55 = vld [vmem:[#allocation86_spill] sm:$0xff] }
 0x447   : > { %v2309_v31 = vsel %vm9795_vm5, %v9794_v5, %v7971_v37  ;;  %v3035_v0 = vadd.f32 %v3003_v21, %v7504_v58  ;;  %3063 = vst.msk [vmem:[%s3743_s4 + $0x10] sm:$0xff] %vm9797_vm14, %v3031_v43  ;;  %vm9799_vm1 = vcmp.lt.f32.partialorder %v9798_v8, 512.0  ;;  %v2980_v47 = vsub.f32 %v2307_v12, %v9800_v3  ;;  %vm9801_vm3 = vmmov %vm9793_vm11  ;;  %v9820_v44 = vld [vmem:[#allocation104_spill] sm:$0xff]  ;;  %v9830_v12 = vld [vmem:[#allocation25_spill] sm:$0xff] }
 0x448   : > { %v2310_v51 = vsel %vm9799_vm1, %v9798_v8, %v7971_v37  ;;  %v3008_v11 = vmul.f32 %v2976_v61, %v2944_v36  ;;  %v3036_v22 = vadd.f32 %v3004_v49, %v7512_v14  ;;  %3064 = vst.msk [vmem:[%s3743_s4 + $0x18] sm:$0xff] %vm9801_vm3, %v3032_v30  ;;  %vm9803_vm15 = vcmp.lt.f32.partialorder %v9802_v59, 512.0  ;;  %vm9805_vm7 = vmmov %vm9801_vm3  ;;  %v9806_v36 = vld [vmem:[#allocation101_spill] sm:$0xff]  ;;  %v9823_v20 = vld [vmem:[#allocation48_spill] sm:$0xff] }
 0x449   : > { %v2311_v58 = vsel %vm9803_vm15, %v9802_v59, %v7971_v37  ;;  %v2981_v56 = vsub.f32 %v2308_v27, %v9804_v42  ;;  %v3009_v48 = vmul.f32 %v2977_v4, %v2945_v54  ;;  %v3037_v26 = vadd.f32 %v3005_v16, %v7518_v34  ;;  %3065 = vst.msk [vmem:[%s3743_s4 + $0x20] sm:$0xff] %vm9805_vm7, %v3033_v15  ;;  %vm9809_vm2 = vmmov %vm9801_vm3  ;;  %v9810_v54 = vld [vmem:[#allocation95_spill] sm:$0xff]  ;;  %v9825_v63 = vld [vmem:[#allocation96_spill] sm:$0xff] }
 0x44a   : > { %vm9807_vm4 = vcmp.lt.f32.partialorder %v9806_v36, 512.0  ;;  %v2982_v6 = vsub.f32 %v2309_v31, %v9808_v39  ;;  %v3010_v62 = vmul.f32 %v2978_v9, %v2946_v45  ;;  %v3038_v18 = vadd.f32 %v3006_v40, %v7524_v28  ;;  %3066 = vst.msk [vmem:[%s3743_s4 + $0x28] sm:$0xff] %vm9809_vm2, %v3034_v23  ;;  %vm9814_vm6 = vmmov %vm9809_vm2  ;;  %v9815_v45 = vld [vmem:[#allocation103_spill] sm:$0xff]  ;;  %v9828_v43 = vld [vmem:[#allocation36_spill] sm:$0xff] }
 0x44b   : > { %v2312_v14 = vsel %vm9807_vm4, %v9806_v36, %v7971_v37  ;;  %vm9811_vm10 = vcmp.lt.f32.partialorder %v9810_v54, 512.0  ;;  %v2983_v32 = vsub.f32 %v2310_v51, %v9812_v52  ;;  %v3011_v29 = vmul.f32 %v2979_v1, %v9813_v10  ;;  %3067 = vst.msk [vmem:[%s3743_s4 + $0x30] sm:$0xff] %vm9814_vm6, %v3035_v0  ;;  %vm9819_vm13 = vmmov %vm9809_vm2  ;;  %v9827_v61 = vld [vmem:[#allocation99_spill] sm:$0xff]  ;;  %v9833_v16 = vld [vmem:[#allocation102_spill] sm:$0xff] }
 0x44c   : > { %v2313_v34 = vsel %vm9811_vm10, %v9810_v54, %v7971_v37  ;;  %v3039_v46 = vadd.f32 %v3007_v38, %v7530_v2  ;;  %vm9816_vm0 = vcmp.lt.f32.partialorder %v9815_v45, 512.0  ;;  %v2984_v41 = vsub.f32 %v2311_v58, %v9817_v53  ;;  %3068 = vst.msk [vmem:[%s3743_s4 + $0x38] sm:$0xff] %vm9819_vm13, %v3036_v22  ;;  %vm9824_vm12 = vmmov %vm9809_vm2  ;;  %v9836_v40 = vld [vmem:[#allocation82_spill] sm:$0xff]  ;;  %v9838_v23 = vld [vmem:[#allocation60_spill] sm:$0xff] }
 0x44d   : > { %v2314_v28 = vsel %vm9816_vm0, %v9815_v45, %v7971_v37  ;;  %v3012_v17 = vmul.f32 %v2980_v47, %v9818_v13  ;;  %v3040_v35 = vadd.f32 %v3008_v11, %v7541_v60  ;;  %vm9821_vm9 = vcmp.lt.f32.partialorder %v9820_v44, 512.0  ;;  %3069 = vst.msk [vmem:[%s3743_s4 + $0x40] sm:$0xff] %vm9824_vm12, %v3037_v26  ;;  %vm9829_vm11 = vmmov %vm9809_vm2  ;;  %v9840_v31 = vld [vmem:[#allocation47_spill] sm:$0xff]  ;;  %v9841_v38 = vld [vmem:[#allocation85_spill] sm:$0xff] }
 0x44e   : > { %v2315_v2 = vsel %vm9821_vm9, %v9820_v44, %v7971_v37  ;;  %v2985_v57 = vsub.f32 %v2312_v14, %v9822_v19  ;;  %v3013_v21 = vmul.f32 %v2981_v56, %v9823_v20  ;;  %v3041_v25 = vadd.f32 %v3009_v48, %v9788_v24  ;;  %3070 = vst.msk [vmem:[%s3743_s4 + $0x48] sm:$0xff] %vm9829_vm11, %v3038_v18  ;;  %v9831_v24 = vld [vmem:[#allocation110_spill] sm:$0xff]  ;;  %vm9835_vm1 = vmmov %vm9809_vm2  ;;  %v9846_v22 = vld [vmem:[#allocation55_spill] sm:$0xff] }
 0x44f   : > { %vm9826_vm8 = vcmp.lt.f32.partialorder %v9825_v63, 512.0  ;;  %v2986_v49 = vsub.f32 %v2313_v34, %v9827_v61  ;;  %v3014_v30 = vmul.f32 %v2982_v6, %v9828_v43  ;;  %v3042_v50 = vadd.f32 %v3010_v62, %v9792_v7  ;;  %3071 = vst.msk [vmem:[%s3743_s4 + $0x50] sm:$0xff] %vm9835_vm1, %v3039_v46  ;;  %v9837_v7 = vld [vmem:[#allocation88_spill] sm:$0xff]  ;;  %vm9842_vm7 = vmmov %vm9835_vm1  ;;  %v9845_v47 = vld [vmem:[#allocation46_spill] sm:$0xff] }
 0x450   : > { %v2316_v60 = vsel %vm9826_vm8, %v9825_v63, %v7971_v37  ;;  %vm2419_vm5 = vcmp.gt.f32.partialorder %v9830_v12, 0.0  ;;  %vm9832_vm14 = vcmp.lt.f32.partialorder %v9831_v24, 512.0  ;;  %v2987_v15 = vsub.f32 %v2314_v28, %v9833_v16  ;;  %3072 = vst.msk [vmem:[%s3743_s4 + $0x58] sm:$0xff] %vm9842_vm7, %v3040_v35  ;;  %vm9847_vm2 = vmmov %vm9835_vm1  ;;  %v9848_v56 = vld [vmem:[#allocation109_spill] sm:$0xff]  ;;  %v9850_v48 = vld [vmem:[#allocation38_spill] sm:$0xff] }
 0x451   : > { %v2317_v4 = vsel %vm9832_vm14, %v9831_v24, %v7971_v37  ;;  %v3015_v27 = vmul.f32 %v2983_v32, %v9834_v55  ;;  %v3043_v9 = vadd.f32 %v3011_v29, %v9796_v33  ;;  %vm2420_vm3 = vcmp.gt.f32.partialorder %v9836_v40, 0.0  ;;  %v9843_v33 = vld [vmem:[#allocation39_spill] sm:$0xff]  ;;  %3073 = vst.msk [vmem:[%s3743_s4 + $0x60] sm:$0xff] %vm9847_vm2, %v3041_v25  ;;  %vm9852_vm6 = vmmov %vm9835_vm1  ;;  %v9853_v62 = vld [vmem:[#allocation62_spill] sm:$0xff] }
 0x452   : > { %vm9839_vm15 = vcmp.gt.f32.partialorder %v9838_v23, -1.0  ;;  %v2988_v1 = vsub.f32 %v2315_v2, %v9840_v31  ;;  %v3016_v0 = vmul.f32 %v2984_v41, %v9841_v38  ;;  %v3044_v8 = vadd.f32 %v3012_v17, %v9800_v3  ;;  %v9851_v36 = vld [vmem:[#allocation119_spill] sm:$0xff]  ;;  %3074 = vst.msk [vmem:[%s3743_s4 + $0x68] sm:$0xff] %vm9852_vm6, %v3042_v50  ;;  %v9857_v34 = vld [vmem:[#allocation21_spill] sm:$0xff]  ;;  %vm9858_vm9 = vmmov %vm9835_vm1 }
 0x453   : > { %v2254_v5 = vsel %vm9839_vm15, %v9838_v23, %v9837_v7  ;;  %vm9844_vm4 = vcmp.gt.f32.partialorder %v9843_v33, -1.0  ;;  %v2989_v11 = vsub.f32 %v2316_v60, %v9845_v47  ;;  %v3017_v59 = vmul.f32 %v2985_v57, %v9846_v22  ;;  %v9855_v18 = vld [vmem:[#allocation111_spill] sm:$0xff]  ;;  %3075 = vst.msk [vmem:[%s3743_s4 + $0x70] sm:$0xff] %vm9858_vm9, %v3043_v9  ;;  %v9861_v46 = vld [vmem:[#allocation113_spill] sm:$0xff]  ;;  %vm9864_vm11 = vmmov %vm9835_vm1 }
 0x454   : > { %v2255_v51 = vsel %vm9844_vm4, %v9843_v33, %v9837_v7  ;;  %v3045_v58 = vadd.f32 %v3013_v21, %v9804_v42  ;;  %vm9849_vm10 = vcmp.lt.f32.partialorder %v9848_v56, 512.0  ;;  %v2990_v26 = vsub.f32 %v2317_v4, %v9850_v48  ;;  %v9863_v28 = vld [vmem:[#allocation83_spill] sm:$0xff]  ;;  %3076 = vst.msk [vmem:[%s3743_s4 + $0x78] sm:$0xff] %vm9864_vm11, %v3044_v8  ;;  %v9868_v2 = vld [vmem:[#allocation53_spill] sm:$0xff]  ;;  %v9869_v21 = vld [vmem:[#allocation114_spill] sm:$0xff] }
 0x455   : > { %v2318_v3 = vsel %vm9849_vm10, %v9848_v56, %v7971_v37  ;;  %v3018_v14 = vmul.f32 %v2986_v49, %v9851_v36  ;;  %v3046_v6 = vadd.f32 %v3014_v30, %v9808_v39  ;;  %vm9854_vm0 = vcmp.gt.f32.partialorder %v9853_v62, -1.0  ;;  %v9859_v39 = vld [vmem:[#allocation41_spill] sm:$0xff]  ;;  %v9867_v35 = vld [vmem:[#allocation139_spill] sm:$0xff]  ;;  %v9872_v60 = vld [vmem:[#allocation26_spill] sm:$0xff] }
 0x456   : > { %v2256_v42 = vsel %vm9854_vm0, %v9853_v62, %v9837_v7  ;;  %vm9856_vm13 = vcmp.lt.f32.partialorder %v9855_v18, 512.0  ;;  %v3019_v32 = vmul.f32 %v2987_v15, %v9857_v34  ;;  %v3047_v10 = vadd.f32 %v3015_v27, %v9812_v52  ;;  %v9865_v52 = vld [vmem:[#allocation112_spill] sm:$0xff]  ;;  %3077 = vst.msk [vmem:[%s3743_s4 + $0x80] sm:$0xff] %vm9835_vm1, %v3045_v58  ;;  %v9871_v25 = vld [vmem:[#allocation51_spill] sm:$0xff]  ;;  %vm9873_vm7 = vmmov %vm9835_vm1 }
 0x457   : > { %v2319_v54 = vsel %vm9856_vm13, %v9855_v18, %v7971_v37  ;;  %vm9860_vm12 = vcmp.gt.f32.partialorder %v9859_v39, -1.0  ;;  %vm9862_vm8 = vcmp.lt.f32.partialorder %v9861_v46, 512.0  ;;  %v3020_v41 = vmul.f32 %v2988_v1, %v9863_v28  ;;  %3078 = vst.msk [vmem:[%s3743_s4 + $0x88] sm:$0xff] %vm9873_vm7, %v3046_v6  ;;  %v9874_v30 = vld [vmem:[#allocation115_spill] sm:$0xff]  ;;  %v9876_v24 = vld [vmem:[#allocation24_spill] sm:$0xff]  ;;  %vm9877_vm2 = vmmov %vm9835_vm1 }
 0x458   : > { %v2257_v29 = vsel %vm9860_vm12, %v9859_v39, %v9837_v7  ;;  %v2320_v45 = vsel %vm9862_vm8, %v9861_v46, %v7971_v37  ;;  %v3048_v13 = vadd.f32 %v3016_v0, %v9817_v53  ;;  %vm9866_vm14 = vcmp.lt.f32.partialorder %v9865_v52, 512.0  ;;  %3079 = vst.msk [vmem:[%s3743_s4 + $0x90] sm:$0xff] %vm9877_vm2, %v3047_v10  ;;  %v9878_v55 = vld [vmem:[#allocation66_spill] sm:$0xff]  ;;  %v9879_v9 = vld [vmem:[#allocation28_spill] sm:$0xff]  ;;  %vm9880_vm10 = vmmov %vm9835_vm1 }
 0x459   : > { %v2321_v17 = vsel %vm9866_vm14, %v9865_v52, %v7971_v37  ;;  %v2991_v44 = vsub.f32 %v2318_v3, %v9867_v35  ;;  %v3021_v57 = vmul.f32 %v2989_v11, %v9868_v2  ;;  %v3049_v20 = vadd.f32 %v3017_v59, %v9822_v19  ;;  %v9882_v38 = vld [vmem:[#allocation54_spill] sm:$0xff]  ;;  %v9884_v33 = vld [vmem:[#allocation29_spill] sm:$0xff]  ;;  %vm9885_vm6 = vmmov %vm9835_vm1 }
 0x45a   : > { %vm9870_vm15 = vcmp.lt.f32.partialorder %v9869_v21, 512.0  ;;  %v2992_v63 = vsub.f32 %v2319_v54, %v9871_v25  ;;  %v3022_v49 = vmul.f32 %v2990_v26, %v9872_v60  ;;  %v3050_v43 = vadd.f32 %v3018_v14, %v9827_v61  ;;  %3080 = vst.msk [vmem:[%s3743_s4 + $0x98] sm:$0xff] %vm9880_vm10, %v3048_v13  ;;  %vm9887_vm0 = vmmov %vm9835_vm1 }
 0x45b   : > { %v2322_v53 = vsel %vm9870_vm15, %v9869_v21, %v7971_v37  ;;  %vm9875_vm4 = vcmp.lt.f32.partialorder %v9874_v30, 512.0  ;;  %v2993_v50 = vsub.f32 %v2320_v45, %v2254_v5  ;;  %v3023_v4 = vmul.f32 %v2991_v44, %v9876_v24  ;;  %vm9888_vm13 = vmmov %vm9887_vm0 }
 0x45c   : > { %v2323_v19 = vsel %vm9875_vm4, %v9874_v30, %v7971_v37  ;;  %v3051_v15 = vadd.f32 %v3019_v32, %v9833_v16  ;;  %v2963_v61 = vsel %vm2419_vm5, %v9878_v55, 0.0  ;;  %v2994_v27 = vsub.f32 %v2321_v17, %v2255_v51  ;;  %v9881_v37 = vld [vmem:[#allocation138_spill] sm:$0xff]  ;;  %vm9883_vm5 = vmmov %vm9835_vm1  ;;  %3082 = vst.msk [vmem:[%s3743_s4 + $0xa8] sm:$0xff] %vm9885_vm6, %v3050_v43 }
 0x45d   : > { %v3024_v7 = vmul.f32 %v2992_v63, %v9879_v9  ;;  %v3052_v23 = vadd.f32 %v3020_v41, %v9840_v31  ;;  %v2964_v1 = vsel %vm2420_vm3, %v9881_v37, 0.0  ;;  %v2995_v16 = vsub.f32 %v2322_v53, %v2256_v42  ;;  %3081 = vst.msk [vmem:[%s3743_s4 + $0xa0] sm:$0xff] %vm9883_vm5, %v3049_v20  ;;  %vm9886_vm3 = vmmov %vm9835_vm1 }
 0x45e   : > { %v3025_v0 = vmul.f32 %v2993_v50, %v9882_v38  ;;  %v3053_v12 = vadd.f32 %v3021_v57, %v9845_v47  ;;  %v2996_v8 = vsub.f32 %v2323_v19, %v2257_v29  ;;  %v3026_v31 = vmul.f32 %v2994_v27, %v9884_v33  ;;  %3083 = vst.msk [vmem:[%s3743_s4 + $0xb0] sm:$0xff] %vm9886_vm3, %v3051_v15  ;;  %vm9889_vm9 = vmmov %vm9887_vm0 }
 0x45f   : > { %v3054_v11 = vadd.f32 %v3022_v49, %v9850_v48  ;;  %v3027_v40 = vmul.f32 %v2995_v16, %v2963_v61  ;;  %v3055_v22 = vadd.f32 %v3023_v4, %v9867_v35  ;;  %v3056_v59 = vadd.f32 %v3024_v7, %v9871_v25  ;;  %3084 = vst.msk [vmem:[%s3743_s4 + $0xb8] sm:$0xff] %vm9887_vm0, %v3052_v23  ;;  %vm9890_vm12 = vmmov %vm9887_vm0 }
 0x460   : > { %v3028_v47 = vmul.f32 %v2996_v8, %v2964_v1  ;;  %v3057_v58 = vadd.f32 %v3025_v0, %v2254_v5  ;;  %3085 = vst.msk [vmem:[%s3743_s4 + $0xc0] sm:$0xff] %vm9888_vm13, %v3053_v12  ;;  %v3058_v56 = vadd.f32 %v3026_v31, %v2255_v51  ;;  %vm9891_vm8 = vmmov %vm9887_vm0 }
 0x461   : > { %3086 = vst.msk [vmem:[%s3743_s4 + $0xc8] sm:$0xff] %vm9889_vm9, %v3054_v11  ;;  %v3059_v3 = vadd.f32 %v3027_v40, %v2256_v42  ;;  %vm9892_vm11 = vmmov %vm9887_vm0 }
 0x462   : > { %3087 = vst.msk [vmem:[%s3743_s4 + $0xd0] sm:$0xff] %vm9890_vm12, %v3055_v22  ;;  %v3060_v48 = vadd.f32 %v3028_v47, %v2257_v29  ;;  %vm9893_vm14 = vmmov %vm9887_vm0 }
 0x463   : > { %3088 = vst.msk [vmem:[%s3743_s4 + $0xd8] sm:$0xff] %vm9891_vm8, %v3056_v59  ;;  %vm9894_vm1 = vmmov %vm9887_vm0 }
 0x464   : > { %3089 = vst.msk [vmem:[%s3743_s4 + $0xe0] sm:$0xff] %vm9892_vm11, %v3057_v58  ;;  %vm9895_vm15 = vmmov %vm9887_vm0 }
 0x465   : > { %3090 = vst.msk [vmem:[%s3743_s4 + $0xe8] sm:$0xff] %vm9893_vm14, %v3058_v56 }
 0x466   : > { %3091 = vst.msk [vmem:[%s3743_s4 + $0xf0] sm:$0xff] %vm9894_vm1, %v3059_v3 }
 0x467   : > { %3092 = vst.msk [vmem:[%s3743_s4 + $0xf8] sm:$0xff] %vm9895_vm15, %v3060_v48 }
 0x468 PF: > { %s13_s16 = sadd.s32 1, %s3667_s16   ;;  %s9896_s12 = smov %s3659_s14 }
 0x469   : > { %p10_p9 = scmp.ge.s32.totalorder %s13_s16, 8   ;;  %s9897_s13 = smov %s3663_s15 }
 0x46a   : > { %s9898_s14 = smov %s9901_s17  ;;  %s9899_s15 = smov %s9905_s18 }
 0x46b   :  { %12 = sbr.rel (!%p10_p9) target bundleno = 3 (0x3), region = 76 }

</bundles_post_ra>
